<compile_context>
chip_gen: v7x
topology: tpu7x:2x2x1
jax: 0.10.0
libtpu: 0.0.40
codegen_flags: <defaults>
</compile_context>

<pallas_src>
import math

import jax
import jax.numpy as jnp
from jax.experimental import pallas as pl
from jax.experimental.pallas import tpu as pltpu

K_IN, HID, N_OUT = 28 * 28, 1200, 10          # logical dims
K_PAD, H_PAD, N_PAD = 896, 1280, 128          # lane-aligned (multiples of 128)


def _round_up(x, m):
    return ((x + m - 1) // m) * m


def _pad2(a, rows, cols):
    return jnp.pad(a, ((0, rows - a.shape[0]), (0, cols - a.shape[1])))


def teacher_kernel(x_ref, w1_ref, b1_ref, w2_ref, b2_ref, w3_ref, b3_ref, o_ref):
    # fc1 + ReLU (dropout is identity in eval mode)
    h1 = jnp.dot(x_ref[...], w1_ref[...], preferred_element_type=jnp.float32)
    h1 = jnp.maximum(h1 + b1_ref[...], 0.0)
    # fc2 + ReLU
    h2 = jnp.dot(h1.astype(jnp.bfloat16), w2_ref[...],
                 preferred_element_type=jnp.float32)
    h2 = jnp.maximum(h2 + b2_ref[...], 0.0)
    # fc3 (logits, lane-padded to 128)
    out = jnp.dot(h2.astype(jnp.bfloat16), w3_ref[...],
                  preferred_element_type=jnp.float32)
    o_ref[...] = (out + b3_ref[...]).astype(o_ref.dtype)


def teacher_forward(x, params, tm=256):
    """x: any shape with trailing elements a multiple of 784 (e.g. (B,1,28,28))."""
    w1, b1, w2, b2, w3, b3 = params

    x2d = x.reshape(-1, K_IN).astype(jnp.float32)       # == x.view(-1, 784)
    B = x2d.shape[0]

    # Batch tile: multiple of 8 sublanes, capped at `tm`; pad B up to a tile.
    TM = min(tm, _round_up(B, 8))
    B_pad = _round_up(B, TM)

    # Lane-aligned, bf16 operands (zero padding is inert through matmul/ReLU).
    x_p = _pad2(x2d, B_pad, K_PAD).astype(jnp.bfloat16)
    w1_p = _pad2(w1, K_PAD, H_PAD).astype(jnp.bfloat16)
    w2_p = _pad2(w2, H_PAD, H_PAD).astype(jnp.bfloat16)
    w3_p = _pad2(w3, H_PAD, N_PAD).astype(jnp.bfloat16)
    b1_p = _pad2(b1, 1, H_PAD)                           # biases stay f32
    b2_p = _pad2(b2, 1, H_PAD)
    b3_p = _pad2(b3, 1, N_PAD)

    grid = (B_pad // TM,)

    flops = 2 * B * (K_IN * HID + HID * HID + HID * N_OUT)
    bytes_accessed = (x_p.size * 2 + w1_p.size * 2 + w2_p.size * 2
                      + w3_p.size * 2 + (b1_p.size + b2_p.size + b3_p.size) * 4
                      + B_pad * N_PAD * 4)

    out = pl.pallas_call(
        teacher_kernel,
        out_shape=jax.ShapeDtypeStruct((B_pad, N_PAD), jnp.float32),
        grid=grid,
        in_specs=[
            pl.BlockSpec((TM, K_PAD), lambda i: (i, 0)),       # x tile
            pl.BlockSpec((K_PAD, H_PAD), lambda i: (0, 0)),    # w1 (resident)
            pl.BlockSpec((1, H_PAD), lambda i: (0, 0)),        # b1
            pl.BlockSpec((H_PAD, H_PAD), lambda i: (0, 0)),    # w2
            pl.BlockSpec((1, H_PAD), lambda i: (0, 0)),        # b2
            pl.BlockSpec((H_PAD, N_PAD), lambda i: (0, 0)),    # w3
            pl.BlockSpec((1, N_PAD), lambda i: (0, 0)),        # b3
        ],
        out_specs=pl.BlockSpec((TM, N_PAD), lambda i: (i, 0)),
        compiler_params=pltpu.CompilerParams(
            dimension_semantics=("parallel",),
            vmem_limit_bytes=32 << 20,
        ),
        cost_estimate=pl.CostEstimate(
            flops=flops, transcendentals=0, bytes_accessed=bytes_accessed),
    )(x_p, w1_p, b1_p, w2_p, b2_p, w3_p, b3_p)

    return out[:B, :N_OUT]


def init_linear_params(key, fan_in, fan_out):
    """Mimic torch.nn.Linear default init: U(-1/sqrt(fan_in), 1/sqrt(fan_in))."""
    kw, kb = jax.random.split(key)
    bound = 1.0 / math.sqrt(fan_in)
    # stored transposed: (in, out) so the kernel does x @ W_t + b
    w_t = jax.random.uniform(kw, (fan_in, fan_out), jnp.float32, -bound, bound)
    b = jax.random.uniform(kb, (1, fan_out), jnp.float32, -bound, bound)
    return w_t, b


def make_params(key):
    k1, k2, k3 = jax.random.split(key, 3)
    w1, b1 = init_linear_params(k1, K_IN, HID)
    w2, b2 = init_linear_params(k2, HID, HID)
    w3, b3 = init_linear_params(k3, HID, N_OUT)
    return (w1, b1, w2, b2, w3, b3)


if __name__ == "__main__":
    key = jax.random.PRNGKey(0)
    k_params, k_x = jax.random.split(key)

    params = make_params(k_params)

    # Small MNIST-like batch: (batch=2, channels=1, 28, 28) NCHW.
    x = jax.random.normal(k_x, (2, 1, 28, 28), dtype=jnp.float32)

    out = teacher_forward(x, params)
    out = jax.block_until_ready(out)

    # Reference with matching numerics (bf16 operands, f32 accumulation).
    w1, b1, w2, b2, w3, b3 = params
    xb = x.reshape(-1, K_IN).astype(jnp.bfloat16)
    h1 = jnp.dot(xb, w1.astype(jnp.bfloat16),
                 preferred_element_type=jnp.float32) + b1
    h1 = jnp.maximum(h1, 0.0)
    h2 = jnp.dot(h1.astype(jnp.bfloat16), w2.astype(jnp.bfloat16),
                 preferred_element_type=jnp.float32) + b2
    h2 = jnp.maximum(h2, 0.0)
    ref = jnp.dot(h2.astype(jnp.bfloat16), w3.astype(jnp.bfloat16),
                  preferred_element_type=jnp.float32) + b3

    assert out.shape == (2, 10), out.shape
    assert jnp.allclose(out, ref, atol=1e-3, rtol=1e-3), \
        float(jnp.max(jnp.abs(out - ref)))

    print("KERNEL_OK")
</pallas_src>

<mosaic_0001>
module attributes {stable_mosaic.version = 11 : i64} {
  func.func @teacher_kernel(%arg0: i32, %arg1: memref<8x896xbf16, #tpu.memory_space<vmem>>, %arg2: memref<896x1280xbf16, #tpu.memory_space<vmem>>, %arg3: memref<1x1280xf32, #tpu.memory_space<vmem>>, %arg4: memref<1280x1280xbf16, #tpu.memory_space<vmem>>, %arg5: memref<1x1280xf32, #tpu.memory_space<vmem>>, %arg6: memref<1280x128xbf16, #tpu.memory_space<vmem>>, %arg7: memref<1x128xf32, #tpu.memory_space<vmem>>, %arg8: memref<8x128xf32, #tpu.memory_space<vmem>>) attributes {dimension_semantics = [#tpu.dimension_semantics<parallel>], iteration_bounds = array<i64: 1>, scalar_prefetch = 0 : i64, scratch_operands = 0 : i64, tpu.core_type = #tpu.core_type<tc>, window_params = [{transform_indices = @transform_0, window_bounds = array<i64: 8, 896>}, {pipeline_mode = #tpu.pipeline_mode<synchronous>, transform_indices = @transform_1, window_bounds = array<i64: 896, 1280>}, {pipeline_mode = #tpu.pipeline_mode<synchronous>, transform_indices = @transform_2, window_bounds = array<i64: 1, 1280>}, {pipeline_mode = #tpu.pipeline_mode<synchronous>, transform_indices = @transform_3, window_bounds = array<i64: 1280, 1280>}, {pipeline_mode = #tpu.pipeline_mode<synchronous>, transform_indices = @transform_4, window_bounds = array<i64: 1, 1280>}, {pipeline_mode = #tpu.pipeline_mode<synchronous>, transform_indices = @transform_5, window_bounds = array<i64: 1280, 128>}, {pipeline_mode = #tpu.pipeline_mode<synchronous>, transform_indices = @transform_6, window_bounds = array<i64: 1, 128>}, {transform_indices = @transform_7, window_bounds = array<i64: 8, 128>}]} {
    %c0 = arith.constant 0 : index
    %c0_0 = arith.constant 0 : index
    %0 = vector.load %arg1[%c0, %c0_0] : memref<8x896xbf16, #tpu.memory_space<vmem>>, vector<8x896xbf16>
    %c0_1 = arith.constant 0 : index
    %c0_2 = arith.constant 0 : index
    %1 = vector.load %arg2[%c0_1, %c0_2] : memref<896x1280xbf16, #tpu.memory_space<vmem>>, vector<896x1280xbf16>
    %cst = arith.constant dense<0.000000e+00> : vector<8x1280xf32>
    %2 = tpu.matmul %0, %1, %cst {dimension_numbers = #tpu.dot_dimension_numbers<[1], [0], [0], [1], [0, 0, 1, 1], [], []>} : vector<8x896xbf16>, vector<896x1280xbf16>, vector<8x1280xf32> -> vector<8x1280xf32>
    %c0_3 = arith.constant 0 : index
    %c0_4 = arith.constant 0 : index
    %3 = vector.load %arg3[%c0_3, %c0_4] : memref<1x1280xf32, #tpu.memory_space<vmem>>, vector<1x1280xf32>
    %4 = vector.broadcast %3 : vector<1x1280xf32> to vector<8x1280xf32>
    %5 = arith.addf %2, %4 : vector<8x1280xf32>
    %cst_5 = arith.constant 0.000000e+00 : f32
    %6 = vector.broadcast %cst_5 : f32 to vector<8x1280xf32>
    %7 = arith.maximumf %5, %6 : vector<8x1280xf32>
    %8 = arith.truncf %7 : vector<8x1280xf32> to vector<8x1280xbf16>
    %c0_6 = arith.constant 0 : index
    %c0_7 = arith.constant 0 : index
    %9 = vector.load %arg4[%c0_6, %c0_7] : memref<1280x1280xbf16, #tpu.memory_space<vmem>>, vector<1280x1280xbf16>
    %cst_8 = arith.constant dense<0.000000e+00> : vector<8x1280xf32>
    %10 = tpu.matmul %8, %9, %cst_8 {dimension_numbers = #tpu.dot_dimension_numbers<[1], [0], [0], [1], [0, 0, 1, 1], [], []>} : vector<8x1280xbf16>, vector<1280x1280xbf16>, vector<8x1280xf32> -> vector<8x1280xf32>
    %c0_9 = arith.constant 0 : index
    %c0_10 = arith.constant 0 : index
    %11 = vector.load %arg5[%c0_9, %c0_10] : memref<1x1280xf32, #tpu.memory_space<vmem>>, vector<1x1280xf32>
    %12 = vector.broadcast %11 : vector<1x1280xf32> to vector<8x1280xf32>
    %13 = arith.addf %10, %12 : vector<8x1280xf32>
    %cst_11 = arith.constant 0.000000e+00 : f32
    %14 = vector.broadcast %cst_11 : f32 to vector<8x1280xf32>
    %15 = arith.maximumf %13, %14 : vector<8x1280xf32>
    %16 = arith.truncf %15 : vector<8x1280xf32> to vector<8x1280xbf16>
    %c0_12 = arith.constant 0 : index
    %c0_13 = arith.constant 0 : index
    %17 = vector.load %arg6[%c0_12, %c0_13] : memref<1280x128xbf16, #tpu.memory_space<vmem>>, vector<1280x128xbf16>
    %cst_14 = arith.constant dense<0.000000e+00> : vector<8x128xf32>
    %18 = tpu.matmul %16, %17, %cst_14 {dimension_numbers = #tpu.dot_dimension_numbers<[1], [0], [0], [1], [0, 0, 1, 1], [], []>} : vector<8x1280xbf16>, vector<1280x128xbf16>, vector<8x128xf32> -> vector<8x128xf32>
    %c0_15 = arith.constant 0 : index
    %c0_16 = arith.constant 0 : index
    %19 = vector.load %arg7[%c0_15, %c0_16] : memref<1x128xf32, #tpu.memory_space<vmem>>, vector<1x128xf32>
    %20 = vector.broadcast %19 : vector<1x128xf32> to vector<8x128xf32>
    %21 = arith.addf %18, %20 : vector<8x128xf32>
    %c0_17 = arith.constant 0 : index
    %c0_18 = arith.constant 0 : index
    %22 = vector.load %arg8[%c0_17, %c0_18] : memref<8x128xf32, #tpu.memory_space<vmem>>, vector<8x128xf32>
    tpu.vector_store %arg8[%c0_17, %c0_18], %21 {strides = array<i32>} : memref<8x128xf32, #tpu.memory_space<vmem>>, vector<8x128xf32>,
    return
  }
  func.func @transform_0(%arg0: i32) -> (i32, i32) {
    %c0_i32 = arith.constant 0 : i32
    %c0_i32_0 = arith.constant 0 : i32
    return %arg0, %c0_i32 : i32, i32
  }
  func.func @transform_1(%arg0: i32) -> (i32, i32) {
    %c0_i32 = arith.constant 0 : i32
    %c0_i32_0 = arith.constant 0 : i32
    %c0_i32_1 = arith.constant 0 : i32
    return %c0_i32, %c0_i32_0 : i32, i32
  }
  func.func @transform_2(%arg0: i32) -> (i32, i32) {
    %c0_i32 = arith.constant 0 : i32
    %c0_i32_0 = arith.constant 0 : i32
    %c0_i32_1 = arith.constant 0 : i32
    return %c0_i32, %c0_i32_0 : i32, i32
  }
  func.func @transform_3(%arg0: i32) -> (i32, i32) {
    %c0_i32 = arith.constant 0 : i32
    %c0_i32_0 = arith.constant 0 : i32
    %c0_i32_1 = arith.constant 0 : i32
    return %c0_i32, %c0_i32_0 : i32, i32
  }
  func.func @transform_4(%arg0: i32) -> (i32, i32) {
    %c0_i32 = arith.constant 0 : i32
    %c0_i32_0 = arith.constant 0 : i32
    %c0_i32_1 = arith.constant 0 : i32
    return %c0_i32, %c0_i32_0 : i32, i32
  }
  func.func @transform_5(%arg0: i32) -> (i32, i32) {
    %c0_i32 = arith.constant 0 : i32
    %c0_i32_0 = arith.constant 0 : i32
    %c0_i32_1 = arith.constant 0 : i32
    return %c0_i32, %c0_i32_0 : i32, i32
  }
  func.func @transform_6(%arg0: i32) -> (i32, i32) {
    %c0_i32 = arith.constant 0 : i32
    %c0_i32_0 = arith.constant 0 : i32
    %c0_i32_1 = arith.constant 0 : i32
    return %c0_i32, %c0_i32_0 : i32, i32
  }
  func.func @transform_7(%arg0: i32) -> (i32, i32) {
    %c0_i32 = arith.constant 0 : i32
    %c0_i32_0 = arith.constant 0 : i32
    return %arg0, %c0_i32 : i32, i32
  }
}

</mosaic_0001>

<bundles_post_ra>
// kernel: tpu_custom_call.1
= control target key start
LH: loop header
LB: loop body
LE: loop exit
PB: predicated region body
PF: predicated region fallthrough
CT: control target
= control target key end

     0   :  { %12 = vsyncpa [#allocation3], 0  ;;  %s15580_s0 = inlined_call_operand.hbm [shape: bf16[8,896], index: 0, kind: input, shape index: {}]   ;;  %s15581_s1 = inlined_call_operand.hbm [shape: bf16[896,1280], index: 1, kind: input, shape index: {}]   ;;  %s15582_s2 = inlined_call_operand.hbm [shape: f32[1,1280], index: 2, kind: input, shape index: {}]   ;;  %s15583_s3 = inlined_call_operand.hbm [shape: bf16[1280,1280], index: 3, kind: input, shape index: {}]   ;;  %s15584_s4 = inlined_call_operand.hbm [shape: f32[1,1280], index: 4, kind: input, shape index: {}]   ;;  %s15585_s5 = inlined_call_operand.hbm [shape: bf16[1280,128], index: 5, kind: input, shape index: {}]   ;;  %s15586_s6 = inlined_call_operand.hbm [shape: f32[1,128], index: 6, kind: input, shape index: {}]   ;;  %s15587_s7 = inlined_call_operand.hbm [shape: f32[8,128], index: 7, kind: output, shape index: {}]  }
   0x1   :  { %13 = vsyncpa [#allocation6], 0 }
   0x2   :  { %14 = vsyncpa [#allocation9], 0 }
   0x3   :  { %15 = vsyncpa [#allocation12], 0 }
   0x4   :  { %16 = vsyncpa [#allocation4], 0  ;;  %s15211_s24 = smov [#allocation5]   ;;  %s15025_s28 = scalar_lea.hbm %s15581_s1, 71680 }
   0x5   :  { %s32_s25 = sshll.u32 %s15211_s24, 4  ;;  %p15026_p0 = scmp.ne.s32.totalorder %s15581_s1, %s15025_s28  ;;  %s33_s25 = int_to_ptr.vmem [resolvable:$true] %s32_s25 }
   0x6   :  { %p15029_p1 = scmp.lt.u32.totalorder %s15025_s28, %s15581_s1 }
   0x8   :  { %p15031_p2 = pnand %p15029_p1, %p15026_p0 }
   0xa   :  { %15034 = shalt.err (!%p15031_p2)
}
   0xb   :  { %s15035_s10 = scalar_lea.vmem %s33_s25, 71680  ;;  %p15040_p4 = scmp.lt.s32.totalorder %s33_s25, %s33_s25 }
   0xc   :  { %p15036_p3 = scmp.ne.s32.totalorder %s33_s25, %s15035_s10  ;;  %p15041_p5 = scmp.lt.s32.totalorder %s15035_s10, %s15035_s10 }
   0xe   :  { %p15042_p6 = por %p15041_p5, %p15040_p4 }
  0x10   :  { %p15043_p7 = pnand %p15042_p6, %p15036_p3 }
  0x12   :  { %15046 = shalt.err (!%p15043_p7)
}
  0x13   :  { %s15212_s11 = smov 640   ;;  %s15213_s12 = smov 40  }
  0x14   :  { %38 = dma.hbm_to_vmem [thread:$0]  %s15581_s1, 71680, %s33_s25, [#allocation6], %s15212_s11, %s15212_s11, %s15213_s12  }
  0x15   :  { %s15214_s15 = smov [#allocation8]   ;;  %s15215_s17 = smov [#allocation11]  }
  0x16   :  { %s54_s16 = sshll.u32 %s15214_s15, 4  ;;  %s76_s18 = sshll.u32 %s15215_s17, 4  ;;  %s55_s16 = int_to_ptr.vmem [resolvable:$true] %s54_s16  ;;  %s77_s18 = int_to_ptr.vmem [resolvable:$true] %s76_s18 }
  0x17   :  { %s15047_s21 = scalar_lea.hbm %s15583_s3, 102400 }
  0x18   :  { %p15048_p8 = scmp.ne.s32.totalorder %s15583_s3, %s15047_s21  ;;  %p15051_p9 = scmp.lt.u32.totalorder %s15047_s21, %s15583_s3 }
  0x1a   :  { %p15053_p10 = pnand %p15051_p9, %p15048_p8 }
  0x1c   :  { %15056 = shalt.err (!%p15053_p10)
}
  0x1d   :  { %s15057_s1 = scalar_lea.vmem %s55_s16, 102400  ;;  %p15062_p12 = scmp.lt.s32.totalorder %s55_s16, %s55_s16 }
  0x1e   :  { %p15058_p11 = scmp.ne.s32.totalorder %s55_s16, %s15057_s1  ;;  %p15063_p13 = scmp.lt.s32.totalorder %s15057_s1, %s15057_s1 }
  0x20   :  { %p15064_p0 = por %p15063_p13, %p15062_p12 }
  0x22   :  { %p15065_p1 = pnand %p15064_p0, %p15058_p11 }
  0x24   :  { %15068 = shalt.err (!%p15065_p1)
}
  0x25   :  { %60 = dma.hbm_to_vmem [thread:$0]  %s15583_s3, 102400, %s55_s16, [#allocation9], %s15212_s11, %s15212_s11, %s15213_s12  }
  0x26   :  { %s15069_s30 = scalar_lea.hbm %s15585_s5, 10240 }
  0x27   :  { %p15070_p2 = scmp.ne.s32.totalorder %s15585_s5, %s15069_s30  ;;  %p15073_p3 = scmp.lt.u32.totalorder %s15069_s30, %s15585_s5 }
  0x29   :  { %p15075_p4 = pnand %p15073_p3, %p15070_p2 }
  0x2b   :  { %15078 = shalt.err (!%p15075_p4)
}
  0x2c   :  { %s15079_s14 = scalar_lea.vmem %s77_s18, 10240  ;;  %p15084_p6 = scmp.lt.s32.totalorder %s77_s18, %s77_s18 }
  0x2d   :  { %p15080_p5 = scmp.ne.s32.totalorder %s77_s18, %s15079_s14  ;;  %p15085_p7 = scmp.lt.s32.totalorder %s15079_s14, %s15079_s14 }
  0x2f   :  { %p15086_p8 = por %p15085_p7, %p15084_p6 }
  0x31   :  { %p15087_p9 = pnand %p15086_p8, %p15080_p5 }
  0x33   :  { %15090 = shalt.err (!%p15087_p9)
}
  0x34   :  { %s15216_s3 = smov 64   ;;  %s15217_s11 = smov 4  }
  0x35   :  { %82 = dma.hbm_to_vmem [thread:$0]  %s15585_s5, 10240, %s77_s18, [#allocation12], %s15216_s3, %s15216_s3, %s15217_s11  }
  0x36   :  { %s15218_s16 = smov [#allocation2]   ;;  %s15219_s19 = smov [#allocation7]  }
  0x37   :  { %s23_s17 = sshll.u32 %s15218_s16, 4  ;;  %s45_s20 = sshll.u32 %s15219_s19, 4  ;;  %s24_s17 = int_to_ptr.vmem [resolvable:$true] %s23_s17  ;;  %s46_s20 = int_to_ptr.vmem [resolvable:$true] %s45_s20 }
  0x38   :  { %s15091_s23 = scalar_lea.hbm %s15580_s0, 448 }
  0x39   :  { %p15092_p10 = scmp.ne.s32.totalorder %s15580_s0, %s15091_s23  ;;  %p15095_p11 = scmp.lt.u32.totalorder %s15091_s23, %s15580_s0 }
  0x3b   :  { %p15097_p12 = pnand %p15095_p11, %p15092_p10 }
  0x3d   :  { %15100 = shalt.err (!%p15097_p12)
}
  0x3e   :  { %s15101_s5 = scalar_lea.vmem %s24_s17, 448  ;;  %p15106_p0 = scmp.lt.s32.totalorder %s24_s17, %s24_s17 }
  0x3f   :  { %p15102_p13 = scmp.ne.s32.totalorder %s24_s17, %s15101_s5  ;;  %p15107_p1 = scmp.lt.s32.totalorder %s15101_s5, %s15101_s5 }
  0x41   :  { %p15108_p2 = por %p15107_p1, %p15106_p0 }
  0x43   :  { %p15109_p3 = pnand %p15108_p2, %p15102_p13 }
  0x45   :  { %15112 = shalt.err (!%p15109_p3)
}
  0x46   :  { %26 = dma.hbm_to_vmem [thread:$0]  %s15580_s0, 448, %s24_s17, [#allocation3]  }
  0x47   :  { %s15113_s30 = scalar_lea.hbm %s15582_s2, 160 }
  0x48   :  { %p15114_p4 = scmp.ne.s32.totalorder %s15582_s2, %s15113_s30  ;;  %p15117_p5 = scmp.lt.u32.totalorder %s15113_s30, %s15582_s2 }
  0x4a   :  { %p15119_p6 = pnand %p15117_p5, %p15114_p4 }
  0x4c   :  { %15122 = shalt.err (!%p15119_p6)
}
  0x4d   :  { %s15123_s14 = scalar_lea.vmem %s46_s20, 160  ;;  %p15128_p8 = scmp.lt.s32.totalorder %s46_s20, %s46_s20 }
  0x4e   :  { %p15124_p7 = scmp.ne.s32.totalorder %s46_s20, %s15123_s14  ;;  %p15129_p9 = scmp.lt.s32.totalorder %s15123_s14, %s15123_s14 }
  0x50   :  { %p15130_p10 = por %p15129_p9, %p15128_p8 }
  0x52   :  { %p15131_p11 = pnand %p15130_p10, %p15124_p7 }
  0x54   :  { %15134 = shalt.err (!%p15131_p11)
}
  0x55   :  { %48 = dma.hbm_to_vmem [thread:$0]  %s15582_s2, 160, %s46_s20, [#allocation6]  }
  0x56   :  { %s15220_s11 = smov [#allocation10]   ;;  %s15221_s15 = smov [#allocation13]  }
  0x57   :  { %s67_s12 = sshll.u32 %s15220_s11, 4  ;;  %s89_s16 = sshll.u32 %s15221_s15, 4  ;;  %s68_s12 = int_to_ptr.vmem [resolvable:$true] %s67_s12  ;;  %s90_s16 = int_to_ptr.vmem [resolvable:$true] %s89_s16 }
  0x58   :  { %s15135_s21 = scalar_lea.hbm %s15584_s4, 160 }
  0x59   :  { %p15136_p12 = scmp.ne.s32.totalorder %s15584_s4, %s15135_s21  ;;  %p15139_p13 = scmp.lt.u32.totalorder %s15135_s21, %s15584_s4 }
  0x5b   :  { %p15141_p0 = pnand %p15139_p13, %p15136_p12 }
  0x5d   :  { %15144 = shalt.err (!%p15141_p0)
}
  0x5e   :  { %s15145_s2 = scalar_lea.vmem %s68_s12, 160  ;;  %p15150_p2 = scmp.lt.s32.totalorder %s68_s12, %s68_s12 }
  0x5f   :  { %p15146_p1 = scmp.ne.s32.totalorder %s68_s12, %s15145_s2  ;;  %p15151_p3 = scmp.lt.s32.totalorder %s15145_s2, %s15145_s2 }
  0x61   :  { %p15152_p4 = por %p15151_p3, %p15150_p2 }
  0x63   :  { %p15153_p5 = pnand %p15152_p4, %p15146_p1 }
  0x65   :  { %15156 = shalt.err (!%p15153_p5)
}
  0x66   :  { %70 = dma.hbm_to_vmem [thread:$0]  %s15584_s4, 160, %s68_s12, [#allocation9]  }
  0x67   :  { %s15157_s18 = scalar_lea.hbm %s15586_s6, 16 }
  0x68   :  { %p15158_p6 = scmp.ne.s32.totalorder %s15586_s6, %s15157_s18  ;;  %p15161_p7 = scmp.lt.u32.totalorder %s15157_s18, %s15586_s6 }
  0x6a   :  { %p15163_p8 = pnand %p15161_p7, %p15158_p6 }
  0x6c   :  { %15166 = shalt.err (!%p15163_p8)
}
  0x6d   :  { %s15167_s8 = scalar_lea.vmem %s90_s16, 16  ;;  %s15171_s9 = scalar_lea.vmem %s90_s16, 32 }
  0x6e   :  { %p15168_p9 = scmp.ne.s32.totalorder %s90_s16, %s15167_s8  ;;  %p15172_p10 = scmp.lt.s32.totalorder %s90_s16, %s90_s16 }
  0x6f   :  { %p15173_p11 = scmp.lt.s32.totalorder %s15171_s9, %s15167_s8 }
  0x71   :  { %p15174_p12 = por %p15173_p11, %p15172_p10 }
  0x73   :  { %p15175_p13 = pnand %p15174_p12, %p15168_p9 }
  0x75   :  { %15178 = shalt.err (!%p15175_p13)
}
  0x76   :  { %92 = dma.hbm_to_vmem [thread:$0]  %s15586_s6, 16, %s90_s16, [#allocation12]  }
  0x77   :  { %15201 = dma.done.wait [#allocation3], 448  }
  0x78   :  { %15202 = vsyncadd [#allocation3], 4294966848 }
  0x79   :  { %15203 = dma.done.wait [#allocation6], 71840  }
  0x7a   :  { %15204 = vsyncadd [#allocation6], 4294895456 }
  0x7b   :  { %15205 = dma.done.wait [#allocation9], 102560  }
  0x7c   :  { %15206 = vsyncadd [#allocation9], 4294864736 }
  0x7d   :  { %15207 = dma.done.wait [#allocation12], 10256  }
  0x7e   :  { %15208 = vsyncadd [#allocation12], 4294957040  ;;  %v12894_v0 = vld [vmem:[#allocation5 + $0x4] ss:$40 sps:$4 sm:$0xff]   ;;  %v12898_v2 = vld [vmem:[#allocation5] ss:$40 sps:$4 sm:$0xff]  }
  0x7f   :  { %v12896_v1 = vld [vmem:[#allocation5 + $0xc] ss:$40 sps:$4 sm:$0xff]   ;;  %3558 = vmatprep.subr.bf16.mxu0 %v12894_v0  ;;  %v12899_v3 = vld [vmem:[#allocation5 + $0x8] ss:$40 sps:$4 sm:$0xff]   ;;  %v12902_v5 = vld [vmem:[#allocation5 + $0x5c] ss:$40 sps:$4 sm:$0xff]  }
  0x80   :  { %3722 = vmatprep.subr.bf16.mxu1 %v12896_v1  ;;  %v12900_v4 = vld [vmem:[#allocation5 + $0x54] ss:$40 sps:$4 sm:$0xff]   ;;  %3559 = vmatpush1.bf16.msra.mxu0 %v12898_v2  ;;  %v12904_v6 = vld [vmem:[#allocation5 + $0x50] ss:$40 sps:$4 sm:$0xff]   ;;  %v12906_v8 = vld [vmem:[#allocation5 + $0xa4] ss:$40 sps:$4 sm:$0xff]  }
  0x81   :  { %3723 = vmatpush1.bf16.msra.mxu1 %v12899_v3  ;;  %3560 = vmatprep.subr.bf16.mxu0 %v12900_v4  ;;  %v12905_v7 = vld [vmem:[#allocation5 + $0x58] ss:$40 sps:$4 sm:$0xff]   ;;  %v12908_v9 = vld [vmem:[#allocation5 + $0xac] ss:$40 sps:$4 sm:$0xff]   ;;  %v12911_v11 = vld [vmem:[#allocation5 + $0xa8] ss:$40 sps:$4 sm:$0xff]  }
  0x82   :  { %3724 = vmatprep.subr.bf16.mxu1 %v12902_v5  ;;  %v12910_v10 = vld [vmem:[#allocation5 + $0xa0] ss:$40 sps:$4 sm:$0xff]   ;;  %v12912_v12 = vld [vmem:[#allocation5 + $0xf4] ss:$40 sps:$4 sm:$0xff]   ;;  %v12916_v14 = vld [vmem:[#allocation5 + $0xf0] ss:$40 sps:$4 sm:$0xff]  }
  0x83   :  { %v12914_v13 = vld [vmem:[#allocation5 + $0xfc] ss:$40 sps:$4 sm:$0xff]   ;;  %v12917_v15 = vld [vmem:[#allocation5 + $0xf8] ss:$40 sps:$4 sm:$0xff]   ;;  %v12920_v17 = vld [vmem:[#allocation5 + $0x14c] ss:$40 sps:$4 sm:$0xff]  }
  0x84   :  { %3561 = vmatpush1.bf16.msra.mxu0 %v12904_v6  ;;  %v12918_v16 = vld [vmem:[#allocation5 + $0x144] ss:$40 sps:$4 sm:$0xff]   ;;  %v12922_v18 = vld [vmem:[#allocation5 + $0x140] ss:$40 sps:$4 sm:$0xff]   ;;  %v12924_v20 = vld [vmem:[#allocation5 + $0x194] ss:$40 sps:$4 sm:$0xff]  }
  0x85   :  { %3725 = vmatpush1.bf16.msra.mxu1 %v12905_v7  ;;  %3562 = vmatprep.subr.bf16.mxu0 %v12906_v8  ;;  %v12923_v19 = vld [vmem:[#allocation5 + $0x148] ss:$40 sps:$4 sm:$0xff]   ;;  %v12926_v21 = vld [vmem:[#allocation5 + $0x19c] ss:$40 sps:$4 sm:$0xff]   ;;  %v12929_v23 = vld [vmem:[#allocation5 + $0x198] ss:$40 sps:$4 sm:$0xff]  }
  0x86   :  { %3726 = vmatprep.subr.bf16.mxu1 %v12908_v9  ;;  %v12928_v22 = vld [vmem:[#allocation5 + $0x190] ss:$40 sps:$4 sm:$0xff]   ;;  %v12930_v24 = vld [vmem:[#allocation5 + $0x1e4] ss:$40 sps:$4 sm:$0xff]   ;;  %v12934_v26 = vld [vmem:[#allocation5 + $0x1e0] ss:$40 sps:$4 sm:$0xff]  }
  0x87   :  { %v12932_v25 = vld [vmem:[#allocation5 + $0x1ec] ss:$40 sps:$4 sm:$0xff]   ;;  %v12935_v27 = vld [vmem:[#allocation5 + $0x1e8] ss:$40 sps:$4 sm:$0xff]   ;;  %v12938_v29 = vld [vmem:[#allocation5 + $0x23c] ss:$40 sps:$4 sm:$0xff]  }
  0x88   :  { %3563 = vmatpush1.bf16.msra.mxu0 %v12910_v10  ;;  %v12936_v28 = vld [vmem:[#allocation5 + $0x234] ss:$40 sps:$4 sm:$0xff]   ;;  %v12940_v30 = vld [vmem:[#allocation5 + $0x230] ss:$40 sps:$4 sm:$0xff]   ;;  %v12942_v32 = vld [vmem:[#allocation5 + $0x284] ss:$40 sps:$4 sm:$0xff]  }
  0x89   :  { %3727 = vmatpush1.bf16.msra.mxu1 %v12911_v11  ;;  %3564 = vmatprep.subr.bf16.mxu0 %v12912_v12  ;;  %v12941_v31 = vld [vmem:[#allocation5 + $0x238] ss:$40 sps:$4 sm:$0xff]   ;;  %v12944_v33 = vld [vmem:[#allocation5 + $0x28c] ss:$40 sps:$4 sm:$0xff]   ;;  %v12947_v35 = vld [vmem:[#allocation5 + $0x288] ss:$40 sps:$4 sm:$0xff]  }
  0x8a   :  { %3728 = vmatprep.subr.bf16.mxu1 %v12914_v13  ;;  %v12946_v34 = vld [vmem:[#allocation5 + $0x280] ss:$40 sps:$4 sm:$0xff]   ;;  %v12948_v36 = vld [vmem:[#allocation5 + $0x2d4] ss:$40 sps:$4 sm:$0xff]   ;;  %v12952_v38 = vld [vmem:[#allocation5 + $0x2d0] ss:$40 sps:$4 sm:$0xff]  }
  0x8b   :  { %v12950_v37 = vld [vmem:[#allocation5 + $0x2dc] ss:$40 sps:$4 sm:$0xff]   ;;  %v12953_v39 = vld [vmem:[#allocation5 + $0x2d8] ss:$40 sps:$4 sm:$0xff]   ;;  %v12956_v41 = vld [vmem:[#allocation5 + $0x32c] ss:$40 sps:$4 sm:$0xff]  }
  0x8c   :  { %3565 = vmatpush1.bf16.msra.mxu0 %v12916_v14  ;;  %v12954_v40 = vld [vmem:[#allocation5 + $0x324] ss:$40 sps:$4 sm:$0xff]   ;;  %v12958_v42 = vld [vmem:[#allocation5 + $0x320] ss:$40 sps:$4 sm:$0xff]   ;;  %v12960_v44 = vld [vmem:[#allocation5 + $0x374] ss:$40 sps:$4 sm:$0xff]  }
  0x8d   :  { %3729 = vmatpush1.bf16.msra.mxu1 %v12917_v15  ;;  %3566 = vmatprep.subr.bf16.mxu0 %v12918_v16  ;;  %v12959_v43 = vld [vmem:[#allocation5 + $0x328] ss:$40 sps:$4 sm:$0xff]   ;;  %v12962_v45 = vld [vmem:[#allocation5 + $0x37c] ss:$40 sps:$4 sm:$0xff]   ;;  %v12965_v49 = vld [vmem:[#allocation5 + $0x378] ss:$40 sps:$4 sm:$0xff]  }
  0x8e   :  { %3730 = vmatprep.subr.bf16.mxu1 %v12920_v17  ;;  %v115_v46 = vld [vmem:[#allocation2] sm:$0xff]  ;;  %v12964_v47 = vld [vmem:[#allocation5 + $0x370] ss:$40 sps:$4 sm:$0xff]   ;;  %v12968_v51 = vld [vmem:[#allocation5 + $0x3cc] ss:$40 sps:$4 sm:$0xff]   ;;  %s15223_s6 = smov [#allocation14]  }
  0x8f   :  { %v15348_v48 = vcombine.high %v115_v46, %v115_v46  ;;  %v12966_v50 = vld [vmem:[#allocation5 + $0x3c4] ss:$40 sps:$4 sm:$0xff]   ;;  %v12970_v52 = vld [vmem:[#allocation5 + $0x3c0] ss:$40 sps:$4 sm:$0xff]   ;;  %v12972_v54 = vld [vmem:[#allocation5 + $0x414] ss:$40 sps:$4 sm:$0xff]   ;;  %v15352_v5 = vcombine.low %v115_v46, %v115_v46 }
  0x90   :  { %3567 = vmatpush1.bf16.msra.mxu0 %v12922_v18  ;;  %v12971_v53 = vld [vmem:[#allocation5 + $0x3c8] ss:$40 sps:$4 sm:$0xff]   ;;  %v12974_v55 = vld [vmem:[#allocation5 + $0x41c] ss:$40 sps:$4 sm:$0xff]   ;;  %v12977_v57 = vld [vmem:[#allocation5 + $0x418] ss:$40 sps:$4 sm:$0xff]  }
  0x91   :  { %3731 = vmatpush1.bf16.msra.mxu1 %v12923_v19  ;;  %3568 = vmatprep.subr.bf16.mxu0 %v12924_v20  ;;  %v12976_v56 = vld [vmem:[#allocation5 + $0x410] ss:$40 sps:$4 sm:$0xff]   ;;  %v12978_v58 = vld [vmem:[#allocation5 + $0x464] ss:$40 sps:$4 sm:$0xff]   ;;  %v12982_v60 = vld [vmem:[#allocation5 + $0x460] ss:$40 sps:$4 sm:$0xff]  }
  0x92   :  { %3732 = vmatprep.subr.bf16.mxu1 %v12926_v21  ;;  %3590 = vmatprep.mubr.bf16.mxu0 %v15348_v48  ;;  %v12980_v59 = vld [vmem:[#allocation5 + $0x46c] ss:$40 sps:$4 sm:$0xff]   ;;  %v12983_v61 = vld [vmem:[#allocation5 + $0x468] ss:$40 sps:$4 sm:$0xff]   ;;  %v12986_v63 = vld [vmem:[#allocation5 + $0x4bc] ss:$40 sps:$4 sm:$0xff]  }
  0x93   :  { %3754 = vmatprep.mubr.bf16.mxu1 %v15348_v48  ;;  %v12984_v62 = vld [vmem:[#allocation5 + $0x4b4] ss:$40 sps:$4 sm:$0xff]   ;;  %v12988_v0 = vld [vmem:[#allocation5 + $0x4b0] ss:$40 sps:$4 sm:$0xff]   ;;  %v12993_v2 = vld [vmem:[#allocation5 + $0x504] ss:$40 sps:$4 sm:$0xff]  }
  0x94   :  { %3569 = vmatpush1.bf16.msra.mxu0 %v12928_v22  ;;  %v12989_v1 = vld [vmem:[#allocation5 + $0x4b8] ss:$40 sps:$4 sm:$0xff]   ;;  %v12996_v3 = vld [vmem:[#allocation5 + $0x50c] ss:$40 sps:$4 sm:$0xff]   ;;  %v12994_v6 = vld [vmem:[#allocation5 + $0x508] ss:$40 sps:$4 sm:$0xff]  }
  0x95   :  { %3733 = vmatpush1.bf16.msra.mxu1 %v12929_v23  ;;  %3570 = vmatprep.subr.bf16.mxu0 %v12930_v24  ;;  %v12991_v4 = vld [vmem:[#allocation5 + $0x500] ss:$40 sps:$4 sm:$0xff]   ;;  %v13000_v7 = vld [vmem:[#allocation5 + $0x554] ss:$40 sps:$4 sm:$0xff]   ;;  %v12998_v9 = vld [vmem:[#allocation5 + $0x550] ss:$40 sps:$4 sm:$0xff]  }
  0x96   :  { %3734 = vmatprep.subr.bf16.mxu1 %v12932_v25  ;;  %v13003_v8 = vld [vmem:[#allocation5 + $0x55c] ss:$40 sps:$4 sm:$0xff]   ;;  %v13001_v10 = vld [vmem:[#allocation5 + $0x558] ss:$40 sps:$4 sm:$0xff]   ;;  %v13009_v12 = vld [vmem:[#allocation5 + $0x5ac] ss:$40 sps:$4 sm:$0xff]  }
  0x97   :  { %v13006_v11 = vld [vmem:[#allocation5 + $0x5a4] ss:$40 sps:$4 sm:$0xff]   ;;  %v13004_v13 = vld [vmem:[#allocation5 + $0x5a0] ss:$40 sps:$4 sm:$0xff]   ;;  %v13012_v15 = vld [vmem:[#allocation5 + $0x5f4] ss:$40 sps:$4 sm:$0xff]  }
  0x98   :  { %3571 = vmatpush1.bf16.msra.mxu0 %v12934_v26  ;;  %v13007_v14 = vld [vmem:[#allocation5 + $0x5a8] ss:$40 sps:$4 sm:$0xff]   ;;  %v13015_v16 = vld [vmem:[#allocation5 + $0x5fc] ss:$40 sps:$4 sm:$0xff]   ;;  %v13013_v18 = vld [vmem:[#allocation5 + $0x5f8] ss:$40 sps:$4 sm:$0xff]  }
  0x99   :  { %3735 = vmatpush1.bf16.msra.mxu1 %v12935_v27  ;;  %3572 = vmatprep.subr.bf16.mxu0 %v12936_v28  ;;  %v13010_v17 = vld [vmem:[#allocation5 + $0x5f0] ss:$40 sps:$4 sm:$0xff]   ;;  %v13018_v19 = vld [vmem:[#allocation5 + $0x644] ss:$40 sps:$4 sm:$0xff]   ;;  %v13016_v21 = vld [vmem:[#allocation5 + $0x640] ss:$40 sps:$4 sm:$0xff]  }
  0x9a   :  { %3736 = vmatprep.subr.bf16.mxu1 %v12938_v29  ;;  %v13021_v20 = vld [vmem:[#allocation5 + $0x64c] ss:$40 sps:$4 sm:$0xff]   ;;  %v13019_v22 = vld [vmem:[#allocation5 + $0x648] ss:$40 sps:$4 sm:$0xff]   ;;  %v13027_v24 = vld [vmem:[#allocation5 + $0x69c] ss:$40 sps:$4 sm:$0xff]  }
  0x9b   :  { %v13024_v23 = vld [vmem:[#allocation5 + $0x694] ss:$40 sps:$4 sm:$0xff]   ;;  %v13022_v25 = vld [vmem:[#allocation5 + $0x690] ss:$40 sps:$4 sm:$0xff]   ;;  %v13030_v27 = vld [vmem:[#allocation5 + $0x6e4] ss:$40 sps:$4 sm:$0xff]  }
  0x9c   :  { %3573 = vmatpush1.bf16.msra.mxu0 %v12940_v30  ;;  %v13025_v26 = vld [vmem:[#allocation5 + $0x698] ss:$40 sps:$4 sm:$0xff]   ;;  %v13033_v28 = vld [vmem:[#allocation5 + $0x6ec] ss:$40 sps:$4 sm:$0xff]   ;;  %s11151_s13 = sshll.u32 %s15223_s6, 4  ;;  %s11152_s13 = int_to_ptr.vmem [resolvable:$true] %s11151_s13 }
  0x9d   :  { %3737 = vmatpush1.bf16.msra.mxu1 %v12941_v31  ;;  %3574 = vmatprep.subr.bf16.mxu0 %v12942_v32  ;;  %v15356_v29 = vld [vmem:[#allocation2 + $0x8] sm:$0xff]  ;;  %v13028_v31 = vld [vmem:[#allocation5 + $0x6e0] ss:$40 sps:$4 sm:$0xff]   ;;  %s15179_s14 = scalar_lea.vmem %s11152_s13, 128  ;;  %p15184_p1 = scmp.lt.s32.totalorder %s11152_s13, %s11152_s13 }
  0x9e   :  { %3738 = vmatprep.subr.bf16.mxu1 %v12944_v33  ;;  %v15360_v30 = vcombine.high %v15356_v29, %v15356_v29  ;;  %v13031_v32 = vld [vmem:[#allocation5 + $0x6e8] ss:$40 sps:$4 sm:$0xff]   ;;  %v13036_v33 = vld [vmem:[#allocation5 + $0x734] ss:$40 sps:$4 sm:$0xff]   ;;  %p15180_p0 = scmp.ne.s32.totalorder %s11152_s13, %s15179_s14  ;;  %p15185_p2 = scmp.lt.s32.totalorder %s15179_s14, %s15179_s14 }
  0x9f   :  { %v13057_v46 = vld [vmem:[#allocation5 + $0x82c] ss:$40 sps:$4 sm:$0xff]  }
  0xa0   :  { %3575 = vmatpush1.bf16.msra.mxu0 %v12946_v34  ;;  %v13039_v34 = vld [vmem:[#allocation5 + $0x73c] ss:$40 sps:$4 sm:$0xff]   ;;  %p15186_p3 = por %p15185_p2, %p15184_p1 }
  0xa1   :  { %3739 = vmatpush1.bf16.msra.mxu1 %v12947_v35  ;;  %3576 = vmatprep.subr.bf16.mxu0 %v12948_v36  ;;  %v13034_v35 = vld [vmem:[#allocation5 + $0x730] ss:$40 sps:$4 sm:$0xff]  }
  0xa2   :  { %3740 = vmatprep.subr.bf16.mxu1 %v12950_v37  ;;  %v13037_v36 = vld [vmem:[#allocation5 + $0x738] ss:$40 sps:$4 sm:$0xff]   ;;  %v13042_v37 = vld [vmem:[#allocation5 + $0x784] ss:$40 sps:$4 sm:$0xff]   ;;  %p15187_p4 = pnand %p15186_p3, %p15180_p0 }
  0xa4   :  { %3577 = vmatpush1.bf16.msra.mxu0 %v12952_v38  ;;  %v13045_v38 = vld [vmem:[#allocation5 + $0x78c] ss:$40 sps:$4 sm:$0xff]  }
  0xa5   :  { %3741 = vmatpush1.bf16.msra.mxu1 %v12953_v39  ;;  %3578 = vmatprep.subr.bf16.mxu0 %v12954_v40  ;;  %v13040_v39 = vld [vmem:[#allocation5 + $0x780] ss:$40 sps:$4 sm:$0xff]  }
  0xa6   :  { %3742 = vmatprep.subr.bf16.mxu1 %v12956_v41  ;;  %v13043_v40 = vld [vmem:[#allocation5 + $0x788] ss:$40 sps:$4 sm:$0xff]   ;;  %v13048_v41 = vld [vmem:[#allocation5 + $0x7d4] ss:$40 sps:$4 sm:$0xff]  }
  0xa8   :  { %3579 = vmatpush1.bf16.msra.mxu0 %v12958_v42  ;;  %v13051_v42 = vld [vmem:[#allocation5 + $0x7dc] ss:$40 sps:$4 sm:$0xff]  }
  0xa9   :  { %3743 = vmatpush1.bf16.msra.mxu1 %v12959_v43  ;;  %3580 = vmatprep.subr.bf16.mxu0 %v12960_v44  ;;  %v13046_v43 = vld [vmem:[#allocation5 + $0x7d0] ss:$40 sps:$4 sm:$0xff]  }
  0xaa   :  { %3744 = vmatprep.subr.bf16.mxu1 %v12962_v45  ;;  %v13049_v44 = vld [vmem:[#allocation5 + $0x7d8] ss:$40 sps:$4 sm:$0xff]   ;;  %v13054_v45 = vld [vmem:[#allocation5 + $0x824] ss:$40 sps:$4 sm:$0xff]  }
  0xac   :  { %3581 = vmatpush1.bf16.msra.mxu0 %v12964_v47  ;;  %v13052_v47 = vld [vmem:[#allocation5 + $0x820] ss:$40 sps:$4 sm:$0xff]  }
  0xad   :  { %3745 = vmatpush1.bf16.msra.mxu1 %v12965_v49  ;;  %3582 = vmatprep.subr.bf16.mxu0 %v12966_v50  ;;  %v13055_v49 = vld [vmem:[#allocation5 + $0x828] ss:$40 sps:$4 sm:$0xff]   ;;  %v13060_v50 = vld [vmem:[#allocation5 + $0x874] ss:$40 sps:$4 sm:$0xff]  }
  0xae   :  { %3746 = vmatprep.subr.bf16.mxu1 %v12968_v51  ;;  %v13063_v51 = vld [vmem:[#allocation5 + $0x87c] ss:$40 sps:$4 sm:$0xff]  }
  0xb0   :  { %3583 = vmatpush1.bf16.msra.mxu0 %v12970_v52  ;;  %v13058_v52 = vld [vmem:[#allocation5 + $0x870] ss:$40 sps:$4 sm:$0xff]  }
  0xb1   :  { %3747 = vmatpush1.bf16.msra.mxu1 %v12971_v53  ;;  %3584 = vmatprep.subr.bf16.mxu0 %v12972_v54  ;;  %v13061_v53 = vld [vmem:[#allocation5 + $0x878] ss:$40 sps:$4 sm:$0xff]   ;;  %v13066_v54 = vld [vmem:[#allocation5 + $0x8c4] ss:$40 sps:$4 sm:$0xff]  }
  0xb2   :  { %3748 = vmatprep.subr.bf16.mxu1 %v12974_v55  ;;  %v13069_v55 = vld [vmem:[#allocation5 + $0x8cc] ss:$40 sps:$4 sm:$0xff]  }
  0xb4   :  { %3585 = vmatpush1.bf16.msra.mxu0 %v12976_v56  ;;  %v13064_v56 = vld [vmem:[#allocation5 + $0x8c0] ss:$40 sps:$4 sm:$0xff]  }
  0xb5   :  { %3749 = vmatpush1.bf16.msra.mxu1 %v12977_v57  ;;  %3586 = vmatprep.subr.bf16.mxu0 %v12978_v58  ;;  %v13067_v57 = vld [vmem:[#allocation5 + $0x8c8] ss:$40 sps:$4 sm:$0xff]   ;;  %v13072_v58 = vld [vmem:[#allocation5 + $0x914] ss:$40 sps:$4 sm:$0xff]  }
  0xb6   :  { %3750 = vmatprep.subr.bf16.mxu1 %v12980_v59  ;;  %v13075_v59 = vld [vmem:[#allocation5 + $0x91c] ss:$40 sps:$4 sm:$0xff]  }
  0xb8   :  { %3587 = vmatpush1.bf16.msra.mxu0 %v12982_v60  ;;  %v13070_v60 = vld [vmem:[#allocation5 + $0x910] ss:$40 sps:$4 sm:$0xff]  }
  0xb9   :  { %3751 = vmatpush1.bf16.msra.mxu1 %v12983_v61  ;;  %3588 = vmatprep.subr.bf16.mxu0 %v12984_v62  ;;  %v13073_v61 = vld [vmem:[#allocation5 + $0x918] ss:$40 sps:$4 sm:$0xff]   ;;  %v13078_v62 = vld [vmem:[#allocation5 + $0x964] ss:$40 sps:$4 sm:$0xff]  }
  0xba   :  { %3752 = vmatprep.subr.bf16.mxu1 %v12986_v63  ;;  %v13081_v63 = vld [vmem:[#allocation5 + $0x96c] ss:$40 sps:$4 sm:$0xff]  }
  0xbc   :  { %3589 = vmatpush1.bf16.msra.mxu0 %v12988_v0  ;;  %v13076_v0 = vld [vmem:[#allocation5 + $0x960] ss:$40 sps:$4 sm:$0xff]  }
  0xbd   :  { %3753 = vmatpush1.bf16.msra.mxu1 %v12989_v1  ;;  %3599 = vmatprep.subr.bf16.mxu0 %v12993_v2  ;;  %v13079_v1 = vld [vmem:[#allocation5 + $0x968] ss:$40 sps:$4 sm:$0xff]   ;;  %v13084_v2 = vld [vmem:[#allocation5 + $0x9b4] ss:$40 sps:$4 sm:$0xff]  }
  0xbe   :  { %3763 = vmatprep.subr.bf16.mxu1 %v12996_v3  ;;  %v13087_v3 = vld [vmem:[#allocation5 + $0x9bc] ss:$40 sps:$4 sm:$0xff]  }
  0xbf   :  { %3591 = vmatmul.mubr.bf16.vlgmr.msra.gmra.mrb[0].mxu0 %v15352_v5 }
  0xc0   :  { %3755 = vmatmul.mubr.bf16.vlgmr.msra.gmra.mrb[0].mxu1 %v15352_v5  ;;  %3600 = vmatpush1.bf16.msra.mxu0 %v12991_v4  ;;  %v13082_v4 = vld [vmem:[#allocation5 + $0x9b0] ss:$40 sps:$4 sm:$0xff]  }
  0xc1   :  { %3764 = vmatpush1.bf16.msra.mxu1 %v12994_v6  ;;  %3601 = vmatprep.subr.bf16.mxu0 %v13000_v7  ;;  %v13085_v6 = vld [vmem:[#allocation5 + $0x9b8] ss:$40 sps:$4 sm:$0xff]   ;;  %v13091_v7 = vld [vmem:[#allocation5 + $0xa04] ss:$40 sps:$4 sm:$0xff]  }
  0xc2   :  { %3765 = vmatprep.subr.bf16.mxu1 %v13003_v8  ;;  %3631 = vmatprep.mubr.bf16.mxu0 %v15360_v30  ;;  %v13094_v8 = vld [vmem:[#allocation5 + $0xa0c] ss:$40 sps:$4 sm:$0xff]  }
  0xc3   :  { %3795 = vmatprep.mubr.bf16.mxu1 %v15360_v30 }
  0xc4   :  { %3602 = vmatpush1.bf16.msra.mxu0 %v12998_v9  ;;  %v13089_v9 = vld [vmem:[#allocation5 + $0xa00] ss:$40 sps:$4 sm:$0xff]  }
  0xc5   :  { %3766 = vmatpush1.bf16.msra.mxu1 %v13001_v10  ;;  %3603 = vmatprep.subr.bf16.mxu0 %v13006_v11  ;;  %v15366_v10 = vcombine.low %v15356_v29, %v15356_v29  ;;  %v13092_v11 = vld [vmem:[#allocation5 + $0xa08] ss:$40 sps:$4 sm:$0xff]  }
  0xc6   :  { %3767 = vmatprep.subr.bf16.mxu1 %v13009_v12  ;;  %v13098_v12 = vld [vmem:[#allocation5 + $0xa54] ss:$40 sps:$4 sm:$0xff]   ;;  %v13117_v29 = vld [vmem:[#allocation5 + $0xb48] ss:$40 sps:$4 sm:$0xff]  }
  0xc8   :  { %3604 = vmatpush1.bf16.msra.mxu0 %v13004_v13  ;;  %v15368_v13 = vld [vmem:[#allocation2 + $0x10] sm:$0xff] }
  0xc9   :  { %3768 = vmatpush1.bf16.msra.mxu1 %v13007_v14  ;;  %3605 = vmatprep.subr.bf16.mxu0 %v13012_v15  ;;  %v13101_v14 = vld [vmem:[#allocation5 + $0xa5c] ss:$40 sps:$4 sm:$0xff]   ;;  %v15372_v15 = vcombine.high %v15368_v13, %v15368_v13 }
  0xca   :  { %3769 = vmatprep.subr.bf16.mxu1 %v13015_v16  ;;  %v13096_v16 = vld [vmem:[#allocation5 + $0xa50] ss:$40 sps:$4 sm:$0xff]  }
  0xcc   :  { %3606 = vmatpush1.bf16.msra.mxu0 %v13010_v17  ;;  %v13099_v17 = vld [vmem:[#allocation5 + $0xa58] ss:$40 sps:$4 sm:$0xff]  }
  0xcd   :  { %3770 = vmatpush1.bf16.msra.mxu1 %v13013_v18  ;;  %3607 = vmatprep.subr.bf16.mxu0 %v13018_v19  ;;  %v13104_v18 = vld [vmem:[#allocation5 + $0xaa4] ss:$40 sps:$4 sm:$0xff]  }
  0xce   :  { %3771 = vmatprep.subr.bf16.mxu1 %v13021_v20  ;;  %v13107_v19 = vld [vmem:[#allocation5 + $0xaac] ss:$40 sps:$4 sm:$0xff]   ;;  %v13102_v20 = vld [vmem:[#allocation5 + $0xaa0] ss:$40 sps:$4 sm:$0xff]  }
  0xd0   :  { %3608 = vmatpush1.bf16.msra.mxu0 %v13016_v21  ;;  %v13105_v21 = vld [vmem:[#allocation5 + $0xaa8] ss:$40 sps:$4 sm:$0xff]  }
  0xd1   :  { %3772 = vmatpush1.bf16.msra.mxu1 %v13019_v22  ;;  %3609 = vmatprep.subr.bf16.mxu0 %v13024_v23  ;;  %v13110_v22 = vld [vmem:[#allocation5 + $0xaf4] ss:$40 sps:$4 sm:$0xff]  }
  0xd2   :  { %3773 = vmatprep.subr.bf16.mxu1 %v13027_v24  ;;  %v13113_v23 = vld [vmem:[#allocation5 + $0xafc] ss:$40 sps:$4 sm:$0xff]   ;;  %v13108_v24 = vld [vmem:[#allocation5 + $0xaf0] ss:$40 sps:$4 sm:$0xff]  }
  0xd4   :  { %3610 = vmatpush1.bf16.msra.mxu0 %v13022_v25  ;;  %v13111_v25 = vld [vmem:[#allocation5 + $0xaf8] ss:$40 sps:$4 sm:$0xff]  }
  0xd5   :  { %3774 = vmatpush1.bf16.msra.mxu1 %v13025_v26  ;;  %3611 = vmatprep.subr.bf16.mxu0 %v13030_v27  ;;  %v13116_v26 = vld [vmem:[#allocation5 + $0xb44] ss:$40 sps:$4 sm:$0xff]  }
  0xd6   :  { %3775 = vmatprep.subr.bf16.mxu1 %v13033_v28  ;;  %v13119_v27 = vld [vmem:[#allocation5 + $0xb4c] ss:$40 sps:$4 sm:$0xff]   ;;  %v13114_v28 = vld [vmem:[#allocation5 + $0xb40] ss:$40 sps:$4 sm:$0xff]  }
  0xd8   :  { %3612 = vmatpush1.bf16.msra.mxu0 %v13028_v31  ;;  %v13122_v31 = vld [vmem:[#allocation5 + $0xb94] ss:$40 sps:$4 sm:$0xff]  }
  0xd9   :  { %3776 = vmatpush1.bf16.msra.mxu1 %v13031_v32  ;;  %3613 = vmatprep.subr.bf16.mxu0 %v13036_v33  ;;  %v13125_v32 = vld [vmem:[#allocation5 + $0xb9c] ss:$40 sps:$4 sm:$0xff]   ;;  %v13120_v33 = vld [vmem:[#allocation5 + $0xb90] ss:$40 sps:$4 sm:$0xff]  }
  0xda   :  { %3777 = vmatprep.subr.bf16.mxu1 %v13039_v34  ;;  %v13123_v34 = vld [vmem:[#allocation5 + $0xb98] ss:$40 sps:$4 sm:$0xff]  }
  0xdc   :  { %3614 = vmatpush1.bf16.msra.mxu0 %v13034_v35  ;;  %v13128_v35 = vld [vmem:[#allocation5 + $0xbe4] ss:$40 sps:$4 sm:$0xff]  }
  0xdd   :  { %3778 = vmatpush1.bf16.msra.mxu1 %v13037_v36  ;;  %3615 = vmatprep.subr.bf16.mxu0 %v13042_v37  ;;  %v13131_v36 = vld [vmem:[#allocation5 + $0xbec] ss:$40 sps:$4 sm:$0xff]   ;;  %v13126_v37 = vld [vmem:[#allocation5 + $0xbe0] ss:$40 sps:$4 sm:$0xff]  }
  0xde   :  { %3779 = vmatprep.subr.bf16.mxu1 %v13045_v38  ;;  %v13129_v38 = vld [vmem:[#allocation5 + $0xbe8] ss:$40 sps:$4 sm:$0xff]  }
  0xe0   :  { %3616 = vmatpush1.bf16.msra.mxu0 %v13040_v39  ;;  %v13134_v39 = vld [vmem:[#allocation5 + $0xc34] ss:$40 sps:$4 sm:$0xff]  }
  0xe1   :  { %3780 = vmatpush1.bf16.msra.mxu1 %v13043_v40  ;;  %3617 = vmatprep.subr.bf16.mxu0 %v13048_v41  ;;  %v13137_v40 = vld [vmem:[#allocation5 + $0xc3c] ss:$40 sps:$4 sm:$0xff]   ;;  %v13132_v41 = vld [vmem:[#allocation5 + $0xc30] ss:$40 sps:$4 sm:$0xff]  }
  0xe2   :  { %3781 = vmatprep.subr.bf16.mxu1 %v13051_v42  ;;  %v13135_v42 = vld [vmem:[#allocation5 + $0xc38] ss:$40 sps:$4 sm:$0xff]  }
  0xe4   :  { %3618 = vmatpush1.bf16.msra.mxu0 %v13046_v43  ;;  %v13140_v43 = vld [vmem:[#allocation5 + $0xc84] ss:$40 sps:$4 sm:$0xff]  }
  0xe5   :  { %3782 = vmatpush1.bf16.msra.mxu1 %v13049_v44  ;;  %3619 = vmatprep.subr.bf16.mxu0 %v13054_v45  ;;  %v13143_v44 = vld [vmem:[#allocation5 + $0xc8c] ss:$40 sps:$4 sm:$0xff]   ;;  %v13138_v45 = vld [vmem:[#allocation5 + $0xc80] ss:$40 sps:$4 sm:$0xff]  }
  0xe6   :  { %3783 = vmatprep.subr.bf16.mxu1 %v13057_v46  ;;  %v13141_v46 = vld [vmem:[#allocation5 + $0xc88] ss:$40 sps:$4 sm:$0xff]  }
  0xe8   :  { %3620 = vmatpush1.bf16.msra.mxu0 %v13052_v47  ;;  %v13146_v47 = vld [vmem:[#allocation5 + $0xcd4] ss:$40 sps:$4 sm:$0xff]  }
  0xe9   :  { %3784 = vmatpush1.bf16.msra.mxu1 %v13055_v49  ;;  %3621 = vmatprep.subr.bf16.mxu0 %v13060_v50  ;;  %v13149_v49 = vld [vmem:[#allocation5 + $0xcdc] ss:$40 sps:$4 sm:$0xff]   ;;  %v13144_v50 = vld [vmem:[#allocation5 + $0xcd0] ss:$40 sps:$4 sm:$0xff]  }
  0xea   :  { %3785 = vmatprep.subr.bf16.mxu1 %v13063_v51  ;;  %v13147_v51 = vld [vmem:[#allocation5 + $0xcd8] ss:$40 sps:$4 sm:$0xff]  }
  0xec   :  { %3622 = vmatpush1.bf16.msra.mxu0 %v13058_v52  ;;  %v13152_v52 = vld [vmem:[#allocation5 + $0xd24] ss:$40 sps:$4 sm:$0xff]  }
  0xed   :  { %3786 = vmatpush1.bf16.msra.mxu1 %v13061_v53  ;;  %3623 = vmatprep.subr.bf16.mxu0 %v13066_v54  ;;  %v13155_v53 = vld [vmem:[#allocation5 + $0xd2c] ss:$40 sps:$4 sm:$0xff]   ;;  %v13150_v54 = vld [vmem:[#allocation5 + $0xd20] ss:$40 sps:$4 sm:$0xff]  }
  0xee   :  { %3787 = vmatprep.subr.bf16.mxu1 %v13069_v55  ;;  %v13153_v55 = vld [vmem:[#allocation5 + $0xd28] ss:$40 sps:$4 sm:$0xff]  }
  0xf0   :  { %3624 = vmatpush1.bf16.msra.mxu0 %v13064_v56  ;;  %v13158_v56 = vld [vmem:[#allocation5 + $0xd74] ss:$40 sps:$4 sm:$0xff]  }
  0xf1   :  { %3788 = vmatpush1.bf16.msra.mxu1 %v13067_v57  ;;  %3625 = vmatprep.subr.bf16.mxu0 %v13072_v58  ;;  %v13161_v57 = vld [vmem:[#allocation5 + $0xd7c] ss:$40 sps:$4 sm:$0xff]   ;;  %v13156_v58 = vld [vmem:[#allocation5 + $0xd70] ss:$40 sps:$4 sm:$0xff]  }
  0xf2   :  { %3789 = vmatprep.subr.bf16.mxu1 %v13075_v59  ;;  %v13159_v59 = vld [vmem:[#allocation5 + $0xd78] ss:$40 sps:$4 sm:$0xff]  }
  0xf4   :  { %3626 = vmatpush1.bf16.msra.mxu0 %v13070_v60  ;;  %v13164_v60 = vld [vmem:[#allocation5 + $0xdc4] ss:$40 sps:$4 sm:$0xff]  }
  0xf5   :  { %3790 = vmatpush1.bf16.msra.mxu1 %v13073_v61  ;;  %3627 = vmatprep.subr.bf16.mxu0 %v13078_v62  ;;  %v13167_v61 = vld [vmem:[#allocation5 + $0xdcc] ss:$40 sps:$4 sm:$0xff]   ;;  %v13162_v62 = vld [vmem:[#allocation5 + $0xdc0] ss:$40 sps:$4 sm:$0xff]  }
  0xf6   :  { %3791 = vmatprep.subr.bf16.mxu1 %v13081_v63  ;;  %v13165_v63 = vld [vmem:[#allocation5 + $0xdc8] ss:$40 sps:$4 sm:$0xff]  }
  0xf8   :  { %3628 = vmatpush1.bf16.msra.mxu0 %v13076_v0  ;;  %v13170_v0 = vld [vmem:[#allocation5 + $0xe14] ss:$40 sps:$4 sm:$0xff]  }
  0xf9   :  { %3792 = vmatpush1.bf16.msra.mxu1 %v13079_v1  ;;  %3629 = vmatprep.subr.bf16.mxu0 %v13084_v2  ;;  %v13173_v1 = vld [vmem:[#allocation5 + $0xe1c] ss:$40 sps:$4 sm:$0xff]   ;;  %v13168_v2 = vld [vmem:[#allocation5 + $0xe10] ss:$40 sps:$4 sm:$0xff]  }
  0xfa   :  { %3793 = vmatprep.subr.bf16.mxu1 %v13087_v3  ;;  %v13171_v3 = vld [vmem:[#allocation5 + $0xe18] ss:$40 sps:$4 sm:$0xff]  }
  0xfc   :  { %3630 = vmatpush1.bf16.msra.mxu0 %v13082_v4  ;;  %v13176_v4 = vld [vmem:[#allocation5 + $0xe64] ss:$40 sps:$4 sm:$0xff]  }
  0xfd   :  { %3794 = vmatpush1.bf16.msra.mxu1 %v13085_v6  ;;  %3640 = vmatprep.subr.bf16.mxu0 %v13091_v7  ;;  %v13179_v6 = vld [vmem:[#allocation5 + $0xe6c] ss:$40 sps:$4 sm:$0xff]   ;;  %v13174_v7 = vld [vmem:[#allocation5 + $0xe60] ss:$40 sps:$4 sm:$0xff]  }
  0xfe   :  { %3804 = vmatprep.subr.bf16.mxu1 %v13094_v8  ;;  %v13177_v8 = vld [vmem:[#allocation5 + $0xe68] ss:$40 sps:$4 sm:$0xff]  }
  0xff   :  { %3632 = vmatmul.mubr.bf16.vlgmr.msra.gmra.mrb[0].mxu0 %v15366_v10 }
 0x100   :  { %3796 = vmatmul.mubr.bf16.vlgmr.msra.gmra.mrb[0].mxu1 %v15366_v10  ;;  %3641 = vmatpush1.bf16.msra.mxu0 %v13089_v9  ;;  %v13182_v9 = vld [vmem:[#allocation5 + $0xeb4] ss:$40 sps:$4 sm:$0xff]  }
 0x101   :  { %3805 = vmatpush1.bf16.msra.mxu1 %v13092_v11  ;;  %3642 = vmatprep.subr.bf16.mxu0 %v13098_v12  ;;  %v13185_v11 = vld [vmem:[#allocation5 + $0xebc] ss:$40 sps:$4 sm:$0xff]   ;;  %v13180_v12 = vld [vmem:[#allocation5 + $0xeb0] ss:$40 sps:$4 sm:$0xff]  }
 0x102   :  { %3806 = vmatprep.subr.bf16.mxu1 %v13101_v14  ;;  %3672 = vmatprep.mubr.bf16.mxu0 %v15372_v15  ;;  %v13183_v14 = vld [vmem:[#allocation5 + $0xeb8] ss:$40 sps:$4 sm:$0xff]  }
 0x103   :  { %3836 = vmatprep.mubr.bf16.mxu1 %v15372_v15 }
 0x104   :  { %3643 = vmatpush1.bf16.msra.mxu0 %v13096_v16  ;;  %v13189_v16 = vld [vmem:[#allocation5 + $0xf04] ss:$40 sps:$4 sm:$0xff]  }
 0x105   :  { %3807 = vmatpush1.bf16.msra.mxu1 %v13099_v17  ;;  %3644 = vmatprep.subr.bf16.mxu0 %v13104_v18  ;;  %v13192_v17 = vld [vmem:[#allocation5 + $0xf0c] ss:$40 sps:$4 sm:$0xff]   ;;  %v13187_v18 = vld [vmem:[#allocation5 + $0xf00] ss:$40 sps:$4 sm:$0xff]  }
 0x106   :  { %3808 = vmatprep.subr.bf16.mxu1 %v13107_v19  ;;  %v15380_v19 = vcombine.low %v15368_v13, %v15368_v13  ;;  %v13205_v13 = vld [vmem:[#allocation5 + $0xfac] ss:$40 sps:$4 sm:$0xff]  }
 0x108   :  { %3645 = vmatpush1.bf16.msra.mxu0 %v13102_v20  ;;  %v13190_v20 = vld [vmem:[#allocation5 + $0xf08] ss:$40 sps:$4 sm:$0xff]  }
 0x109   :  { %3809 = vmatpush1.bf16.msra.mxu1 %v13105_v21  ;;  %3646 = vmatprep.subr.bf16.mxu0 %v13110_v22  ;;  %v13196_v21 = vld [vmem:[#allocation5 + $0xf54] ss:$40 sps:$4 sm:$0xff]  }
 0x10a   :  { %3810 = vmatprep.subr.bf16.mxu1 %v13113_v23  ;;  %v13199_v22 = vld [vmem:[#allocation5 + $0xf5c] ss:$40 sps:$4 sm:$0xff]   ;;  %v13194_v23 = vld [vmem:[#allocation5 + $0xf50] ss:$40 sps:$4 sm:$0xff]  }
 0x10c   :  { %3647 = vmatpush1.bf16.msra.mxu0 %v13108_v24  ;;  %v13197_v24 = vld [vmem:[#allocation5 + $0xf58] ss:$40 sps:$4 sm:$0xff]  }
 0x10d   :  { %3811 = vmatpush1.bf16.msra.mxu1 %v13111_v25  ;;  %3648 = vmatprep.subr.bf16.mxu0 %v13116_v26  ;;  %v13202_v25 = vld [vmem:[#allocation5 + $0xfa4] ss:$40 sps:$4 sm:$0xff]   ;;  %v15222_v26 = vmov 0  }
 0x10e   :  { %3812 = vmatprep.subr.bf16.mxu1 %v13119_v27  ;;  %v13200_v27 = vld [vmem:[#allocation5 + $0xfa0] ss:$40 sps:$4 sm:$0xff]  }
 0x110   :  { %3649 = vmatpush1.bf16.msra.mxu0 %v13114_v28  ;;  %v13203_v28 = vld [vmem:[#allocation5 + $0xfa8] ss:$40 sps:$4 sm:$0xff]  }
 0x111   :  { %3813 = vmatpush1.bf16.msra.mxu1 %v13117_v29  ;;  %3650 = vmatprep.subr.bf16.mxu0 %v13122_v31  ;;  %v13208_v29 = vld [vmem:[#allocation5 + $0xff4] ss:$40 sps:$4 sm:$0xff]  }
 0x112   :  { %3814 = vmatprep.subr.bf16.mxu1 %v13125_v32  ;;  %v13211_v31 = vld [vmem:[#allocation5 + $0xffc] ss:$40 sps:$4 sm:$0xff]   ;;  %v13206_v32 = vld [vmem:[#allocation5 + $0xff0] ss:$40 sps:$4 sm:$0xff]  }
 0x114   :  { %3651 = vmatpush1.bf16.msra.mxu0 %v13120_v33  ;;  %v13209_v33 = vld [vmem:[#allocation5 + $0xff8] ss:$40 sps:$4 sm:$0xff]  }
 0x115   :  { %3815 = vmatpush1.bf16.msra.mxu1 %v13123_v34  ;;  %3652 = vmatprep.subr.bf16.mxu0 %v13128_v35  ;;  %v13214_v34 = vld [vmem:[#allocation5 + $0x1044] ss:$40 sps:$4 sm:$0xff]  }
 0x116   :  { %3816 = vmatprep.subr.bf16.mxu1 %v13131_v36  ;;  %v13217_v35 = vld [vmem:[#allocation5 + $0x104c] ss:$40 sps:$4 sm:$0xff]   ;;  %v13212_v36 = vld [vmem:[#allocation5 + $0x1040] ss:$40 sps:$4 sm:$0xff]  }
 0x118   :  { %3653 = vmatpush1.bf16.msra.mxu0 %v13126_v37  ;;  %v13215_v37 = vld [vmem:[#allocation5 + $0x1048] ss:$40 sps:$4 sm:$0xff]  }
 0x119   :  { %3817 = vmatpush1.bf16.msra.mxu1 %v13129_v38  ;;  %3654 = vmatprep.subr.bf16.mxu0 %v13134_v39  ;;  %v13220_v38 = vld [vmem:[#allocation5 + $0x1094] ss:$40 sps:$4 sm:$0xff]  }
 0x11a   :  { %3818 = vmatprep.subr.bf16.mxu1 %v13137_v40  ;;  %v13223_v39 = vld [vmem:[#allocation5 + $0x109c] ss:$40 sps:$4 sm:$0xff]   ;;  %v13218_v40 = vld [vmem:[#allocation5 + $0x1090] ss:$40 sps:$4 sm:$0xff]  }
 0x11c   :  { %3655 = vmatpush1.bf16.msra.mxu0 %v13132_v41  ;;  %v13221_v41 = vld [vmem:[#allocation5 + $0x1098] ss:$40 sps:$4 sm:$0xff]  }
 0x11d   :  { %3819 = vmatpush1.bf16.msra.mxu1 %v13135_v42  ;;  %3656 = vmatprep.subr.bf16.mxu0 %v13140_v43  ;;  %v13226_v42 = vld [vmem:[#allocation5 + $0x10e4] ss:$40 sps:$4 sm:$0xff]  }
 0x11e   :  { %3820 = vmatprep.subr.bf16.mxu1 %v13143_v44  ;;  %v13229_v43 = vld [vmem:[#allocation5 + $0x10ec] ss:$40 sps:$4 sm:$0xff]   ;;  %v13224_v44 = vld [vmem:[#allocation5 + $0x10e0] ss:$40 sps:$4 sm:$0xff]  }
 0x120   :  { %3657 = vmatpush1.bf16.msra.mxu0 %v13138_v45  ;;  %v13227_v45 = vld [vmem:[#allocation5 + $0x10e8] ss:$40 sps:$4 sm:$0xff]  }
 0x121   :  { %3821 = vmatpush1.bf16.msra.mxu1 %v13141_v46  ;;  %3658 = vmatprep.subr.bf16.mxu0 %v13146_v47  ;;  %v13232_v46 = vld [vmem:[#allocation5 + $0x1134] ss:$40 sps:$4 sm:$0xff]  }
 0x122   :  { %3822 = vmatprep.subr.bf16.mxu1 %v13149_v49  ;;  %v13235_v47 = vld [vmem:[#allocation5 + $0x113c] ss:$40 sps:$4 sm:$0xff]   ;;  %v13230_v49 = vld [vmem:[#allocation5 + $0x1130] ss:$40 sps:$4 sm:$0xff]  }
 0x124   :  { %3659 = vmatpush1.bf16.msra.mxu0 %v13144_v50  ;;  %v13233_v50 = vld [vmem:[#allocation5 + $0x1138] ss:$40 sps:$4 sm:$0xff]  }
 0x125   :  { %3823 = vmatpush1.bf16.msra.mxu1 %v13147_v51  ;;  %3660 = vmatprep.subr.bf16.mxu0 %v13152_v52  ;;  %v13239_v51 = vld [vmem:[#allocation5 + $0x14] ss:$40 sps:$4 sm:$0xff]  }
 0x126   :  { %3824 = vmatprep.subr.bf16.mxu1 %v13155_v53  ;;  %v13242_v52 = vld [vmem:[#allocation5 + $0x1c] ss:$40 sps:$4 sm:$0xff]  }
 0x127   :  { %v13236_v53 = vld [vmem:[#allocation2 + $0x18] ss:$0 sps:$4 sm:$0xff]  }
 0x128   :  { %3661 = vmatpush1.bf16.msra.mxu0 %v13150_v54  ;;  %v13237_v54 = vld [vmem:[#allocation5 + $0x10] ss:$40 sps:$4 sm:$0xff]  }
 0x129   :  { %3825 = vmatpush1.bf16.msra.mxu1 %v13153_v55  ;;  %3662 = vmatprep.subr.bf16.mxu0 %v13158_v56  ;;  %v13240_v55 = vld [vmem:[#allocation5 + $0x18] ss:$40 sps:$4 sm:$0xff]   ;;  %v13245_v56 = vld [vmem:[#allocation5 + $0x64] ss:$40 sps:$4 sm:$0xff]  }
 0x12a   :  { %3826 = vmatprep.subr.bf16.mxu1 %v13161_v57  ;;  %v13248_v57 = vld [vmem:[#allocation5 + $0x6c] ss:$40 sps:$4 sm:$0xff]  }
 0x12c   :  { %3663 = vmatpush1.bf16.msra.mxu0 %v13156_v58  ;;  %v13243_v58 = vld [vmem:[#allocation5 + $0x60] ss:$40 sps:$4 sm:$0xff]  }
 0x12d   :  { %3827 = vmatpush1.bf16.msra.mxu1 %v13159_v59  ;;  %3664 = vmatprep.subr.bf16.mxu0 %v13164_v60  ;;  %v13246_v59 = vld [vmem:[#allocation5 + $0x68] ss:$40 sps:$4 sm:$0xff]   ;;  %v13251_v60 = vld [vmem:[#allocation5 + $0xb4] ss:$40 sps:$4 sm:$0xff]  }
 0x12e   :  { %3828 = vmatprep.subr.bf16.mxu1 %v13167_v61  ;;  %v13254_v61 = vld [vmem:[#allocation5 + $0xbc] ss:$40 sps:$4 sm:$0xff]  }
 0x130   :  { %3665 = vmatpush1.bf16.msra.mxu0 %v13162_v62  ;;  %v13249_v62 = vld [vmem:[#allocation5 + $0xb0] ss:$40 sps:$4 sm:$0xff]  }
 0x131   :  { %3829 = vmatpush1.bf16.msra.mxu1 %v13165_v63  ;;  %3666 = vmatprep.subr.bf16.mxu0 %v13170_v0  ;;  %v13252_v63 = vld [vmem:[#allocation5 + $0xb8] ss:$40 sps:$4 sm:$0xff]   ;;  %v13257_v0 = vld [vmem:[#allocation5 + $0x104] ss:$40 sps:$4 sm:$0xff]  }
 0x132   :  { %3830 = vmatprep.subr.bf16.mxu1 %v13173_v1  ;;  %v13260_v1 = vld [vmem:[#allocation5 + $0x10c] ss:$40 sps:$4 sm:$0xff]  }
 0x134   :  { %3667 = vmatpush1.bf16.msra.mxu0 %v13168_v2  ;;  %v13255_v2 = vld [vmem:[#allocation5 + $0x100] ss:$40 sps:$4 sm:$0xff]  }
 0x135   :  { %3831 = vmatpush1.bf16.msra.mxu1 %v13171_v3  ;;  %3668 = vmatprep.subr.bf16.mxu0 %v13176_v4  ;;  %v13258_v3 = vld [vmem:[#allocation5 + $0x108] ss:$40 sps:$4 sm:$0xff]   ;;  %v13263_v4 = vld [vmem:[#allocation5 + $0x154] ss:$40 sps:$4 sm:$0xff]  }
 0x136   :  { %3832 = vmatprep.subr.bf16.mxu1 %v13179_v6  ;;  %v13266_v6 = vld [vmem:[#allocation5 + $0x15c] ss:$40 sps:$4 sm:$0xff]  }
 0x138   :  { %3669 = vmatpush1.bf16.msra.mxu0 %v13174_v7  ;;  %v13261_v7 = vld [vmem:[#allocation5 + $0x150] ss:$40 sps:$4 sm:$0xff]  }
 0x139   :  { %3833 = vmatpush1.bf16.msra.mxu1 %v13177_v8  ;;  %3670 = vmatprep.subr.bf16.mxu0 %v13182_v9  ;;  %v13264_v8 = vld [vmem:[#allocation5 + $0x158] ss:$40 sps:$4 sm:$0xff]   ;;  %v13269_v9 = vld [vmem:[#allocation5 + $0x1a4] ss:$40 sps:$4 sm:$0xff]  }
 0x13a   :  { %3834 = vmatprep.subr.bf16.mxu1 %v13185_v11  ;;  %v13272_v11 = vld [vmem:[#allocation5 + $0x1ac] ss:$40 sps:$4 sm:$0xff]  }
 0x13c   :  { %3671 = vmatpush1.bf16.msra.mxu0 %v13180_v12  ;;  %v13267_v12 = vld [vmem:[#allocation5 + $0x1a0] ss:$40 sps:$4 sm:$0xff]  }
 0x13d   :  { %3835 = vmatpush1.bf16.msra.mxu1 %v13183_v14  ;;  %3681 = vmatprep.subr.bf16.mxu0 %v13189_v16  ;;  %v13270_v14 = vld [vmem:[#allocation5 + $0x1a8] ss:$40 sps:$4 sm:$0xff]   ;;  %v13275_v16 = vld [vmem:[#allocation5 + $0x1f4] ss:$40 sps:$4 sm:$0xff]  }
 0x13e   :  { %3845 = vmatprep.subr.bf16.mxu1 %v13192_v17  ;;  %v13278_v17 = vld [vmem:[#allocation5 + $0x1fc] ss:$40 sps:$4 sm:$0xff]  }
 0x13f   :  { %3673 = vmatmul.mubr.bf16.vlgmr.msra.gmra.mrb[0].mxu0 %v15380_v19 }
 0x140   :  { %3837 = vmatmul.mubr.bf16.vlgmr.msra.gmra.mrb[0].mxu1 %v15380_v19  ;;  %3682 = vmatpush1.bf16.msra.mxu0 %v13187_v18  ;;  %v13273_v18 = vld [vmem:[#allocation5 + $0x1f0] ss:$40 sps:$4 sm:$0xff]  }
 0x141   :  { %3846 = vmatpush1.bf16.msra.mxu1 %v13190_v20  ;;  %3683 = vmatprep.subr.bf16.mxu0 %v13196_v21  ;;  %v13276_v20 = vld [vmem:[#allocation5 + $0x1f8] ss:$40 sps:$4 sm:$0xff]   ;;  %v13281_v21 = vld [vmem:[#allocation5 + $0x244] ss:$40 sps:$4 sm:$0xff]  }
 0x142   :  { %3847 = vmatprep.subr.bf16.mxu1 %v13199_v22  ;;  %3713 = vmatprep.mubr.bf16.mxu0 %v15222_v26  ;;  %v13284_v22 = vld [vmem:[#allocation5 + $0x24c] ss:$40 sps:$4 sm:$0xff]  }
 0x143   :  { %3877 = vmatprep.mubr.bf16.mxu1 %v15222_v26 }
 0x144   :  { %3684 = vmatpush1.bf16.msra.mxu0 %v13194_v23  ;;  %v13279_v23 = vld [vmem:[#allocation5 + $0x240] ss:$40 sps:$4 sm:$0xff]  }
 0x145   :  { %3848 = vmatpush1.bf16.msra.mxu1 %v13197_v24  ;;  %3685 = vmatprep.subr.bf16.mxu0 %v13202_v25  ;;  %v13282_v24 = vld [vmem:[#allocation5 + $0x248] ss:$40 sps:$4 sm:$0xff]   ;;  %v13287_v25 = vld [vmem:[#allocation5 + $0x294] ss:$40 sps:$4 sm:$0xff]  }
 0x146   :  { %3849 = vmatprep.subr.bf16.mxu1 %v13205_v13  ;;  %v13290_v13 = vld [vmem:[#allocation5 + $0x29c] ss:$40 sps:$4 sm:$0xff]  }
 0x148   :  { %3686 = vmatpush1.bf16.msra.mxu0 %v13200_v27  ;;  %v13285_v27 = vld [vmem:[#allocation5 + $0x290] ss:$40 sps:$4 sm:$0xff]  }
 0x149   :  { %3850 = vmatpush1.bf16.msra.mxu1 %v13203_v28  ;;  %3687 = vmatprep.subr.bf16.mxu0 %v13208_v29  ;;  %v13288_v28 = vld [vmem:[#allocation5 + $0x298] ss:$40 sps:$4 sm:$0xff]   ;;  %v13293_v29 = vld [vmem:[#allocation5 + $0x2e4] ss:$40 sps:$4 sm:$0xff]  }
 0x14a   :  { %3851 = vmatprep.subr.bf16.mxu1 %v13211_v31  ;;  %v13296_v31 = vld [vmem:[#allocation5 + $0x2ec] ss:$40 sps:$4 sm:$0xff]  }
 0x14c   :  { %3688 = vmatpush1.bf16.msra.mxu0 %v13206_v32  ;;  %v13291_v32 = vld [vmem:[#allocation5 + $0x2e0] ss:$40 sps:$4 sm:$0xff]  }
 0x14d   :  { %3852 = vmatpush1.bf16.msra.mxu1 %v13209_v33  ;;  %3689 = vmatprep.subr.bf16.mxu0 %v13214_v34  ;;  %v13294_v33 = vld [vmem:[#allocation5 + $0x2e8] ss:$40 sps:$4 sm:$0xff]   ;;  %v13299_v34 = vld [vmem:[#allocation5 + $0x334] ss:$40 sps:$4 sm:$0xff]  }
 0x14e   :  { %3853 = vmatprep.subr.bf16.mxu1 %v13217_v35  ;;  %v13302_v35 = vld [vmem:[#allocation5 + $0x33c] ss:$40 sps:$4 sm:$0xff]  }
 0x150   :  { %3690 = vmatpush1.bf16.msra.mxu0 %v13212_v36  ;;  %v13297_v36 = vld [vmem:[#allocation5 + $0x330] ss:$40 sps:$4 sm:$0xff]  }
 0x151   :  { %3854 = vmatpush1.bf16.msra.mxu1 %v13215_v37  ;;  %3691 = vmatprep.subr.bf16.mxu0 %v13220_v38  ;;  %v13300_v37 = vld [vmem:[#allocation5 + $0x338] ss:$40 sps:$4 sm:$0xff]   ;;  %v13305_v38 = vld [vmem:[#allocation5 + $0x384] ss:$40 sps:$4 sm:$0xff]  }
 0x152   :  { %3855 = vmatprep.subr.bf16.mxu1 %v13223_v39  ;;  %v13308_v39 = vld [vmem:[#allocation5 + $0x38c] ss:$40 sps:$4 sm:$0xff]  }
 0x154   :  { %3692 = vmatpush1.bf16.msra.mxu0 %v13218_v40  ;;  %v13303_v40 = vld [vmem:[#allocation5 + $0x380] ss:$40 sps:$4 sm:$0xff]  }
 0x155   :  { %3856 = vmatpush1.bf16.msra.mxu1 %v13221_v41  ;;  %3693 = vmatprep.subr.bf16.mxu0 %v13226_v42  ;;  %v13306_v41 = vld [vmem:[#allocation5 + $0x388] ss:$40 sps:$4 sm:$0xff]   ;;  %v13311_v42 = vld [vmem:[#allocation5 + $0x3d4] ss:$40 sps:$4 sm:$0xff]  }
 0x156   :  { %3857 = vmatprep.subr.bf16.mxu1 %v13229_v43  ;;  %v13314_v43 = vld [vmem:[#allocation5 + $0x3dc] ss:$40 sps:$4 sm:$0xff]  }
 0x158   :  { %3694 = vmatpush1.bf16.msra.mxu0 %v13224_v44  ;;  %v13309_v44 = vld [vmem:[#allocation5 + $0x3d0] ss:$40 sps:$4 sm:$0xff]  }
 0x159   :  { %3858 = vmatpush1.bf16.msra.mxu1 %v13227_v45  ;;  %3695 = vmatprep.subr.bf16.mxu0 %v13232_v46  ;;  %v13312_v45 = vld [vmem:[#allocation5 + $0x3d8] ss:$40 sps:$4 sm:$0xff]   ;;  %v13317_v46 = vld [vmem:[#allocation5 + $0x424] ss:$40 sps:$4 sm:$0xff]  }
 0x15a   :  { %3859 = vmatprep.subr.bf16.mxu1 %v13235_v47  ;;  %v13320_v47 = vld [vmem:[#allocation5 + $0x42c] ss:$40 sps:$4 sm:$0xff]  }
 0x15c   :  { %3696 = vmatpush1.bf16.msra.mxu0 %v13230_v49  ;;  %v13315_v49 = vld [vmem:[#allocation5 + $0x420] ss:$40 sps:$4 sm:$0xff]  }
 0x15d   :  { %3860 = vmatpush1.bf16.msra.mxu1 %v13233_v50  ;;  %3886 = vmatprep.subr.bf16.mxu0 %v13239_v51  ;;  %v13318_v50 = vld [vmem:[#allocation5 + $0x428] ss:$40 sps:$4 sm:$0xff]   ;;  %v13323_v51 = vld [vmem:[#allocation5 + $0x474] ss:$40 sps:$4 sm:$0xff]  }
 0x15e   :  { %4050 = vmatprep.subr.bf16.mxu1 %v13242_v52  ;;  %v13326_v52 = vld [vmem:[#allocation5 + $0x47c] ss:$40 sps:$4 sm:$0xff]  }
 0x15f   :  { %3714 = vmatmul.mubr.bf16.vlgmr.msra.gmra.mrb[0].mxu0 %v13236_v53 }
 0x160   :  { %3878 = vmatmul.mubr.bf16.vlgmr.msra.gmra.mrb[0].mxu1 %v13236_v53  ;;  %3887 = vmatpush1.bf16.msra.mxu0 %v13237_v54  ;;  %v13321_v53 = vld [vmem:[#allocation5 + $0x470] ss:$40 sps:$4 sm:$0xff]  }
 0x161   :  { %4051 = vmatpush1.bf16.msra.mxu1 %v13240_v55  ;;  %3888 = vmatprep.subr.bf16.mxu0 %v13245_v56  ;;  %v13324_v54 = vld [vmem:[#allocation5 + $0x478] ss:$40 sps:$4 sm:$0xff]   ;;  %v13329_v55 = vld [vmem:[#allocation5 + $0x4c4] ss:$40 sps:$4 sm:$0xff]  }
 0x162   :  { %4052 = vmatprep.subr.bf16.mxu1 %v13248_v57  ;;  %3918 = vmatprep.mubr.bf16.mxu0 %v15348_v48  ;;  %v13332_v56 = vld [vmem:[#allocation5 + $0x4cc] ss:$40 sps:$4 sm:$0xff]   ;;  %v13327_v57 = vld [vmem:[#allocation5 + $0x4c0] ss:$40 sps:$4 sm:$0xff]  }
 0x163   :  { %4082 = vmatprep.mubr.bf16.mxu1 %v15348_v48 }
 0x164   :  { %3889 = vmatpush1.bf16.msra.mxu0 %v13243_v58  ;;  %v13330_v58 = vld [vmem:[#allocation5 + $0x4c8] ss:$40 sps:$4 sm:$0xff]  }
 0x165   :  { %4053 = vmatpush1.bf16.msra.mxu1 %v13246_v59  ;;  %3890 = vmatprep.subr.bf16.mxu0 %v13251_v60  ;;  %v13335_v59 = vld [vmem:[#allocation5 + $0x514] ss:$40 sps:$4 sm:$0xff]  }
 0x166   :  { %4054 = vmatprep.subr.bf16.mxu1 %v13254_v61  ;;  %v13338_v60 = vld [vmem:[#allocation5 + $0x51c] ss:$40 sps:$4 sm:$0xff]   ;;  %v13333_v61 = vld [vmem:[#allocation5 + $0x510] ss:$40 sps:$4 sm:$0xff]  }
 0x168   :  { %3891 = vmatpush1.bf16.msra.mxu0 %v13249_v62  ;;  %v13336_v62 = vld [vmem:[#allocation5 + $0x518] ss:$40 sps:$4 sm:$0xff]  }
 0x169   :  { %4055 = vmatpush1.bf16.msra.mxu1 %v13252_v63  ;;  %3892 = vmatprep.subr.bf16.mxu0 %v13257_v0  ;;  %v13341_v63 = vld [vmem:[#allocation5 + $0x564] ss:$40 sps:$4 sm:$0xff]  }
 0x16a   :  { %4056 = vmatprep.subr.bf16.mxu1 %v13260_v1  ;;  %v13344_v0 = vld [vmem:[#allocation5 + $0x56c] ss:$40 sps:$4 sm:$0xff]   ;;  %v13339_v1 = vld [vmem:[#allocation5 + $0x560] ss:$40 sps:$4 sm:$0xff]  }
 0x16c   :  { %3893 = vmatpush1.bf16.msra.mxu0 %v13255_v2  ;;  %v13342_v2 = vld [vmem:[#allocation5 + $0x568] ss:$40 sps:$4 sm:$0xff]  }
 0x16d   :  { %4057 = vmatpush1.bf16.msra.mxu1 %v13258_v3  ;;  %3894 = vmatprep.subr.bf16.mxu0 %v13263_v4  ;;  %v13347_v3 = vld [vmem:[#allocation5 + $0x5b4] ss:$40 sps:$4 sm:$0xff]  }
 0x16e   :  { %4058 = vmatprep.subr.bf16.mxu1 %v13266_v6  ;;  %v13350_v4 = vld [vmem:[#allocation5 + $0x5bc] ss:$40 sps:$4 sm:$0xff]   ;;  %v13345_v6 = vld [vmem:[#allocation5 + $0x5b0] ss:$40 sps:$4 sm:$0xff]  }
 0x170   :  { %3895 = vmatpush1.bf16.msra.mxu0 %v13261_v7  ;;  %v13348_v7 = vld [vmem:[#allocation5 + $0x5b8] ss:$40 sps:$4 sm:$0xff]  }
 0x171   :  { %4059 = vmatpush1.bf16.msra.mxu1 %v13264_v8  ;;  %3896 = vmatprep.subr.bf16.mxu0 %v13269_v9  ;;  %v13353_v8 = vld [vmem:[#allocation5 + $0x604] ss:$40 sps:$4 sm:$0xff]  }
 0x172   :  { %4060 = vmatprep.subr.bf16.mxu1 %v13272_v11  ;;  %v13356_v9 = vld [vmem:[#allocation5 + $0x60c] ss:$40 sps:$4 sm:$0xff]   ;;  %v13351_v11 = vld [vmem:[#allocation5 + $0x600] ss:$40 sps:$4 sm:$0xff]  }
 0x174   :  { %3897 = vmatpush1.bf16.msra.mxu0 %v13267_v12  ;;  %v13354_v12 = vld [vmem:[#allocation5 + $0x608] ss:$40 sps:$4 sm:$0xff]  }
 0x175   :  { %4061 = vmatpush1.bf16.msra.mxu1 %v13270_v14  ;;  %3898 = vmatprep.subr.bf16.mxu0 %v13275_v16  ;;  %v13359_v14 = vld [vmem:[#allocation5 + $0x654] ss:$40 sps:$4 sm:$0xff]  }
 0x176   :  { %4062 = vmatprep.subr.bf16.mxu1 %v13278_v17  ;;  %v13362_v16 = vld [vmem:[#allocation5 + $0x65c] ss:$40 sps:$4 sm:$0xff]   ;;  %v13357_v17 = vld [vmem:[#allocation5 + $0x650] ss:$40 sps:$4 sm:$0xff]  }
 0x178   :  { %3899 = vmatpush1.bf16.msra.mxu0 %v13273_v18  ;;  %v13360_v18 = vld [vmem:[#allocation5 + $0x658] ss:$40 sps:$4 sm:$0xff]  }
 0x179   :  { %4063 = vmatpush1.bf16.msra.mxu1 %v13276_v20  ;;  %3900 = vmatprep.subr.bf16.mxu0 %v13281_v21  ;;  %v13365_v20 = vld [vmem:[#allocation5 + $0x6a4] ss:$40 sps:$4 sm:$0xff]  }
 0x17a   :  { %4064 = vmatprep.subr.bf16.mxu1 %v13284_v22  ;;  %v13368_v21 = vld [vmem:[#allocation5 + $0x6ac] ss:$40 sps:$4 sm:$0xff]   ;;  %v13363_v22 = vld [vmem:[#allocation5 + $0x6a0] ss:$40 sps:$4 sm:$0xff]  }
 0x17c   :  { %3901 = vmatpush1.bf16.msra.mxu0 %v13279_v23  ;;  %v13366_v23 = vld [vmem:[#allocation5 + $0x6a8] ss:$40 sps:$4 sm:$0xff]  }
 0x17d   :  { %4065 = vmatpush1.bf16.msra.mxu1 %v13282_v24  ;;  %3902 = vmatprep.subr.bf16.mxu0 %v13287_v25  ;;  %v13371_v24 = vld [vmem:[#allocation5 + $0x6f4] ss:$40 sps:$4 sm:$0xff]  }
 0x17e   :  { %4066 = vmatprep.subr.bf16.mxu1 %v13290_v13  ;;  %v13374_v25 = vld [vmem:[#allocation5 + $0x6fc] ss:$40 sps:$4 sm:$0xff]   ;;  %v13369_v13 = vld [vmem:[#allocation5 + $0x6f0] ss:$40 sps:$4 sm:$0xff]  }
 0x180   :  { %3903 = vmatpush1.bf16.msra.mxu0 %v13285_v27  ;;  %v13372_v27 = vld [vmem:[#allocation5 + $0x6f8] ss:$40 sps:$4 sm:$0xff]  }
 0x181   :  { %4067 = vmatpush1.bf16.msra.mxu1 %v13288_v28  ;;  %3904 = vmatprep.subr.bf16.mxu0 %v13293_v29  ;;  %v13377_v28 = vld [vmem:[#allocation5 + $0x744] ss:$40 sps:$4 sm:$0xff]  }
 0x182   :  { %4068 = vmatprep.subr.bf16.mxu1 %v13296_v31  ;;  %v13380_v29 = vld [vmem:[#allocation5 + $0x74c] ss:$40 sps:$4 sm:$0xff]   ;;  %v13375_v31 = vld [vmem:[#allocation5 + $0x740] ss:$40 sps:$4 sm:$0xff]  }
 0x184   :  { %3905 = vmatpush1.bf16.msra.mxu0 %v13291_v32  ;;  %v13378_v32 = vld [vmem:[#allocation5 + $0x748] ss:$40 sps:$4 sm:$0xff]  }
 0x185   :  { %4069 = vmatpush1.bf16.msra.mxu1 %v13294_v33  ;;  %3906 = vmatprep.subr.bf16.mxu0 %v13299_v34  ;;  %v13383_v33 = vld [vmem:[#allocation5 + $0x794] ss:$40 sps:$4 sm:$0xff]  }
 0x186   :  { %4070 = vmatprep.subr.bf16.mxu1 %v13302_v35  ;;  %v13386_v34 = vld [vmem:[#allocation5 + $0x79c] ss:$40 sps:$4 sm:$0xff]   ;;  %v13381_v35 = vld [vmem:[#allocation5 + $0x790] ss:$40 sps:$4 sm:$0xff]  }
 0x188   :  { %3907 = vmatpush1.bf16.msra.mxu0 %v13297_v36  ;;  %v13384_v36 = vld [vmem:[#allocation5 + $0x798] ss:$40 sps:$4 sm:$0xff]  }
 0x189   :  { %4071 = vmatpush1.bf16.msra.mxu1 %v13300_v37  ;;  %3908 = vmatprep.subr.bf16.mxu0 %v13305_v38  ;;  %v13389_v37 = vld [vmem:[#allocation5 + $0x7e4] ss:$40 sps:$4 sm:$0xff]  }
 0x18a   :  { %4072 = vmatprep.subr.bf16.mxu1 %v13308_v39  ;;  %v13392_v38 = vld [vmem:[#allocation5 + $0x7ec] ss:$40 sps:$4 sm:$0xff]   ;;  %v13387_v39 = vld [vmem:[#allocation5 + $0x7e0] ss:$40 sps:$4 sm:$0xff]  }
 0x18c   :  { %3909 = vmatpush1.bf16.msra.mxu0 %v13303_v40  ;;  %v13390_v40 = vld [vmem:[#allocation5 + $0x7e8] ss:$40 sps:$4 sm:$0xff]  }
 0x18d   :  { %4073 = vmatpush1.bf16.msra.mxu1 %v13306_v41  ;;  %3910 = vmatprep.subr.bf16.mxu0 %v13311_v42  ;;  %v13395_v41 = vld [vmem:[#allocation5 + $0x834] ss:$40 sps:$4 sm:$0xff]  }
 0x18e   :  { %4074 = vmatprep.subr.bf16.mxu1 %v13314_v43  ;;  %v13398_v42 = vld [vmem:[#allocation5 + $0x83c] ss:$40 sps:$4 sm:$0xff]   ;;  %v13393_v43 = vld [vmem:[#allocation5 + $0x830] ss:$40 sps:$4 sm:$0xff]  }
 0x190   :  { %3911 = vmatpush1.bf16.msra.mxu0 %v13309_v44  ;;  %v13396_v44 = vld [vmem:[#allocation5 + $0x838] ss:$40 sps:$4 sm:$0xff]  }
 0x191   :  { %4075 = vmatpush1.bf16.msra.mxu1 %v13312_v45  ;;  %3912 = vmatprep.subr.bf16.mxu0 %v13317_v46  ;;  %v13401_v45 = vld [vmem:[#allocation5 + $0x884] ss:$40 sps:$4 sm:$0xff]  }
 0x192   :  { %4076 = vmatprep.subr.bf16.mxu1 %v13320_v47  ;;  %v13404_v46 = vld [vmem:[#allocation5 + $0x88c] ss:$40 sps:$4 sm:$0xff]   ;;  %v13399_v47 = vld [vmem:[#allocation5 + $0x880] ss:$40 sps:$4 sm:$0xff]  }
 0x194   :  { %3913 = vmatpush1.bf16.msra.mxu0 %v13315_v49  ;;  %v13402_v49 = vld [vmem:[#allocation5 + $0x888] ss:$40 sps:$4 sm:$0xff]  }
 0x195   :  { %4077 = vmatpush1.bf16.msra.mxu1 %v13318_v50  ;;  %3914 = vmatprep.subr.bf16.mxu0 %v13323_v51  ;;  %v13407_v50 = vld [vmem:[#allocation5 + $0x8d4] ss:$40 sps:$4 sm:$0xff]  }
 0x196   :  { %4078 = vmatprep.subr.bf16.mxu1 %v13326_v52  ;;  %v13410_v51 = vld [vmem:[#allocation5 + $0x8dc] ss:$40 sps:$4 sm:$0xff]   ;;  %v13405_v52 = vld [vmem:[#allocation5 + $0x8d0] ss:$40 sps:$4 sm:$0xff]  }
 0x198   :  { %3915 = vmatpush1.bf16.msra.mxu0 %v13321_v53  ;;  %v13408_v53 = vld [vmem:[#allocation5 + $0x8d8] ss:$40 sps:$4 sm:$0xff]  }
 0x199   :  { %4079 = vmatpush1.bf16.msra.mxu1 %v13324_v54  ;;  %3916 = vmatprep.subr.bf16.mxu0 %v13329_v55  ;;  %v13413_v54 = vld [vmem:[#allocation5 + $0x924] ss:$40 sps:$4 sm:$0xff]  }
 0x19a   :  { %4080 = vmatprep.subr.bf16.mxu1 %v13332_v56  ;;  %v13416_v55 = vld [vmem:[#allocation5 + $0x92c] ss:$40 sps:$4 sm:$0xff]   ;;  %v13411_v56 = vld [vmem:[#allocation5 + $0x920] ss:$40 sps:$4 sm:$0xff]  }
 0x19c   :  { %3917 = vmatpush1.bf16.msra.mxu0 %v13327_v57  ;;  %v13414_v57 = vld [vmem:[#allocation5 + $0x928] ss:$40 sps:$4 sm:$0xff]  }
 0x19d   :  { %4081 = vmatpush1.bf16.msra.mxu1 %v13330_v58  ;;  %3927 = vmatprep.subr.bf16.mxu0 %v13335_v59  ;;  %v13419_v58 = vld [vmem:[#allocation5 + $0x974] ss:$40 sps:$4 sm:$0xff]  }
 0x19e   :  { %4091 = vmatprep.subr.bf16.mxu1 %v13338_v60  ;;  %v13422_v59 = vld [vmem:[#allocation5 + $0x97c] ss:$40 sps:$4 sm:$0xff]   ;;  %v13417_v60 = vld [vmem:[#allocation5 + $0x970] ss:$40 sps:$4 sm:$0xff]  }
 0x19f   :  { %3919 = vmatmul.mubr.bf16.vlgmr.msra.gmra.mrb[4].mxu0 %v15352_v5 }
 0x1a0   :  { %4083 = vmatmul.mubr.bf16.vlgmr.msra.gmra.mrb[4].mxu1 %v15352_v5  ;;  %3928 = vmatpush1.bf16.msra.mxu0 %v13333_v61  ;;  %v13420_v61 = vld [vmem:[#allocation5 + $0x978] ss:$40 sps:$4 sm:$0xff]  }
 0x1a1   :  { %4092 = vmatpush1.bf16.msra.mxu1 %v13336_v62  ;;  %3929 = vmatprep.subr.bf16.mxu0 %v13341_v63  ;;  %v13425_v62 = vld [vmem:[#allocation5 + $0x9c4] ss:$40 sps:$4 sm:$0xff]  }
 0x1a2   :  { %4093 = vmatprep.subr.bf16.mxu1 %v13344_v0  ;;  %3959 = vmatprep.mubr.bf16.mxu0 %v15360_v30  ;;  %v13428_v63 = vld [vmem:[#allocation5 + $0x9cc] ss:$40 sps:$4 sm:$0xff]   ;;  %v13423_v0 = vld [vmem:[#allocation5 + $0x9c0] ss:$40 sps:$4 sm:$0xff]  }
 0x1a3   :  { %4123 = vmatprep.mubr.bf16.mxu1 %v15360_v30 }
 0x1a4   :  { %3930 = vmatpush1.bf16.msra.mxu0 %v13339_v1  ;;  %v13426_v1 = vld [vmem:[#allocation5 + $0x9c8] ss:$40 sps:$4 sm:$0xff]  }
 0x1a5   :  { %4094 = vmatpush1.bf16.msra.mxu1 %v13342_v2  ;;  %3931 = vmatprep.subr.bf16.mxu0 %v13347_v3  ;;  %v13431_v2 = vld [vmem:[#allocation5 + $0xa14] ss:$40 sps:$4 sm:$0xff]  }
 0x1a6   :  { %4095 = vmatprep.subr.bf16.mxu1 %v13350_v4  ;;  %v13434_v3 = vld [vmem:[#allocation5 + $0xa1c] ss:$40 sps:$4 sm:$0xff]   ;;  %v13429_v4 = vld [vmem:[#allocation5 + $0xa10] ss:$40 sps:$4 sm:$0xff]  }
 0x1a8   :  { %3932 = vmatpush1.bf16.msra.mxu0 %v13345_v6  ;;  %v13432_v6 = vld [vmem:[#allocation5 + $0xa18] ss:$40 sps:$4 sm:$0xff]  }
 0x1a9   :  { %4096 = vmatpush1.bf16.msra.mxu1 %v13348_v7  ;;  %3933 = vmatprep.subr.bf16.mxu0 %v13353_v8  ;;  %v13437_v7 = vld [vmem:[#allocation5 + $0xa64] ss:$40 sps:$4 sm:$0xff]  }
 0x1aa   :  { %4097 = vmatprep.subr.bf16.mxu1 %v13356_v9  ;;  %v13440_v8 = vld [vmem:[#allocation5 + $0xa6c] ss:$40 sps:$4 sm:$0xff]   ;;  %v13435_v9 = vld [vmem:[#allocation5 + $0xa60] ss:$40 sps:$4 sm:$0xff]  }
 0x1ac   :  { %3934 = vmatpush1.bf16.msra.mxu0 %v13351_v11  ;;  %v13438_v11 = vld [vmem:[#allocation5 + $0xa68] ss:$40 sps:$4 sm:$0xff]  }
 0x1ad   :  { %4098 = vmatpush1.bf16.msra.mxu1 %v13354_v12  ;;  %3935 = vmatprep.subr.bf16.mxu0 %v13359_v14  ;;  %v13443_v12 = vld [vmem:[#allocation5 + $0xab4] ss:$40 sps:$4 sm:$0xff]  }
 0x1ae   :  { %4099 = vmatprep.subr.bf16.mxu1 %v13362_v16  ;;  %v13446_v14 = vld [vmem:[#allocation5 + $0xabc] ss:$40 sps:$4 sm:$0xff]   ;;  %v13441_v16 = vld [vmem:[#allocation5 + $0xab0] ss:$40 sps:$4 sm:$0xff]  }
 0x1b0   :  { %3936 = vmatpush1.bf16.msra.mxu0 %v13357_v17  ;;  %v13444_v17 = vld [vmem:[#allocation5 + $0xab8] ss:$40 sps:$4 sm:$0xff]  }
 0x1b1   :  { %4100 = vmatpush1.bf16.msra.mxu1 %v13360_v18  ;;  %3937 = vmatprep.subr.bf16.mxu0 %v13365_v20  ;;  %v13449_v18 = vld [vmem:[#allocation5 + $0xb04] ss:$40 sps:$4 sm:$0xff]  }
 0x1b2   :  { %4101 = vmatprep.subr.bf16.mxu1 %v13368_v21  ;;  %v13452_v20 = vld [vmem:[#allocation5 + $0xb0c] ss:$40 sps:$4 sm:$0xff]   ;;  %v13447_v21 = vld [vmem:[#allocation5 + $0xb00] ss:$40 sps:$4 sm:$0xff]  }
 0x1b4   :  { %3938 = vmatpush1.bf16.msra.mxu0 %v13363_v22  ;;  %v13450_v22 = vld [vmem:[#allocation5 + $0xb08] ss:$40 sps:$4 sm:$0xff]  }
 0x1b5   :  { %4102 = vmatpush1.bf16.msra.mxu1 %v13366_v23  ;;  %3939 = vmatprep.subr.bf16.mxu0 %v13371_v24  ;;  %v13455_v23 = vld [vmem:[#allocation5 + $0xb54] ss:$40 sps:$4 sm:$0xff]  }
 0x1b6   :  { %4103 = vmatprep.subr.bf16.mxu1 %v13374_v25  ;;  %v13458_v24 = vld [vmem:[#allocation5 + $0xb5c] ss:$40 sps:$4 sm:$0xff]   ;;  %v13453_v25 = vld [vmem:[#allocation5 + $0xb50] ss:$40 sps:$4 sm:$0xff]  }
 0x1b8   :  { %3940 = vmatpush1.bf16.msra.mxu0 %v13369_v13  ;;  %v13456_v13 = vld [vmem:[#allocation5 + $0xb58] ss:$40 sps:$4 sm:$0xff]  }
 0x1b9   :  { %4104 = vmatpush1.bf16.msra.mxu1 %v13372_v27  ;;  %3941 = vmatprep.subr.bf16.mxu0 %v13377_v28  ;;  %v13461_v27 = vld [vmem:[#allocation5 + $0xba4] ss:$40 sps:$4 sm:$0xff]  }
 0x1ba   :  { %4105 = vmatprep.subr.bf16.mxu1 %v13380_v29  ;;  %v13464_v28 = vld [vmem:[#allocation5 + $0xbac] ss:$40 sps:$4 sm:$0xff]   ;;  %v13459_v29 = vld [vmem:[#allocation5 + $0xba0] ss:$40 sps:$4 sm:$0xff]  }
 0x1bc   :  { %3942 = vmatpush1.bf16.msra.mxu0 %v13375_v31  ;;  %v13462_v31 = vld [vmem:[#allocation5 + $0xba8] ss:$40 sps:$4 sm:$0xff]  }
 0x1bd   :  { %4106 = vmatpush1.bf16.msra.mxu1 %v13378_v32  ;;  %3943 = vmatprep.subr.bf16.mxu0 %v13383_v33  ;;  %v13467_v32 = vld [vmem:[#allocation5 + $0xbf4] ss:$40 sps:$4 sm:$0xff]  }
 0x1be   :  { %4107 = vmatprep.subr.bf16.mxu1 %v13386_v34  ;;  %v13470_v33 = vld [vmem:[#allocation5 + $0xbfc] ss:$40 sps:$4 sm:$0xff]   ;;  %v13465_v34 = vld [vmem:[#allocation5 + $0xbf0] ss:$40 sps:$4 sm:$0xff]  }
 0x1c0   :  { %3944 = vmatpush1.bf16.msra.mxu0 %v13381_v35  ;;  %v13468_v35 = vld [vmem:[#allocation5 + $0xbf8] ss:$40 sps:$4 sm:$0xff]  }
 0x1c1   :  { %4108 = vmatpush1.bf16.msra.mxu1 %v13384_v36  ;;  %3945 = vmatprep.subr.bf16.mxu0 %v13389_v37  ;;  %v13473_v36 = vld [vmem:[#allocation5 + $0xc44] ss:$40 sps:$4 sm:$0xff]  }
 0x1c2   :  { %4109 = vmatprep.subr.bf16.mxu1 %v13392_v38  ;;  %v13476_v37 = vld [vmem:[#allocation5 + $0xc4c] ss:$40 sps:$4 sm:$0xff]   ;;  %v13471_v38 = vld [vmem:[#allocation5 + $0xc40] ss:$40 sps:$4 sm:$0xff]  }
 0x1c4   :  { %3946 = vmatpush1.bf16.msra.mxu0 %v13387_v39  ;;  %v13474_v39 = vld [vmem:[#allocation5 + $0xc48] ss:$40 sps:$4 sm:$0xff]  }
 0x1c5   :  { %4110 = vmatpush1.bf16.msra.mxu1 %v13390_v40  ;;  %3947 = vmatprep.subr.bf16.mxu0 %v13395_v41  ;;  %v13479_v40 = vld [vmem:[#allocation5 + $0xc94] ss:$40 sps:$4 sm:$0xff]  }
 0x1c6   :  { %4111 = vmatprep.subr.bf16.mxu1 %v13398_v42  ;;  %v13482_v41 = vld [vmem:[#allocation5 + $0xc9c] ss:$40 sps:$4 sm:$0xff]   ;;  %v13477_v42 = vld [vmem:[#allocation5 + $0xc90] ss:$40 sps:$4 sm:$0xff]  }
 0x1c8   :  { %3948 = vmatpush1.bf16.msra.mxu0 %v13393_v43  ;;  %v13480_v43 = vld [vmem:[#allocation5 + $0xc98] ss:$40 sps:$4 sm:$0xff]  }
 0x1c9   :  { %4112 = vmatpush1.bf16.msra.mxu1 %v13396_v44  ;;  %3949 = vmatprep.subr.bf16.mxu0 %v13401_v45  ;;  %v13485_v44 = vld [vmem:[#allocation5 + $0xce4] ss:$40 sps:$4 sm:$0xff]  }
 0x1ca   :  { %4113 = vmatprep.subr.bf16.mxu1 %v13404_v46  ;;  %v13488_v45 = vld [vmem:[#allocation5 + $0xcec] ss:$40 sps:$4 sm:$0xff]   ;;  %v13483_v46 = vld [vmem:[#allocation5 + $0xce0] ss:$40 sps:$4 sm:$0xff]  }
 0x1cc   :  { %3950 = vmatpush1.bf16.msra.mxu0 %v13399_v47  ;;  %v13486_v47 = vld [vmem:[#allocation5 + $0xce8] ss:$40 sps:$4 sm:$0xff]  }
 0x1cd   :  { %4114 = vmatpush1.bf16.msra.mxu1 %v13402_v49  ;;  %3951 = vmatprep.subr.bf16.mxu0 %v13407_v50  ;;  %v13491_v49 = vld [vmem:[#allocation5 + $0xd34] ss:$40 sps:$4 sm:$0xff]  }
 0x1ce   :  { %4115 = vmatprep.subr.bf16.mxu1 %v13410_v51  ;;  %v13494_v50 = vld [vmem:[#allocation5 + $0xd3c] ss:$40 sps:$4 sm:$0xff]   ;;  %v13489_v51 = vld [vmem:[#allocation5 + $0xd30] ss:$40 sps:$4 sm:$0xff]  }
 0x1d0   :  { %3952 = vmatpush1.bf16.msra.mxu0 %v13405_v52  ;;  %v13492_v52 = vld [vmem:[#allocation5 + $0xd38] ss:$40 sps:$4 sm:$0xff]  }
 0x1d1   :  { %4116 = vmatpush1.bf16.msra.mxu1 %v13408_v53  ;;  %3953 = vmatprep.subr.bf16.mxu0 %v13413_v54  ;;  %v13497_v53 = vld [vmem:[#allocation5 + $0xd84] ss:$40 sps:$4 sm:$0xff]  }
 0x1d2   :  { %4117 = vmatprep.subr.bf16.mxu1 %v13416_v55  ;;  %v13500_v54 = vld [vmem:[#allocation5 + $0xd8c] ss:$40 sps:$4 sm:$0xff]   ;;  %v13495_v55 = vld [vmem:[#allocation5 + $0xd80] ss:$40 sps:$4 sm:$0xff]  }
 0x1d4   :  { %3954 = vmatpush1.bf16.msra.mxu0 %v13411_v56  ;;  %v13498_v56 = vld [vmem:[#allocation5 + $0xd88] ss:$40 sps:$4 sm:$0xff]  }
 0x1d5   :  { %4118 = vmatpush1.bf16.msra.mxu1 %v13414_v57  ;;  %3955 = vmatprep.subr.bf16.mxu0 %v13419_v58  ;;  %v13503_v57 = vld [vmem:[#allocation5 + $0xdd4] ss:$40 sps:$4 sm:$0xff]  }
 0x1d6   :  { %4119 = vmatprep.subr.bf16.mxu1 %v13422_v59  ;;  %v13506_v58 = vld [vmem:[#allocation5 + $0xddc] ss:$40 sps:$4 sm:$0xff]   ;;  %v13501_v59 = vld [vmem:[#allocation5 + $0xdd0] ss:$40 sps:$4 sm:$0xff]  }
 0x1d8   :  { %3956 = vmatpush1.bf16.msra.mxu0 %v13417_v60  ;;  %v13504_v60 = vld [vmem:[#allocation5 + $0xdd8] ss:$40 sps:$4 sm:$0xff]  }
 0x1d9   :  { %4120 = vmatpush1.bf16.msra.mxu1 %v13420_v61  ;;  %3957 = vmatprep.subr.bf16.mxu0 %v13425_v62  ;;  %v13509_v61 = vld [vmem:[#allocation5 + $0xe24] ss:$40 sps:$4 sm:$0xff]  }
 0x1da   :  { %4121 = vmatprep.subr.bf16.mxu1 %v13428_v63  ;;  %v13512_v62 = vld [vmem:[#allocation5 + $0xe2c] ss:$40 sps:$4 sm:$0xff]   ;;  %v13507_v63 = vld [vmem:[#allocation5 + $0xe20] ss:$40 sps:$4 sm:$0xff]  }
 0x1dc   :  { %3958 = vmatpush1.bf16.msra.mxu0 %v13423_v0  ;;  %v13510_v0 = vld [vmem:[#allocation5 + $0xe28] ss:$40 sps:$4 sm:$0xff]  }
 0x1dd   :  { %4122 = vmatpush1.bf16.msra.mxu1 %v13426_v1  ;;  %3968 = vmatprep.subr.bf16.mxu0 %v13431_v2  ;;  %v13515_v1 = vld [vmem:[#allocation5 + $0xe74] ss:$40 sps:$4 sm:$0xff]  }
 0x1de   :  { %4132 = vmatprep.subr.bf16.mxu1 %v13434_v3  ;;  %v13518_v2 = vld [vmem:[#allocation5 + $0xe7c] ss:$40 sps:$4 sm:$0xff]   ;;  %v13513_v3 = vld [vmem:[#allocation5 + $0xe70] ss:$40 sps:$4 sm:$0xff]  }
 0x1df   :  { %3960 = vmatmul.mubr.bf16.vlgmr.msra.gmra.mrb[4].mxu0 %v15366_v10 }
 0x1e0   :  { %4124 = vmatmul.mubr.bf16.vlgmr.msra.gmra.mrb[4].mxu1 %v15366_v10  ;;  %3969 = vmatpush1.bf16.msra.mxu0 %v13429_v4  ;;  %v13516_v4 = vld [vmem:[#allocation5 + $0xe78] ss:$40 sps:$4 sm:$0xff]  }
 0x1e1   :  { %4133 = vmatpush1.bf16.msra.mxu1 %v13432_v6  ;;  %3970 = vmatprep.subr.bf16.mxu0 %v13437_v7  ;;  %v13521_v6 = vld [vmem:[#allocation5 + $0xec4] ss:$40 sps:$4 sm:$0xff]  }
 0x1e2   :  { %4134 = vmatprep.subr.bf16.mxu1 %v13440_v8  ;;  %4000 = vmatprep.mubr.bf16.mxu0 %v15372_v15  ;;  %v13524_v7 = vld [vmem:[#allocation5 + $0xecc] ss:$40 sps:$4 sm:$0xff]   ;;  %v13519_v8 = vld [vmem:[#allocation5 + $0xec0] ss:$40 sps:$4 sm:$0xff]  }
 0x1e3   :  { %4164 = vmatprep.mubr.bf16.mxu1 %v15372_v15 }
 0x1e4   :  { %3971 = vmatpush1.bf16.msra.mxu0 %v13435_v9  ;;  %v13522_v9 = vld [vmem:[#allocation5 + $0xec8] ss:$40 sps:$4 sm:$0xff]  }
 0x1e5   :  { %4135 = vmatpush1.bf16.msra.mxu1 %v13438_v11  ;;  %3972 = vmatprep.subr.bf16.mxu0 %v13443_v12  ;;  %v13527_v11 = vld [vmem:[#allocation5 + $0xf14] ss:$40 sps:$4 sm:$0xff]  }
 0x1e6   :  { %4136 = vmatprep.subr.bf16.mxu1 %v13446_v14  ;;  %v13530_v12 = vld [vmem:[#allocation5 + $0xf1c] ss:$40 sps:$4 sm:$0xff]   ;;  %v13525_v14 = vld [vmem:[#allocation5 + $0xf10] ss:$40 sps:$4 sm:$0xff]  }
 0x1e8   :  { %3973 = vmatpush1.bf16.msra.mxu0 %v13441_v16  ;;  %v13528_v16 = vld [vmem:[#allocation5 + $0xf18] ss:$40 sps:$4 sm:$0xff]  }
 0x1e9   :  { %4137 = vmatpush1.bf16.msra.mxu1 %v13444_v17  ;;  %3974 = vmatprep.subr.bf16.mxu0 %v13449_v18  ;;  %v13533_v17 = vld [vmem:[#allocation5 + $0xf64] ss:$40 sps:$4 sm:$0xff]  }
 0x1ea   :  { %4138 = vmatprep.subr.bf16.mxu1 %v13452_v20  ;;  %v13536_v18 = vld [vmem:[#allocation5 + $0xf6c] ss:$40 sps:$4 sm:$0xff]   ;;  %v13531_v20 = vld [vmem:[#allocation5 + $0xf60] ss:$40 sps:$4 sm:$0xff]  }
 0x1ec   :  { %3975 = vmatpush1.bf16.msra.mxu0 %v13447_v21  ;;  %v13534_v21 = vld [vmem:[#allocation5 + $0xf68] ss:$40 sps:$4 sm:$0xff]  }
 0x1ed   :  { %4139 = vmatpush1.bf16.msra.mxu1 %v13450_v22  ;;  %3976 = vmatprep.subr.bf16.mxu0 %v13455_v23  ;;  %v13539_v22 = vld [vmem:[#allocation5 + $0xfb4] ss:$40 sps:$4 sm:$0xff]  }
 0x1ee   :  { %4140 = vmatprep.subr.bf16.mxu1 %v13458_v24  ;;  %v13542_v23 = vld [vmem:[#allocation5 + $0xfbc] ss:$40 sps:$4 sm:$0xff]   ;;  %v13537_v24 = vld [vmem:[#allocation5 + $0xfb0] ss:$40 sps:$4 sm:$0xff]  }
 0x1f0   :  { %3977 = vmatpush1.bf16.msra.mxu0 %v13453_v25  ;;  %v13540_v25 = vld [vmem:[#allocation5 + $0xfb8] ss:$40 sps:$4 sm:$0xff]  }
 0x1f1   :  { %4141 = vmatpush1.bf16.msra.mxu1 %v13456_v13  ;;  %3978 = vmatprep.subr.bf16.mxu0 %v13461_v27  ;;  %v13545_v13 = vld [vmem:[#allocation5 + $0x1004] ss:$40 sps:$4 sm:$0xff]  }
 0x1f2   :  { %4142 = vmatprep.subr.bf16.mxu1 %v13464_v28  ;;  %v13548_v27 = vld [vmem:[#allocation5 + $0x100c] ss:$40 sps:$4 sm:$0xff]   ;;  %v683_v28 = vlaneseq }
 0x1f4   :  { %3979 = vmatpush1.bf16.msra.mxu0 %v13459_v29  ;;  %v13543_v29 = vld [vmem:[#allocation5 + $0x1000] ss:$40 sps:$4 sm:$0xff]  }
 0x1f5   :  { %4143 = vmatpush1.bf16.msra.mxu1 %v13462_v31  ;;  %3980 = vmatprep.subr.bf16.mxu0 %v13467_v32  ;;  %v13546_v31 = vld [vmem:[#allocation5 + $0x1008] ss:$40 sps:$4 sm:$0xff]   ;;  %v13551_v32 = vld [vmem:[#allocation5 + $0x1054] ss:$40 sps:$4 sm:$0xff]  }
 0x1f6   :  { %4144 = vmatprep.subr.bf16.mxu1 %v13470_v33  ;;  %v13554_v33 = vld [vmem:[#allocation5 + $0x105c] ss:$40 sps:$4 sm:$0xff]  }
 0x1f8   :  { %3981 = vmatpush1.bf16.msra.mxu0 %v13465_v34  ;;  %v15400_v34 = vshrl.u32 %v683_v28, 7  ;;  %v13606_v28 = vld [vmem:[#allocation8 + $0x190] ss:$40 sps:$4 sm:$0xff]  }
 0x1f9   :  { %4145 = vmatpush1.bf16.msra.mxu1 %v13468_v35  ;;  %3982 = vmatprep.subr.bf16.mxu0 %v13473_v36  ;;  %v13549_v35 = vld [vmem:[#allocation5 + $0x1050] ss:$40 sps:$4 sm:$0xff]  }
 0x1fa   :  { %4146 = vmatprep.subr.bf16.mxu1 %v13476_v37  ;;  %v13552_v36 = vld [vmem:[#allocation5 + $0x1058] ss:$40 sps:$4 sm:$0xff]   ;;  %v13557_v37 = vld [vmem:[#allocation5 + $0x10a4] ss:$40 sps:$4 sm:$0xff]  }
 0x1fc   :  { %3983 = vmatpush1.bf16.msra.mxu0 %v13471_v38  ;;  %v13560_v38 = vld [vmem:[#allocation5 + $0x10ac] ss:$40 sps:$4 sm:$0xff]  }
 0x1fd   :  { %4147 = vmatpush1.bf16.msra.mxu1 %v13474_v39  ;;  %3984 = vmatprep.subr.bf16.mxu0 %v13479_v40  ;;  %v15402_v39 = vld [vmem:[#allocation7] sm:$0xff]  ;;  %v15405_v40 = vsub.s32 1, %v15400_v34 }
 0x1fe   :  { %4148 = vmatprep.subr.bf16.mxu1 %v13482_v41  ;;  %v13555_v41 = vld [vmem:[#allocation5 + $0x10a0] ss:$40 sps:$4 sm:$0xff]  }
 0x200   :  { %3985 = vmatpush1.bf16.msra.mxu0 %v13477_v42  ;;  %v13558_v42 = vld [vmem:[#allocation5 + $0x10a8] ss:$40 sps:$4 sm:$0xff]  }
 0x201   :  { %4149 = vmatpush1.bf16.msra.mxu1 %v13480_v43  ;;  %3986 = vmatprep.subr.bf16.mxu0 %v13485_v44  ;;  %v13563_v43 = vld [vmem:[#allocation5 + $0x10f4] ss:$40 sps:$4 sm:$0xff]  }
 0x202   :  { %4150 = vmatprep.subr.bf16.mxu1 %v13488_v45  ;;  %v13566_v44 = vld [vmem:[#allocation5 + $0x10fc] ss:$40 sps:$4 sm:$0xff]  }
 0x204   :  { %3987 = vmatpush1.bf16.msra.mxu0 %v13483_v46 }
 0x205   :  { %4151 = vmatpush1.bf16.msra.mxu1 %v13486_v47  ;;  %3988 = vmatprep.subr.bf16.mxu0 %v13491_v49  ;;  %v690_v47 = vrot.slane %v15402_v39, %v15405_v40 }
 0x206   :  { %4152 = vmatprep.subr.bf16.mxu1 %v13494_v50 }
 0x208   :  { %3989 = vmatpush1.bf16.msra.mxu0 %v13489_v51 }
 0x209   :  { %4153 = vmatpush1.bf16.msra.mxu1 %v13492_v52  ;;  %3990 = vmatprep.subr.bf16.mxu0 %v13497_v53  ;;  %v13561_v53 = vld [vmem:[#allocation5 + $0x10f0] ss:$40 sps:$4 sm:$0xff]  }
 0x20a   :  { %4154 = vmatprep.subr.bf16.mxu1 %v13500_v54  ;;  %v13564_v54 = vld [vmem:[#allocation5 + $0x10f8] ss:$40 sps:$4 sm:$0xff]  }
 0x20c   :  { %3991 = vmatpush1.bf16.msra.mxu0 %v13495_v55 }
 0x20d   :  { %4155 = vmatpush1.bf16.msra.mxu1 %v13498_v56  ;;  %3992 = vmatprep.subr.bf16.mxu0 %v13503_v57  ;;  %v13569_v57 = vld [vmem:[#allocation5 + $0x1144] ss:$40 sps:$4 sm:$0xff]  }
 0x20e   :  { %4156 = vmatprep.subr.bf16.mxu1 %v13506_v58  ;;  %v13572_v58 = vld [vmem:[#allocation5 + $0x114c] ss:$40 sps:$4 sm:$0xff]  }
 0x210   :  { %3993 = vmatpush1.bf16.msra.mxu0 %v13501_v59 }
 0x211   :  { %4157 = vmatpush1.bf16.msra.mxu1 %v13504_v60  ;;  %3994 = vmatprep.subr.bf16.mxu0 %v13509_v61  ;;  %v13567_v60 = vld [vmem:[#allocation5 + $0x1140] ss:$40 sps:$4 sm:$0xff]  }
 0x212   :  { %4158 = vmatprep.subr.bf16.mxu1 %v13512_v62  ;;  %v13570_v61 = vld [vmem:[#allocation5 + $0x1148] ss:$40 sps:$4 sm:$0xff]   ;;  %v13575_v62 = vld [vmem:[#allocation5 + $0x24] ss:$40 sps:$4 sm:$0xff]  }
 0x214   :  { %3995 = vmatpush1.bf16.msra.mxu0 %v13507_v63  ;;  %v13578_v63 = vld [vmem:[#allocation8 + $0x4] ss:$40 sps:$4 sm:$0xff]  }
 0x215   :  { %4159 = vmatpush1.bf16.msra.mxu1 %v13510_v0  ;;  %3996 = vmatprep.subr.bf16.mxu0 %v13515_v1  ;;  %v13573_v0 = vld [vmem:[#allocation5 + $0x20] ss:$40 sps:$4 sm:$0xff]  }
 0x216   :  { %4160 = vmatprep.subr.bf16.mxu1 %v13518_v2  ;;  %v13576_v1 = vld [vmem:[#allocation8] ss:$40 sps:$4 sm:$0xff]  }
 0x218   :  { %3997 = vmatpush1.bf16.msra.mxu0 %v13513_v3  ;;  %v13581_v3 = vld [vmem:[#allocation5 + $0x74] ss:$40 sps:$4 sm:$0xff]  }
 0x219   :  { %4161 = vmatpush1.bf16.msra.mxu1 %v13516_v4  ;;  %3998 = vmatprep.subr.bf16.mxu0 %v13521_v6  ;;  %v13584_v4 = vld [vmem:[#allocation8 + $0x54] ss:$40 sps:$4 sm:$0xff]   ;;  %v13579_v6 = vld [vmem:[#allocation5 + $0x70] ss:$40 sps:$4 sm:$0xff]  }
 0x21a   :  { %4162 = vmatprep.subr.bf16.mxu1 %v13524_v7  ;;  %v13582_v7 = vld [vmem:[#allocation8 + $0x50] ss:$40 sps:$4 sm:$0xff]  }
 0x21c   :  { %3999 = vmatpush1.bf16.msra.mxu0 %v13519_v8 }
 0x21d   :  { %4163 = vmatpush1.bf16.msra.mxu1 %v13522_v9  ;;  %4009 = vmatprep.subr.bf16.mxu0 %v13527_v11  ;;  %v15021_v9 = vld [vmem:[#allocation2 + $0x18] ss:$0 sps:$4 sm:$0xff]   ;;  %v13587_v11 = vld [vmem:[#allocation5 + $0xc4] ss:$40 sps:$4 sm:$0xff]  }
 0x21e   :  { %4173 = vmatprep.subr.bf16.mxu1 %v13530_v12  ;;  %v13590_v12 = vld [vmem:[#allocation8 + $0xa4] ss:$40 sps:$4 sm:$0xff]  }
 0x21f   :  { %4001 = vmatmul.mubr.bf16.vlgmr.msra.gmra.mrb[4].mxu0 %v15380_v19 }
 0x220   :  { %4165 = vmatmul.mubr.bf16.vlgmr.msra.gmra.mrb[4].mxu1 %v15380_v19  ;;  %4010 = vmatpush1.bf16.msra.mxu0 %v13525_v14  ;;  %v13585_v14 = vld [vmem:[#allocation5 + $0xc0] ss:$40 sps:$4 sm:$0xff]  }
 0x221   :  { %4174 = vmatpush1.bf16.msra.mxu1 %v13528_v16  ;;  %4011 = vmatprep.subr.bf16.mxu0 %v13533_v17  ;;  %v13588_v16 = vld [vmem:[#allocation8 + $0xa0] ss:$40 sps:$4 sm:$0xff]  }
 0x222   :  { %4175 = vmatprep.subr.bf16.mxu1 %v13536_v18  ;;  %4041 = vmatprep.mubr.bf16.mxu0 %v15222_v26  ;;  %v13593_v17 = vld [vmem:[#allocation5 + $0x114] ss:$40 sps:$4 sm:$0xff]  }
 0x223   :  { %4205 = vmatprep.mubr.bf16.mxu1 %v15222_v26  ;;  %v13596_v18 = vld [vmem:[#allocation8 + $0xf4] ss:$40 sps:$4 sm:$0xff]  }
 0x224   :  { %4012 = vmatpush1.bf16.msra.mxu0 %v13531_v20  ;;  %v13591_v20 = vld [vmem:[#allocation5 + $0x110] ss:$40 sps:$4 sm:$0xff]  }
 0x225   :  { %4176 = vmatpush1.bf16.msra.mxu1 %v13534_v21  ;;  %4013 = vmatprep.subr.bf16.mxu0 %v13539_v22  ;;  %v13594_v21 = vld [vmem:[#allocation8 + $0xf0] ss:$40 sps:$4 sm:$0xff]  }
 0x226   :  { %4177 = vmatprep.subr.bf16.mxu1 %v13542_v23  ;;  %v13599_v22 = vld [vmem:[#allocation5 + $0x164] ss:$40 sps:$4 sm:$0xff]  }
 0x227   :  { %v13602_v23 = vld [vmem:[#allocation8 + $0x144] ss:$40 sps:$4 sm:$0xff]  }
 0x228   :  { %4014 = vmatpush1.bf16.msra.mxu0 %v13537_v24  ;;  %v13597_v24 = vld [vmem:[#allocation5 + $0x160] ss:$40 sps:$4 sm:$0xff]  }
 0x229   :  { %4178 = vmatpush1.bf16.msra.mxu1 %v13540_v25  ;;  %4015 = vmatprep.subr.bf16.mxu0 %v13545_v13  ;;  %v13600_v25 = vld [vmem:[#allocation8 + $0x140] ss:$40 sps:$4 sm:$0xff]  }
 0x22a   :  { %4179 = vmatprep.subr.bf16.mxu1 %v13548_v27  ;;  %v13605_v13 = vld [vmem:[#allocation5 + $0x1b4] ss:$40 sps:$4 sm:$0xff]   ;;  %v13603_v27 = vld [vmem:[#allocation5 + $0x1b0] ss:$40 sps:$4 sm:$0xff]  }
 0x22c   :  { %4016 = vmatpush1.bf16.msra.mxu0 %v13543_v29  ;;  %v13611_v29 = vld [vmem:[#allocation5 + $0x204] ss:$40 sps:$4 sm:$0xff]  }
 0x22d   :  { %4180 = vmatpush1.bf16.msra.mxu1 %v13546_v31  ;;  %4017 = vmatprep.subr.bf16.mxu0 %v13551_v32  ;;  %v13614_v31 = vld [vmem:[#allocation8 + $0x1e4] ss:$40 sps:$4 sm:$0xff]   ;;  %v13609_v32 = vld [vmem:[#allocation5 + $0x200] ss:$40 sps:$4 sm:$0xff]  }
 0x22e   :  { %4181 = vmatprep.subr.bf16.mxu1 %v13554_v33  ;;  %v13612_v33 = vld [vmem:[#allocation8 + $0x1e0] ss:$40 sps:$4 sm:$0xff]  }
 0x230   :  { %4018 = vmatpush1.bf16.msra.mxu0 %v13549_v35  ;;  %v13617_v35 = vld [vmem:[#allocation5 + $0x254] ss:$40 sps:$4 sm:$0xff]  }
 0x231   :  { %4182 = vmatpush1.bf16.msra.mxu1 %v13552_v36  ;;  %4019 = vmatprep.subr.bf16.mxu0 %v13557_v37  ;;  %v13620_v36 = vld [vmem:[#allocation8 + $0x234] ss:$40 sps:$4 sm:$0xff]   ;;  %v13615_v37 = vld [vmem:[#allocation5 + $0x250] ss:$40 sps:$4 sm:$0xff]  }
 0x232   :  { %4183 = vmatprep.subr.bf16.mxu1 %v13560_v38  ;;  %v15407_v45 = vpop.f32.mrb[0].mxu0  ;;  %v13618_v38 = vld [vmem:[#allocation8 + $0x230] ss:$40 sps:$4 sm:$0xff]  }
 0x233   :  { %v15409_v46 = vpop.f32.mrb[0].mxu1  ;;  %v3717_v49 = vpop.f32.mrb[1].mxu0 }
 0x234   :  { %v15413_v50 = vpop.f32.mrb[1].mxu1  ;;  %v3719_v51 = vpop.f32.mrb[2].mxu0  ;;  %4020 = vmatpush1.bf16.msra.mxu0 %v13555_v41  ;;  %v12722_v59 = vadd.f32 %v3717_v49, %v690_v47  ;;  %v13623_v41 = vld [vmem:[#allocation5 + $0x2a4] ss:$40 sps:$4 sm:$0xff]   ;;  %v13629_v47 = vld [vmem:[#allocation5 + $0x2f4] ss:$40 sps:$4 sm:$0xff]  }
 0x235   :  { %v3883_v52 = vpop.f32.mrb[2].mxu1  ;;  %4184 = vmatpush1.bf16.msra.mxu1 %v13558_v42  ;;  %v3720_v55 = vpop.f32.mrb[3].mxu0  ;;  %4021 = vmatprep.subr.bf16.mxu0 %v13563_v43  ;;  %v13626_v42 = vld [vmem:[#allocation8 + $0x284] ss:$40 sps:$4 sm:$0xff]   ;;  %v13621_v43 = vld [vmem:[#allocation5 + $0x2a0] ss:$40 sps:$4 sm:$0xff]  }
 0x236   :  { %v3884_v56 = vpop.f32.mrb[3].mxu1  ;;  %4185 = vmatprep.subr.bf16.mxu1 %v13566_v44  ;;  %v4379_v2 = vmax.f32 %v12722_v59, 0.0  ;;  %v13624_v44 = vld [vmem:[#allocation8 + $0x280] ss:$40 sps:$4 sm:$0xff]   ;;  %v13632_v49 = vld [vmem:[#allocation8 + $0x2d4] ss:$40 sps:$4 sm:$0xff]  }
 0x237   :  { %v13627_v51 = vld [vmem:[#allocation5 + $0x2f0] ss:$40 sps:$4 sm:$0xff]   ;;  %v13633_v55 = vld [vmem:[#allocation5 + $0x340] ss:$40 sps:$4 sm:$0xff]  }
 0x238   :  { %4022 = vmatpush1.bf16.msra.mxu0 %v13561_v53  ;;  %v15415_v8 = vpack.c.bf16 %v4379_v2, %v4379_v2  ;;  %v13630_v52 = vld [vmem:[#allocation8 + $0x2d0] ss:$40 sps:$4 sm:$0xff]   ;;  %v13636_v56 = vld [vmem:[#allocation8 + $0x320] ss:$40 sps:$4 sm:$0xff]   ;;  %v15420_v2 = vsub.s32 0, %v15400_v34 }
 0x239   :  { %4186 = vmatpush1.bf16.msra.mxu1 %v13564_v54  ;;  %4023 = vmatprep.subr.bf16.mxu0 %v13569_v57  ;;  %v13635_v53 = vld [vmem:[#allocation5 + $0x344] ss:$40 sps:$4 sm:$0xff]   ;;  %v13641_v57 = vld [vmem:[#allocation5 + $0x394] ss:$40 sps:$4 sm:$0xff]   ;;  %v13639_v59 = vld [vmem:[#allocation5 + $0x390] ss:$40 sps:$4 sm:$0xff]  }
 0x23a   :  { %4187 = vmatprep.subr.bf16.mxu1 %v13572_v58  ;;  %v13638_v54 = vld [vmem:[#allocation8 + $0x324] ss:$40 sps:$4 sm:$0xff]   ;;  %v13644_v58 = vld [vmem:[#allocation8 + $0x374] ss:$40 sps:$4 sm:$0xff]  }
 0x23c   :  { %4024 = vmatpush1.bf16.msra.mxu0 %v13567_v60  ;;  %v13642_v60 = vld [vmem:[#allocation8 + $0x370] ss:$40 sps:$4 sm:$0xff]  }
 0x23d   :  { %4188 = vmatpush1.bf16.msra.mxu1 %v13570_v61  ;;  %4214 = vmatprep.subr.bf16.mxu0 %v13575_v62  ;;  %v13647_v61 = vld [vmem:[#allocation5 + $0x3e4] ss:$40 sps:$4 sm:$0xff]  }
 0x23e   :  { %9252 = vmatprep.subr.bf16.mxu1 %v13578_v63  ;;  %v13650_v62 = vld [vmem:[#allocation8 + $0x3c4] ss:$40 sps:$4 sm:$0xff]   ;;  %v13645_v63 = vld [vmem:[#allocation5 + $0x3e0] ss:$40 sps:$4 sm:$0xff]  }
 0x23f   :  { %4042 = vmatmul.mubr.bf16.vlgmr.msra.gmra.mrb[4].mxu0 %v15021_v9 }
 0x240   :  { %4206 = vmatmul.mubr.bf16.vlgmr.msra.gmra.mrb[4].mxu1 %v15021_v9  ;;  %4215 = vmatpush1.bf16.msra.mxu0 %v13573_v0  ;;  %v13648_v0 = vld [vmem:[#allocation8 + $0x3c0] ss:$40 sps:$4 sm:$0xff]  }
 0x241   :  { %9253 = vmatpush1.bf16.msra.mxu1 %v13576_v1  ;;  %9284 = vmatprep.mubr.bf16.mxu1 %v15415_v8  ;;  %v13653_v1 = vld [vmem:[#allocation5 + $0x434] ss:$40 sps:$4 sm:$0xff]   ;;  %v13659_v9 = vld [vmem:[#allocation5 + $0x484] ss:$40 sps:$4 sm:$0xff]  }
 0x242   :  { %4216 = vmatprep.subr.bf16.mxu0 %v13581_v3  ;;  %9254 = vmatprep.subr.bf16.mxu1 %v13584_v4  ;;  %v13656_v3 = vld [vmem:[#allocation8 + $0x414] ss:$40 sps:$4 sm:$0xff]   ;;  %v697_v4 = vsub.s32 3, %v15400_v34 }
 0x243   :  { %4246 = vmatprep.mubr.bf16.mxu0 %v15348_v48  ;;  %v13608_v48 = vld [vmem:[#allocation8 + $0x194] ss:$40 sps:$4 sm:$0xff]  }
 0x244   :  { %4217 = vmatpush1.bf16.msra.mxu0 %v13579_v6  ;;  %v13651_v6 = vld [vmem:[#allocation5 + $0x430] ss:$40 sps:$4 sm:$0xff]  }
 0x245   :  { %9255 = vmatpush1.bf16.msra.mxu1 %v13582_v7  ;;  %4218 = vmatprep.subr.bf16.mxu0 %v13587_v11  ;;  %v13654_v7 = vld [vmem:[#allocation8 + $0x410] ss:$40 sps:$4 sm:$0xff]   ;;  %v686_v11 = vrot.slane %v15402_v39, %v15420_v2 }
 0x246   :  { %9256 = vmatprep.subr.bf16.mxu1 %v13590_v12  ;;  %v13662_v12 = vld [vmem:[#allocation8 + $0x464] ss:$40 sps:$4 sm:$0xff]  }
 0x248   :  { %4219 = vmatpush1.bf16.msra.mxu0 %v13585_v14  ;;  %v698_v14 = vrot.slane %v15402_v39, %v697_v4  ;;  %v13674_v39 = vld [vmem:[#allocation8 + $0x504] ss:$40 sps:$4 sm:$0xff]  }
 0x249   :  { %9257 = vmatpush1.bf16.msra.mxu1 %v13588_v16  ;;  %4220 = vmatprep.subr.bf16.mxu0 %v13593_v17  ;;  %v13657_v16 = vld [vmem:[#allocation5 + $0x480] ss:$40 sps:$4 sm:$0xff]  }
 0x24a   :  { %9258 = vmatprep.subr.bf16.mxu1 %v13596_v18  ;;  %v13660_v17 = vld [vmem:[#allocation8 + $0x460] ss:$40 sps:$4 sm:$0xff]  }
 0x24b   :  { %v13665_v18 = vld [vmem:[#allocation5 + $0x4d4] ss:$40 sps:$4 sm:$0xff]  }
 0x24c   :  { %4221 = vmatpush1.bf16.msra.mxu0 %v13591_v20  ;;  %v12721_v20 = vadd.f32 %v15407_v45, %v686_v11  ;;  %v13677_v45 = vld [vmem:[#allocation5 + $0x574] ss:$40 sps:$4 sm:$0xff]  }
 0x24d   :  { %9259 = vmatpush1.bf16.msra.mxu1 %v13594_v21  ;;  %4222 = vmatprep.subr.bf16.mxu0 %v13599_v22  ;;  %v13668_v21 = vld [vmem:[#allocation8 + $0x4b4] ss:$40 sps:$4 sm:$0xff]   ;;  %v12724_v22 = vadd.f32 %v15413_v50, %v698_v14  ;;  %v13726_v11 = vld [vmem:[#allocation8 + $0x7d0] ss:$40 sps:$4 sm:$0xff]   ;;  %v13734_v14 = vld [vmem:[#allocation8 + $0x824] ss:$40 sps:$4 sm:$0xff]  }
 0x24e   :  { %9260 = vmatprep.subr.bf16.mxu1 %v13602_v23  ;;  %v13663_v23 = vld [vmem:[#allocation5 + $0x4d0] ss:$40 sps:$4 sm:$0xff]   ;;  %v13680_v50 = vld [vmem:[#allocation8 + $0x554] ss:$40 sps:$4 sm:$0xff]  }
 0x250   :  { %4223 = vmatpush1.bf16.msra.mxu0 %v13597_v24  ;;  %v13666_v24 = vld [vmem:[#allocation8 + $0x4b0] ss:$40 sps:$4 sm:$0xff]  }
 0x251   :  { %9261 = vmatpush1.bf16.msra.mxu1 %v13600_v25  ;;  %4224 = vmatprep.subr.bf16.mxu0 %v13605_v13  ;;  %v13671_v25 = vld [vmem:[#allocation5 + $0x524] ss:$40 sps:$4 sm:$0xff]   ;;  %v4378_v13 = vmax.f32 %v12721_v20, 0.0 }
 0x252   :  { %9262 = vmatprep.subr.bf16.mxu1 %v13608_v48  ;;  %v4381_v48 = vmax.f32 %v12724_v22, 0.0  ;;  %v13740_v20 = vld [vmem:[#allocation8 + $0x874] ss:$40 sps:$4 sm:$0xff]   ;;  %v13738_v22 = vld [vmem:[#allocation8 + $0x870] ss:$40 sps:$4 sm:$0xff]  }
 0x254   :  { %4225 = vmatpush1.bf16.msra.mxu0 %v13603_v27  ;;  %v13669_v27 = vld [vmem:[#allocation5 + $0x520] ss:$40 sps:$4 sm:$0xff]  }
 0x255   :  { %9263 = vmatpush1.bf16.msra.mxu1 %v13606_v28  ;;  %4226 = vmatprep.subr.bf16.mxu0 %v13611_v29  ;;  %v13672_v28 = vld [vmem:[#allocation8 + $0x500] ss:$40 sps:$4 sm:$0xff]   ;;  %v15430_v29 = vpack.c.bf16 %v4378_v13, %v4378_v13 }
 0x256   :  { %9264 = vmatprep.subr.bf16.mxu1 %v13614_v31  ;;  %v15432_v31 = vpack.c.bf16 %v4381_v48, %v4381_v48  ;;  %v13744_v13 = vld [vmem:[#allocation8 + $0x8c0] ss:$40 sps:$4 sm:$0xff]   ;;  %v13752_v48 = vld [vmem:[#allocation8 + $0x914] ss:$40 sps:$4 sm:$0xff]  }
 0x258   :  { %4227 = vmatpush1.bf16.msra.mxu0 %v13609_v32  ;;  %v13675_v32 = vld [vmem:[#allocation5 + $0x570] ss:$40 sps:$4 sm:$0xff]  }
 0x259   :  { %9265 = vmatpush1.bf16.msra.mxu1 %v13612_v33  ;;  %4228 = vmatprep.subr.bf16.mxu0 %v13617_v35  ;;  %v13678_v33 = vld [vmem:[#allocation8 + $0x550] ss:$40 sps:$4 sm:$0xff]  }
 0x25a   :  { %9266 = vmatprep.subr.bf16.mxu1 %v13620_v36  ;;  %v13683_v35 = vld [vmem:[#allocation5 + $0x5c4] ss:$40 sps:$4 sm:$0xff]  }
 0x25b   :  { %v13686_v36 = vld [vmem:[#allocation8 + $0x5a4] ss:$40 sps:$4 sm:$0xff]  }
 0x25c   :  { %4229 = vmatpush1.bf16.msra.mxu0 %v13615_v37  ;;  %v13681_v37 = vld [vmem:[#allocation5 + $0x5c0] ss:$40 sps:$4 sm:$0xff]  }
 0x25d   :  { %9267 = vmatpush1.bf16.msra.mxu1 %v13618_v38  ;;  %4230 = vmatprep.subr.bf16.mxu0 %v13623_v41  ;;  %v13684_v38 = vld [vmem:[#allocation8 + $0x5a0] ss:$40 sps:$4 sm:$0xff]  }
 0x25e   :  { %9268 = vmatprep.subr.bf16.mxu1 %v13626_v42  ;;  %v13689_v41 = vld [vmem:[#allocation5 + $0x614] ss:$40 sps:$4 sm:$0xff]   ;;  %v13687_v42 = vld [vmem:[#allocation5 + $0x610] ss:$40 sps:$4 sm:$0xff]  }
 0x260   :  { %4231 = vmatpush1.bf16.msra.mxu0 %v13621_v43  ;;  %v13690_v43 = vld [vmem:[#allocation8 + $0x5f0] ss:$40 sps:$4 sm:$0xff]  }
 0x261   :  { %9269 = vmatpush1.bf16.msra.mxu1 %v13624_v44  ;;  %4232 = vmatprep.subr.bf16.mxu0 %v13629_v47  ;;  %v13695_v44 = vld [vmem:[#allocation5 + $0x664] ss:$40 sps:$4 sm:$0xff]  }
 0x262   :  { %9270 = vmatprep.subr.bf16.mxu1 %v13632_v49  ;;  %v13698_v47 = vld [vmem:[#allocation8 + $0x644] ss:$40 sps:$4 sm:$0xff]   ;;  %v13693_v49 = vld [vmem:[#allocation5 + $0x660] ss:$40 sps:$4 sm:$0xff]  }
 0x264   :  { %4233 = vmatpush1.bf16.msra.mxu0 %v13627_v51  ;;  %v13701_v51 = vld [vmem:[#allocation5 + $0x6b4] ss:$40 sps:$4 sm:$0xff]  }
 0x265   :  { %9271 = vmatpush1.bf16.msra.mxu1 %v13630_v52  ;;  %4234 = vmatprep.subr.bf16.mxu0 %v13635_v53  ;;  %v13704_v52 = vld [vmem:[#allocation8 + $0x694] ss:$40 sps:$4 sm:$0xff]   ;;  %v13699_v53 = vld [vmem:[#allocation5 + $0x6b0] ss:$40 sps:$4 sm:$0xff]  }
 0x266   :  { %9272 = vmatprep.subr.bf16.mxu1 %v13638_v54  ;;  %v13702_v54 = vld [vmem:[#allocation8 + $0x690] ss:$40 sps:$4 sm:$0xff]  }
 0x268   :  { %4235 = vmatpush1.bf16.msra.mxu0 %v13633_v55  ;;  %v13707_v55 = vld [vmem:[#allocation5 + $0x704] ss:$40 sps:$4 sm:$0xff]  }
 0x269   :  { %9273 = vmatpush1.bf16.msra.mxu1 %v13636_v56  ;;  %4236 = vmatprep.subr.bf16.mxu0 %v13641_v57  ;;  %v13710_v56 = vld [vmem:[#allocation8 + $0x6e4] ss:$40 sps:$4 sm:$0xff]   ;;  %v13705_v57 = vld [vmem:[#allocation5 + $0x700] ss:$40 sps:$4 sm:$0xff]  }
 0x26a   :  { %9274 = vmatprep.subr.bf16.mxu1 %v13644_v58  ;;  %v13708_v58 = vld [vmem:[#allocation8 + $0x6e0] ss:$40 sps:$4 sm:$0xff]  }
 0x26c   :  { %4237 = vmatpush1.bf16.msra.mxu0 %v13639_v59  ;;  %v13713_v59 = vld [vmem:[#allocation5 + $0x754] ss:$40 sps:$4 sm:$0xff]  }
 0x26d   :  { %9275 = vmatpush1.bf16.msra.mxu1 %v13642_v60  ;;  %4238 = vmatprep.subr.bf16.mxu0 %v13647_v61  ;;  %v13716_v60 = vld [vmem:[#allocation8 + $0x734] ss:$40 sps:$4 sm:$0xff]   ;;  %v13711_v61 = vld [vmem:[#allocation5 + $0x750] ss:$40 sps:$4 sm:$0xff]  }
 0x26e   :  { %9276 = vmatprep.subr.bf16.mxu1 %v13650_v62  ;;  %v13714_v62 = vld [vmem:[#allocation8 + $0x730] ss:$40 sps:$4 sm:$0xff]  }
 0x270   :  { %4239 = vmatpush1.bf16.msra.mxu0 %v13645_v63  ;;  %v13719_v63 = vld [vmem:[#allocation5 + $0x7a4] ss:$40 sps:$4 sm:$0xff]  }
 0x271   :  { %9277 = vmatpush1.bf16.msra.mxu1 %v13648_v0  ;;  %4240 = vmatprep.subr.bf16.mxu0 %v13653_v1  ;;  %v13722_v0 = vld [vmem:[#allocation8 + $0x784] ss:$40 sps:$4 sm:$0xff]   ;;  %v13717_v1 = vld [vmem:[#allocation5 + $0x7a0] ss:$40 sps:$4 sm:$0xff]  }
 0x272   :  { %9278 = vmatprep.subr.bf16.mxu1 %v13656_v3  ;;  %v13720_v3 = vld [vmem:[#allocation8 + $0x780] ss:$40 sps:$4 sm:$0xff]  }
 0x274   :  { %4241 = vmatpush1.bf16.msra.mxu0 %v13651_v6  ;;  %v13725_v6 = vld [vmem:[#allocation5 + $0x7f4] ss:$40 sps:$4 sm:$0xff]  }
 0x275   :  { %9279 = vmatpush1.bf16.msra.mxu1 %v13654_v7  ;;  %4242 = vmatprep.subr.bf16.mxu0 %v13659_v9  ;;  %v13728_v7 = vld [vmem:[#allocation8 + $0x7d4] ss:$40 sps:$4 sm:$0xff]   ;;  %v13723_v9 = vld [vmem:[#allocation5 + $0x7f0] ss:$40 sps:$4 sm:$0xff]  }
 0x276   :  { %9280 = vmatprep.subr.bf16.mxu1 %v13662_v12  ;;  %v13731_v12 = vld [vmem:[#allocation5 + $0x844] ss:$40 sps:$4 sm:$0xff]  }
 0x278   :  { %4243 = vmatpush1.bf16.msra.mxu0 %v13657_v16  ;;  %v13729_v16 = vld [vmem:[#allocation5 + $0x840] ss:$40 sps:$4 sm:$0xff]  }
 0x279   :  { %9281 = vmatpush1.bf16.msra.mxu1 %v13660_v17  ;;  %4244 = vmatprep.subr.bf16.mxu0 %v13665_v18  ;;  %v13732_v17 = vld [vmem:[#allocation8 + $0x820] ss:$40 sps:$4 sm:$0xff]  }
 0x27a   :  { %9282 = vmatprep.subr.bf16.mxu1 %v13668_v21  ;;  %v13737_v18 = vld [vmem:[#allocation5 + $0x894] ss:$40 sps:$4 sm:$0xff]   ;;  %v13735_v21 = vld [vmem:[#allocation5 + $0x890] ss:$40 sps:$4 sm:$0xff]  }
 0x27c   :  { %4245 = vmatpush1.bf16.msra.mxu0 %v13663_v23  ;;  %v13743_v23 = vld [vmem:[#allocation5 + $0x8e4] ss:$40 sps:$4 sm:$0xff]  }
 0x27d   :  { %9283 = vmatpush1.bf16.msra.mxu1 %v13666_v24  ;;  %4255 = vmatprep.subr.bf16.mxu0 %v13671_v25  ;;  %v13746_v24 = vld [vmem:[#allocation8 + $0x8c4] ss:$40 sps:$4 sm:$0xff]   ;;  %v13741_v25 = vld [vmem:[#allocation5 + $0x8e0] ss:$40 sps:$4 sm:$0xff]  }
 0x27e   :  { %9293 = vmatprep.subr.bf16.mxu1 %v13674_v39  ;;  %v13749_v39 = vld [vmem:[#allocation5 + $0x934] ss:$40 sps:$4 sm:$0xff]  }
 0x27f   :  { %4247 = vmatmul.mubr.bf16.vlgmr.msra.gmra.mrb[8].mxu0 %v15352_v5  ;;  %v13692_v5 = vld [vmem:[#allocation8 + $0x5f4] ss:$40 sps:$4 sm:$0xff]  }
 0x280   :  { %9285 = vmatmul.mubr.bf16.vlgmr.msra.gmra.mrb[8].mxu1 %v15430_v29  ;;  %4256 = vmatpush1.bf16.msra.mxu0 %v13669_v27  ;;  %v693_v27 = vsub.s32 2, %v15400_v34 }
 0x281   :  { %9294 = vmatpush1.bf16.msra.mxu1 %v13672_v28  ;;  %9325 = vmatprep.mubr.bf16.mxu1 %v15432_v31  ;;  %v13747_v28 = vld [vmem:[#allocation5 + $0x930] ss:$40 sps:$4 sm:$0xff]  }
 0x282   :  { %4257 = vmatprep.subr.bf16.mxu0 %v13677_v45  ;;  %9295 = vmatprep.subr.bf16.mxu1 %v13680_v50  ;;  %v13750_v45 = vld [vmem:[#allocation8 + $0x910] ss:$40 sps:$4 sm:$0xff]  }
 0x283   :  { %4287 = vmatprep.mubr.bf16.mxu0 %v15360_v30  ;;  %v13696_v30 = vld [vmem:[#allocation8 + $0x640] ss:$40 sps:$4 sm:$0xff]  }
 0x284   :  { %4258 = vmatpush1.bf16.msra.mxu0 %v13675_v32  ;;  %v13755_v50 = vld [vmem:[#allocation5 + $0x984] ss:$40 sps:$4 sm:$0xff]  }
 0x285   :  { %9296 = vmatpush1.bf16.msra.mxu1 %v13678_v33  ;;  %4259 = vmatprep.subr.bf16.mxu0 %v13683_v35  ;;  %v13758_v32 = vld [vmem:[#allocation8 + $0x964] ss:$40 sps:$4 sm:$0xff]   ;;  %v15439_v33 = vld [vmem:[#allocation7] sm:$0xff] }
 0x286   :  { %9297 = vmatprep.subr.bf16.mxu1 %v13686_v36  ;;  %v694_v35 = vrot.slane %v15439_v33, %v693_v27  ;;  %v13753_v36 = vld [vmem:[#allocation5 + $0x980] ss:$40 sps:$4 sm:$0xff]  }
 0x288   :  { %4260 = vmatpush1.bf16.msra.mxu0 %v13681_v37  ;;  %v13756_v37 = vld [vmem:[#allocation8 + $0x960] ss:$40 sps:$4 sm:$0xff]  }
 0x289   :  { %9298 = vmatpush1.bf16.msra.mxu1 %v13684_v38  ;;  %4261 = vmatprep.subr.bf16.mxu0 %v13689_v41  ;;  %v13761_v38 = vld [vmem:[#allocation5 + $0x9d4] ss:$40 sps:$4 sm:$0xff]  }
 0x28a   :  { %9299 = vmatprep.subr.bf16.mxu1 %v13692_v5  ;;  %v13764_v41 = vld [vmem:[#allocation8 + $0x9b4] ss:$40 sps:$4 sm:$0xff]   ;;  %v12723_v5 = vadd.f32 %v15409_v46, %v694_v35  ;;  %v13768_v46 = vld [vmem:[#allocation5 + $0xa70] ss:$40 sps:$4 sm:$0xff]  }
 0x28b   :  { %v13815_v35 = vld [vmem:[#allocation5 + $0xd94] ss:$40 sps:$4 sm:$0xff]  }
 0x28c   :  { %4262 = vmatpush1.bf16.msra.mxu0 %v13687_v42  ;;  %v13759_v42 = vld [vmem:[#allocation5 + $0x9d0] ss:$40 sps:$4 sm:$0xff]  }
 0x28d   :  { %9300 = vmatpush1.bf16.msra.mxu1 %v13690_v43  ;;  %4263 = vmatprep.subr.bf16.mxu0 %v13695_v44  ;;  %v13762_v43 = vld [vmem:[#allocation8 + $0x9b0] ss:$40 sps:$4 sm:$0xff]  }
 0x28e   :  { %9301 = vmatprep.subr.bf16.mxu1 %v13698_v47  ;;  %v13767_v44 = vld [vmem:[#allocation5 + $0xa24] ss:$40 sps:$4 sm:$0xff]  }
 0x28f   :  { %v13788_v47 = vld [vmem:[#allocation8 + $0xa04] ss:$40 sps:$4 sm:$0xff]  }
 0x290   :  { %4264 = vmatpush1.bf16.msra.mxu0 %v13693_v49  ;;  %v4380_v49 = vmax.f32 %v12723_v5, 0.0  ;;  %v13852_v5 = vld [vmem:[#allocation8 + $0xd70] ss:$40 sps:$4 sm:$0xff]  }
 0x291   :  { %9302 = vmatpush1.bf16.msra.mxu1 %v13696_v30  ;;  %4265 = vmatprep.subr.bf16.mxu0 %v13701_v51  ;;  %v13765_v30 = vld [vmem:[#allocation5 + $0xa20] ss:$40 sps:$4 sm:$0xff]   ;;  %v13770_v51 = vld [vmem:[#allocation5 + $0xa74] ss:$40 sps:$4 sm:$0xff]  }
 0x292   :  { %9303 = vmatprep.subr.bf16.mxu1 %v13704_v52  ;;  %v13786_v52 = vld [vmem:[#allocation8 + $0xa00] ss:$40 sps:$4 sm:$0xff]  }
 0x294   :  { %4266 = vmatpush1.bf16.msra.mxu0 %v13699_v53  ;;  %v13794_v53 = vld [vmem:[#allocation8 + $0xa54] ss:$40 sps:$4 sm:$0xff]  }
 0x295   :  { %9304 = vmatpush1.bf16.msra.mxu1 %v13702_v54  ;;  %4267 = vmatprep.subr.bf16.mxu0 %v13707_v55  ;;  %v15445_v54 = vpack.c.bf16 %v4380_v49, %v4380_v49  ;;  %v13773_v55 = vld [vmem:[#allocation5 + $0xac4] ss:$40 sps:$4 sm:$0xff]  }
 0x296   :  { %9305 = vmatprep.subr.bf16.mxu1 %v13710_v56  ;;  %v13792_v56 = vld [vmem:[#allocation8 + $0xa50] ss:$40 sps:$4 sm:$0xff]   ;;  %v13866_v49 = vld [vmem:[#allocation8 + $0xe14] ss:$40 sps:$4 sm:$0xff]  }
 0x298   :  { %4268 = vmatpush1.bf16.msra.mxu0 %v13705_v57  ;;  %v13800_v57 = vld [vmem:[#allocation8 + $0xaa4] ss:$40 sps:$4 sm:$0xff]  }
 0x299   :  { %9306 = vmatpush1.bf16.msra.mxu1 %v13708_v58  ;;  %4269 = vmatprep.subr.bf16.mxu0 %v13713_v59  ;;  %v13771_v58 = vld [vmem:[#allocation5 + $0xac0] ss:$40 sps:$4 sm:$0xff]   ;;  %v13776_v59 = vld [vmem:[#allocation5 + $0xb14] ss:$40 sps:$4 sm:$0xff]  }
 0x29a   :  { %9307 = vmatprep.subr.bf16.mxu1 %v13716_v60  ;;  %v13798_v60 = vld [vmem:[#allocation8 + $0xaa0] ss:$40 sps:$4 sm:$0xff]  }
 0x29c   :  { %4270 = vmatpush1.bf16.msra.mxu0 %v13711_v61  ;;  %v13806_v61 = vld [vmem:[#allocation8 + $0xaf4] ss:$40 sps:$4 sm:$0xff]  }
 0x29d   :  { %9308 = vmatpush1.bf16.msra.mxu1 %v13714_v62  ;;  %4271 = vmatprep.subr.bf16.mxu0 %v13719_v63  ;;  %v13774_v62 = vld [vmem:[#allocation5 + $0xb10] ss:$40 sps:$4 sm:$0xff]   ;;  %v13779_v63 = vld [vmem:[#allocation5 + $0xb64] ss:$40 sps:$4 sm:$0xff]  }
 0x29e   :  { %9309 = vmatprep.subr.bf16.mxu1 %v13722_v0  ;;  %v13812_v0 = vld [vmem:[#allocation8 + $0xb44] ss:$40 sps:$4 sm:$0xff]  }
 0x2a0   :  { %4272 = vmatpush1.bf16.msra.mxu0 %v13717_v1  ;;  %v13777_v1 = vld [vmem:[#allocation5 + $0xb60] ss:$40 sps:$4 sm:$0xff]  }
 0x2a1   :  { %9310 = vmatpush1.bf16.msra.mxu1 %v13720_v3  ;;  %4273 = vmatprep.subr.bf16.mxu0 %v13725_v6  ;;  %v13782_v3 = vld [vmem:[#allocation5 + $0xbb4] ss:$40 sps:$4 sm:$0xff]  }
 0x2a2   :  { %9311 = vmatprep.subr.bf16.mxu1 %v13728_v7  ;;  %v13818_v6 = vld [vmem:[#allocation8 + $0xb94] ss:$40 sps:$4 sm:$0xff]   ;;  %v13780_v7 = vld [vmem:[#allocation5 + $0xbb0] ss:$40 sps:$4 sm:$0xff]  }
 0x2a4   :  { %4274 = vmatpush1.bf16.msra.mxu0 %v13723_v9  ;;  %v13785_v9 = vld [vmem:[#allocation5 + $0xc04] ss:$40 sps:$4 sm:$0xff]  }
 0x2a5   :  { %9312 = vmatpush1.bf16.msra.mxu1 %v13726_v11  ;;  %4275 = vmatprep.subr.bf16.mxu0 %v13731_v12  ;;  %v13816_v11 = vld [vmem:[#allocation8 + $0xb90] ss:$40 sps:$4 sm:$0xff]   ;;  %v13824_v12 = vld [vmem:[#allocation8 + $0xbe4] ss:$40 sps:$4 sm:$0xff]  }
 0x2a6   :  { %9313 = vmatprep.subr.bf16.mxu1 %v13734_v14  ;;  %v13783_v14 = vld [vmem:[#allocation5 + $0xc00] ss:$40 sps:$4 sm:$0xff]  }
 0x2a8   :  { %4276 = vmatpush1.bf16.msra.mxu0 %v13729_v16  ;;  %v13791_v16 = vld [vmem:[#allocation5 + $0xc54] ss:$40 sps:$4 sm:$0xff]  }
 0x2a9   :  { %9314 = vmatpush1.bf16.msra.mxu1 %v13732_v17  ;;  %4277 = vmatprep.subr.bf16.mxu0 %v13737_v18  ;;  %v13822_v17 = vld [vmem:[#allocation8 + $0xbe0] ss:$40 sps:$4 sm:$0xff]   ;;  %v13830_v18 = vld [vmem:[#allocation8 + $0xc34] ss:$40 sps:$4 sm:$0xff]  }
 0x2aa   :  { %9315 = vmatprep.subr.bf16.mxu1 %v13740_v20  ;;  %v13789_v20 = vld [vmem:[#allocation5 + $0xc50] ss:$40 sps:$4 sm:$0xff]  }
 0x2ac   :  { %4278 = vmatpush1.bf16.msra.mxu0 %v13735_v21  ;;  %v13828_v21 = vld [vmem:[#allocation8 + $0xc30] ss:$40 sps:$4 sm:$0xff]  }
 0x2ad   :  { %9316 = vmatpush1.bf16.msra.mxu1 %v13738_v22  ;;  %4279 = vmatprep.subr.bf16.mxu0 %v13743_v23  ;;  %v13797_v22 = vld [vmem:[#allocation5 + $0xca4] ss:$40 sps:$4 sm:$0xff]  }
 0x2ae   :  { %9317 = vmatprep.subr.bf16.mxu1 %v13746_v24  ;;  %v13836_v23 = vld [vmem:[#allocation8 + $0xc84] ss:$40 sps:$4 sm:$0xff]   ;;  %v13795_v24 = vld [vmem:[#allocation5 + $0xca0] ss:$40 sps:$4 sm:$0xff]  }
 0x2b0   :  { %4280 = vmatpush1.bf16.msra.mxu0 %v13741_v25  ;;  %v13834_v25 = vld [vmem:[#allocation8 + $0xc80] ss:$40 sps:$4 sm:$0xff]  }
 0x2b1   :  { %9318 = vmatpush1.bf16.msra.mxu1 %v13744_v13  ;;  %4281 = vmatprep.subr.bf16.mxu0 %v13749_v39  ;;  %v13803_v13 = vld [vmem:[#allocation5 + $0xcf4] ss:$40 sps:$4 sm:$0xff]  }
 0x2b2   :  { %9319 = vmatprep.subr.bf16.mxu1 %v13752_v48  ;;  %v13842_v39 = vld [vmem:[#allocation8 + $0xcd4] ss:$40 sps:$4 sm:$0xff]   ;;  %v13801_v48 = vld [vmem:[#allocation5 + $0xcf0] ss:$40 sps:$4 sm:$0xff]  }
 0x2b4   :  { %4282 = vmatpush1.bf16.msra.mxu0 %v13747_v28  ;;  %v13809_v28 = vld [vmem:[#allocation5 + $0xd44] ss:$40 sps:$4 sm:$0xff]  }
 0x2b5   :  { %9320 = vmatpush1.bf16.msra.mxu1 %v13750_v45  ;;  %4283 = vmatprep.subr.bf16.mxu0 %v13755_v50  ;;  %v13840_v45 = vld [vmem:[#allocation8 + $0xcd0] ss:$40 sps:$4 sm:$0xff]   ;;  %v13848_v50 = vld [vmem:[#allocation8 + $0xd24] ss:$40 sps:$4 sm:$0xff]  }
 0x2b6   :  { %9321 = vmatprep.subr.bf16.mxu1 %v13758_v32  ;;  %v13807_v32 = vld [vmem:[#allocation5 + $0xd40] ss:$40 sps:$4 sm:$0xff]  }
 0x2b8   :  { %4284 = vmatpush1.bf16.msra.mxu0 %v13753_v36  ;;  %v13846_v36 = vld [vmem:[#allocation8 + $0xd20] ss:$40 sps:$4 sm:$0xff]  }
 0x2b9   :  { %9322 = vmatpush1.bf16.msra.mxu1 %v13756_v37  ;;  %4285 = vmatprep.subr.bf16.mxu0 %v13761_v38  ;;  %v13854_v37 = vld [vmem:[#allocation8 + $0xd74] ss:$40 sps:$4 sm:$0xff]   ;;  %v13813_v38 = vld [vmem:[#allocation5 + $0xd90] ss:$40 sps:$4 sm:$0xff]  }
 0x2ba   :  { %9323 = vmatprep.subr.bf16.mxu1 %v13764_v41  ;;  %v13821_v41 = vld [vmem:[#allocation5 + $0xde4] ss:$40 sps:$4 sm:$0xff]  }
 0x2bc   :  { %4286 = vmatpush1.bf16.msra.mxu0 %v13759_v42  ;;  %v13860_v42 = vld [vmem:[#allocation8 + $0xdc4] ss:$40 sps:$4 sm:$0xff]  }
 0x2bd   :  { %9324 = vmatpush1.bf16.msra.mxu1 %v13762_v43  ;;  %4296 = vmatprep.subr.bf16.mxu0 %v13767_v44  ;;  %v13819_v43 = vld [vmem:[#allocation5 + $0xde0] ss:$40 sps:$4 sm:$0xff]   ;;  %v13827_v44 = vld [vmem:[#allocation5 + $0xe34] ss:$40 sps:$4 sm:$0xff]  }
 0x2be   :  { %9334 = vmatprep.subr.bf16.mxu1 %v13788_v47  ;;  %v13858_v47 = vld [vmem:[#allocation8 + $0xdc0] ss:$40 sps:$4 sm:$0xff]  }
 0x2bf   :  { %4288 = vmatmul.mubr.bf16.vlgmr.msra.gmra.mrb[8].mxu0 %v15366_v10  ;;  %v13804_v10 = vld [vmem:[#allocation8 + $0xaf0] ss:$40 sps:$4 sm:$0xff]  }
 0x2c0   :  { %9326 = vmatmul.mubr.bf16.vlgmr.msra.gmra.mrb[8].mxu1 %v15445_v54  ;;  %4297 = vmatpush1.bf16.msra.mxu0 %v13765_v30  ;;  %v13825_v30 = vld [vmem:[#allocation5 + $0xe30] ss:$40 sps:$4 sm:$0xff]  }
 0x2c1   :  { %9335 = vmatpush1.bf16.msra.mxu1 %v13786_v52  ;;  %4298 = vmatprep.subr.bf16.mxu0 %v13770_v51  ;;  %v13833_v51 = vld [vmem:[#allocation5 + $0xe84] ss:$40 sps:$4 sm:$0xff]  }
 0x2c2   :  { %9336 = vmatprep.subr.bf16.mxu1 %v13794_v53  ;;  %4328 = vmatprep.mubr.bf16.mxu0 %v15372_v15  ;;  %v13810_v15 = vld [vmem:[#allocation8 + $0xb40] ss:$40 sps:$4 sm:$0xff]   ;;  %v13864_v52 = vld [vmem:[#allocation8 + $0xe10] ss:$40 sps:$4 sm:$0xff]   ;;  %v13872_v53 = vld [vmem:[#allocation8 + $0xe64] ss:$40 sps:$4 sm:$0xff]  }
 0x2c4   :  { %4299 = vmatpush1.bf16.msra.mxu0 %v13768_v46  ;;  %v13831_v46 = vld [vmem:[#allocation5 + $0xe80] ss:$40 sps:$4 sm:$0xff]  }
 0x2c5   :  { %9337 = vmatpush1.bf16.msra.mxu1 %v13792_v56  ;;  %4300 = vmatprep.subr.bf16.mxu0 %v13773_v55  ;;  %v13839_v55 = vld [vmem:[#allocation5 + $0xed4] ss:$40 sps:$4 sm:$0xff]  }
 0x2c6   :  { %9338 = vmatprep.subr.bf16.mxu1 %v13800_v57  ;;  %v13870_v56 = vld [vmem:[#allocation8 + $0xe60] ss:$40 sps:$4 sm:$0xff]   ;;  %v13878_v57 = vld [vmem:[#allocation8 + $0xeb4] ss:$40 sps:$4 sm:$0xff]  }
 0x2c8   :  { %4301 = vmatpush1.bf16.msra.mxu0 %v13771_v58  ;;  %v13837_v58 = vld [vmem:[#allocation5 + $0xed0] ss:$40 sps:$4 sm:$0xff]  }
 0x2c9   :  { %9339 = vmatpush1.bf16.msra.mxu1 %v13798_v60  ;;  %4302 = vmatprep.subr.bf16.mxu0 %v13776_v59  ;;  %v13845_v59 = vld [vmem:[#allocation5 + $0xf24] ss:$40 sps:$4 sm:$0xff]  }
 0x2ca   :  { %9340 = vmatprep.subr.bf16.mxu1 %v13806_v61  ;;  %v13876_v60 = vld [vmem:[#allocation8 + $0xeb0] ss:$40 sps:$4 sm:$0xff]   ;;  %v13884_v61 = vld [vmem:[#allocation8 + $0xf04] ss:$40 sps:$4 sm:$0xff]  }
 0x2cc   :  { %4303 = vmatpush1.bf16.msra.mxu0 %v13774_v62  ;;  %v13843_v62 = vld [vmem:[#allocation5 + $0xf20] ss:$40 sps:$4 sm:$0xff]  }
 0x2cd   :  { %9341 = vmatpush1.bf16.msra.mxu1 %v13804_v10  ;;  %4304 = vmatprep.subr.bf16.mxu0 %v13779_v63  ;;  %v13851_v63 = vld [vmem:[#allocation5 + $0xf74] ss:$40 sps:$4 sm:$0xff]   ;;  %v13849_v10 = vld [vmem:[#allocation5 + $0xf70] ss:$40 sps:$4 sm:$0xff]  }
 0x2ce   :  { %9342 = vmatprep.subr.bf16.mxu1 %v13812_v0  ;;  %v13857_v0 = vld [vmem:[#allocation5 + $0xfc4] ss:$40 sps:$4 sm:$0xff]  }
 0x2d0   :  { %4305 = vmatpush1.bf16.msra.mxu0 %v13777_v1  ;;  %v13855_v1 = vld [vmem:[#allocation5 + $0xfc0] ss:$40 sps:$4 sm:$0xff]  }
 0x2d1   :  { %9343 = vmatpush1.bf16.msra.mxu1 %v13810_v15  ;;  %4306 = vmatprep.subr.bf16.mxu0 %v13782_v3  ;;  %v13863_v3 = vld [vmem:[#allocation5 + $0x1014] ss:$40 sps:$4 sm:$0xff]   ;;  %v13861_v15 = vld [vmem:[#allocation5 + $0x1010] ss:$40 sps:$4 sm:$0xff]  }
 0x2d2   :  { %9344 = vmatprep.subr.bf16.mxu1 %v13818_v6  ;;  %v13869_v6 = vld [vmem:[#allocation5 + $0x1064] ss:$40 sps:$4 sm:$0xff]  }
 0x2d4   :  { %4307 = vmatpush1.bf16.msra.mxu0 %v13780_v7  ;;  %v13867_v7 = vld [vmem:[#allocation5 + $0x1060] ss:$40 sps:$4 sm:$0xff]  }
 0x2d5   :  { %9345 = vmatpush1.bf16.msra.mxu1 %v13816_v11  ;;  %4308 = vmatprep.subr.bf16.mxu0 %v13785_v9  ;;  %v701_v9 = vsub.s32 4, %v15400_v34  ;;  %v713_v11 = vsub.s32 7, %v15400_v34 }
 0x2d6   :  { %9346 = vmatprep.subr.bf16.mxu1 %v13824_v12  ;;  %v13875_v12 = vld [vmem:[#allocation5 + $0x10b4] ss:$40 sps:$4 sm:$0xff]  }
 0x2d8   :  { %4309 = vmatpush1.bf16.msra.mxu0 %v13783_v14 }
 0x2d9   :  { %9347 = vmatpush1.bf16.msra.mxu1 %v13822_v17  ;;  %4310 = vmatprep.subr.bf16.mxu0 %v13791_v16  ;;  %v714_v16 = vrot.slane %v15439_v33, %v713_v11  ;;  %v13873_v17 = vld [vmem:[#allocation5 + $0x10b0] ss:$40 sps:$4 sm:$0xff]  }
 0x2da   :  { %9348 = vmatprep.subr.bf16.mxu1 %v13830_v18  ;;  %v13881_v18 = vld [vmem:[#allocation5 + $0x1104] ss:$40 sps:$4 sm:$0xff]  }
 0x2dc   :  { %4311 = vmatpush1.bf16.msra.mxu0 %v13789_v20 }
 0x2dd   :  { %9349 = vmatpush1.bf16.msra.mxu1 %v13828_v21  ;;  %4312 = vmatprep.subr.bf16.mxu0 %v13797_v22 }
 0x2de   :  { %9350 = vmatprep.subr.bf16.mxu1 %v13836_v23 }
 0x2e0   :  { %4313 = vmatpush1.bf16.msra.mxu0 %v13795_v24 }
 0x2e1   :  { %9351 = vmatpush1.bf16.msra.mxu1 %v13834_v25  ;;  %4314 = vmatprep.subr.bf16.mxu0 %v13803_v13 }
 0x2e2   :  { %9352 = vmatprep.subr.bf16.mxu1 %v13842_v39 }
 0x2e4   :  { %4315 = vmatpush1.bf16.msra.mxu0 %v13801_v48 }
 0x2e5   :  { %9353 = vmatpush1.bf16.msra.mxu1 %v13840_v45  ;;  %4316 = vmatprep.subr.bf16.mxu0 %v13809_v28  ;;  %v13879_v28 = vld [vmem:[#allocation5 + $0x1100] ss:$40 sps:$4 sm:$0xff]   ;;  %v13887_v45 = vld [vmem:[#allocation5 + $0x1154] ss:$40 sps:$4 sm:$0xff]  }
 0x2e6   :  { %9354 = vmatprep.subr.bf16.mxu1 %v13848_v50 }
 0x2e8   :  { %4317 = vmatpush1.bf16.msra.mxu0 %v13807_v32 }
 0x2e9   :  { %9355 = vmatpush1.bf16.msra.mxu1 %v13846_v36  ;;  %4318 = vmatprep.subr.bf16.mxu0 %v13815_v35  ;;  %v13882_v36 = vld [vmem:[#allocation8 + $0xf00] ss:$40 sps:$4 sm:$0xff]  }
 0x2ea   :  { %9356 = vmatprep.subr.bf16.mxu1 %v13854_v37  ;;  %v13885_v37 = vld [vmem:[#allocation5 + $0x1150] ss:$40 sps:$4 sm:$0xff]  }
 0x2ec   :  { %4319 = vmatpush1.bf16.msra.mxu0 %v13813_v38 }
 0x2ed   :  { %9357 = vmatpush1.bf16.msra.mxu1 %v13852_v5  ;;  %4320 = vmatprep.subr.bf16.mxu0 %v13821_v41  ;;  %v13890_v5 = vld [vmem:[#allocation8 + $0xf54] ss:$40 sps:$4 sm:$0xff]  }
 0x2ee   :  { %9358 = vmatprep.subr.bf16.mxu1 %v13860_v42  ;;  %v13893_v42 = vld [vmem:[#allocation8 + $0xc] ss:$40 sps:$4 sm:$0xff]  }
 0x2f0   :  { %4321 = vmatpush1.bf16.msra.mxu0 %v13819_v43 }
 0x2f1   :  { %9359 = vmatpush1.bf16.msra.mxu1 %v13858_v47  ;;  %4322 = vmatprep.subr.bf16.mxu0 %v13827_v44  ;;  %v13888_v44 = vld [vmem:[#allocation8 + $0xf50] ss:$40 sps:$4 sm:$0xff]  }
 0x2f2   :  { %9360 = vmatprep.subr.bf16.mxu1 %v13866_v49  ;;  %v13891_v47 = vld [vmem:[#allocation8 + $0x8] ss:$40 sps:$4 sm:$0xff]  }
 0x2f4   :  { %4323 = vmatpush1.bf16.msra.mxu0 %v13825_v30  ;;  %v13896_v30 = vld [vmem:[#allocation8 + $0xfa4] ss:$40 sps:$4 sm:$0xff]  }
 0x2f5   :  { %9361 = vmatpush1.bf16.msra.mxu1 %v13864_v52  ;;  %4324 = vmatprep.subr.bf16.mxu0 %v13833_v51  ;;  %v13894_v51 = vld [vmem:[#allocation8 + $0xfa0] ss:$40 sps:$4 sm:$0xff]   ;;  %v13899_v52 = vld [vmem:[#allocation8 + $0x5c] ss:$40 sps:$4 sm:$0xff]  }
 0x2f6   :  { %9362 = vmatprep.subr.bf16.mxu1 %v13872_v53  ;;  %v15023_v53 = vld [vmem:[#allocation2 + $0x18] ss:$0 sps:$4 sm:$0xff]  }
 0x2f8   :  { %4325 = vmatpush1.bf16.msra.mxu0 %v13831_v46  ;;  %v13897_v46 = vld [vmem:[#allocation8 + $0x58] ss:$40 sps:$4 sm:$0xff]  }
 0x2f9   :  { %9363 = vmatpush1.bf16.msra.mxu1 %v13870_v56  ;;  %4326 = vmatprep.subr.bf16.mxu0 %v13839_v55  ;;  %v13902_v55 = vld [vmem:[#allocation8 + $0xff4] ss:$40 sps:$4 sm:$0xff]  }
 0x2fa   :  { %9364 = vmatprep.subr.bf16.mxu1 %v13878_v57  ;;  %v13905_v56 = vld [vmem:[#allocation8 + $0xac] ss:$40 sps:$4 sm:$0xff]   ;;  %v13900_v57 = vld [vmem:[#allocation8 + $0xff0] ss:$40 sps:$4 sm:$0xff]  }
 0x2fc   :  { %4327 = vmatpush1.bf16.msra.mxu0 %v13837_v58  ;;  %v13903_v58 = vld [vmem:[#allocation8 + $0xa8] ss:$40 sps:$4 sm:$0xff]  }
 0x2fd   :  { %9365 = vmatpush1.bf16.msra.mxu1 %v13876_v60  ;;  %4337 = vmatprep.subr.bf16.mxu0 %v13845_v59  ;;  %v13908_v59 = vld [vmem:[#allocation8 + $0x1044] ss:$40 sps:$4 sm:$0xff]  }
 0x2fe   :  { %9375 = vmatprep.subr.bf16.mxu1 %v13884_v61  ;;  %v13911_v60 = vld [vmem:[#allocation8 + $0xfc] ss:$40 sps:$4 sm:$0xff]   ;;  %v13906_v61 = vld [vmem:[#allocation8 + $0x1040] ss:$40 sps:$4 sm:$0xff]  }
 0x2ff   :  { %4329 = vmatmul.mubr.bf16.vlgmr.msra.gmra.mrb[8].mxu0 %v15380_v19  ;;  %v705_v19 = vsub.s32 5, %v15400_v34 }
 0x300   :  { %4338 = vmatpush1.bf16.msra.mxu0 %v13843_v62  ;;  %4369 = vmatprep.mubr.bf16.mxu0 %v15222_v26  ;;  %v702_v26 = vrot.slane %v15439_v33, %v701_v9  ;;  %v13909_v62 = vld [vmem:[#allocation8 + $0xf8] ss:$40 sps:$4 sm:$0xff]  }
 0x301   :  { %4339 = vmatprep.subr.bf16.mxu0 %v13851_v63  ;;  %v706_v14 = vrot.slane %v15439_v33, %v705_v19  ;;  %v13914_v63 = vld [vmem:[#allocation8 + $0x1094] ss:$40 sps:$4 sm:$0xff]  }
 0x304   :  { %4340 = vmatpush1.bf16.msra.mxu0 %v13849_v10  ;;  %v13917_v10 = vld [vmem:[#allocation8 + $0x14c] ss:$40 sps:$4 sm:$0xff]  }
 0x305   :  { %4341 = vmatprep.subr.bf16.mxu0 %v13857_v0  ;;  %v13912_v0 = vld [vmem:[#allocation8 + $0x1090] ss:$40 sps:$4 sm:$0xff]  }
 0x308   :  { %4342 = vmatpush1.bf16.msra.mxu0 %v13855_v1  ;;  %v13915_v1 = vld [vmem:[#allocation8 + $0x148] ss:$40 sps:$4 sm:$0xff]  }
 0x309   :  { %4343 = vmatprep.subr.bf16.mxu0 %v13863_v3  ;;  %v13920_v3 = vld [vmem:[#allocation8 + $0x10e4] ss:$40 sps:$4 sm:$0xff]  }
 0x30c   :  { %4344 = vmatpush1.bf16.msra.mxu0 %v13861_v15  ;;  %v13923_v15 = vld [vmem:[#allocation8 + $0x19c] ss:$40 sps:$4 sm:$0xff]  }
 0x30d   :  { %4345 = vmatprep.subr.bf16.mxu0 %v13869_v6  ;;  %v13918_v6 = vld [vmem:[#allocation8 + $0x10e0] ss:$40 sps:$4 sm:$0xff]  }
 0x310   :  { %4346 = vmatpush1.bf16.msra.mxu0 %v13867_v7  ;;  %v13921_v7 = vld [vmem:[#allocation8 + $0x198] ss:$40 sps:$4 sm:$0xff]  }
 0x311   :  { %4347 = vmatprep.subr.bf16.mxu0 %v13875_v12  ;;  %v13926_v12 = vld [vmem:[#allocation8 + $0x1134] ss:$40 sps:$4 sm:$0xff]  }
 0x312   :  { %v4043_v20 = vpop.f32.mrb[4].mxu0 }
 0x313   :  { %v15464_v21 = vpop.f32.mrb[4].mxu1  ;;  %v12725_v22 = vadd.f32 %v4043_v20, %v702_v26  ;;  %v4045_v23 = vpop.f32.mrb[5].mxu0  ;;  %v13929_v26 = vld [vmem:[#allocation8 + $0x1ec] ss:$40 sps:$4 sm:$0xff]   ;;  %v13930_v20 = vld [vmem:[#allocation8 + $0x1180] ss:$40 sps:$4 sm:$0xff]  }
 0x314   :  { %v4209_v24 = vpop.f32.mrb[5].mxu1  ;;  %v12726_v25 = vadd.f32 %v4045_v23, %v706_v14  ;;  %v4047_v39 = vpop.f32.mrb[6].mxu0  ;;  %4348 = vmatpush1.bf16.msra.mxu0 %v13873_v17  ;;  %v13924_v14 = vld [vmem:[#allocation8 + $0x1130] ss:$40 sps:$4 sm:$0xff]   ;;  %v13932_v17 = vld [vmem:[#allocation8 + $0x1184] ss:$40 sps:$4 sm:$0xff]  }
 0x315   :  { %v12728_v13 = vadd.f32 %v4209_v24, %v714_v16  ;;  %v4211_v48 = vpop.f32.mrb[6].mxu1  ;;  %v4382_v50 = vmax.f32 %v12725_v22, 0.0  ;;  %v4048_v32 = vpop.f32.mrb[7].mxu0  ;;  %4349 = vmatprep.subr.bf16.mxu0 %v13881_v18  ;;  %v13927_v16 = vld [vmem:[#allocation8 + $0x1e8] ss:$40 sps:$4 sm:$0xff]  }
 0x316   :  { %v4212_v35 = vpop.f32.mrb[7].mxu1  ;;  %v4383_v33 = vmax.f32 %v12726_v25, 0.0  ;;  %v13935_v18 = vld [vmem:[#allocation8 + $0x23c] ss:$40 sps:$4 sm:$0xff]   ;;  %v13933_v22 = vld [vmem:[#allocation8 + $0x238] ss:$40 sps:$4 sm:$0xff]  }
 0x317   :  { %v4385_v38 = vmax.f32 %v12728_v13, 0.0  ;;  %v15468_v43 = vpack.c.bf16 %v4382_v50, %v4382_v50  ;;  %v13938_v23 = vld [vmem:[#allocation8 + $0x11d4] ss:$40 sps:$4 sm:$0xff]   ;;  %v13936_v25 = vld [vmem:[#allocation8 + $0x11d0] ss:$40 sps:$4 sm:$0xff]  }
 0x318   :  { %v15466_v41 = vpack.c.bf16 %v4383_v33, %v4383_v33  ;;  %4350 = vmatpush1.bf16.msra.mxu0 %v13879_v28  ;;  %v13941_v24 = vld [vmem:[#allocation8 + $0x28c] ss:$40 sps:$4 sm:$0xff]   ;;  %v13939_v13 = vld [vmem:[#allocation8 + $0x288] ss:$40 sps:$4 sm:$0xff]   ;;  %v13947_v48 = vld [vmem:[#allocation8 + $0x2dc] ss:$40 sps:$4 sm:$0xff]  }
 0x319   :  { %4351 = vmatprep.subr.bf16.mxu0 %v13887_v45  ;;  %v15471_v49 = vpack.c.bf16 %v4385_v38, %v4385_v38  ;;  %v13944_v39 = vld [vmem:[#allocation8 + $0x1224] ss:$40 sps:$4 sm:$0xff]   ;;  %v13942_v28 = vld [vmem:[#allocation8 + $0x1220] ss:$40 sps:$4 sm:$0xff]   ;;  %v13950_v50 = vld [vmem:[#allocation8 + $0x1274] ss:$40 sps:$4 sm:$0xff]  }
 0x31a   :  { %9366 = vmatprep.mubr.bf16.mxu1 %v15466_v41  ;;  %v13945_v45 = vld [vmem:[#allocation8 + $0x2d8] ss:$40 sps:$4 sm:$0xff]   ;;  %v13953_v32 = vld [vmem:[#allocation8 + $0x32c] ss:$40 sps:$4 sm:$0xff]   ;;  %v13951_v33 = vld [vmem:[#allocation8 + $0x328] ss:$40 sps:$4 sm:$0xff]  }
 0x31b   :  { %9367 = vmatmul.mubr.bf16.vlgmr.msra.gmra.mrb[8].mxu1 %v15468_v43  ;;  %v13948_v35 = vld [vmem:[#allocation8 + $0x1270] ss:$40 sps:$4 sm:$0xff]   ;;  %v709_v38 = vsub.s32 6, %v15400_v34 }
 0x31c   :  { %9376 = vmatpush1.bf16.msra.mxu1 %v13882_v36  ;;  %4352 = vmatpush1.bf16.msra.mxu0 %v13885_v37  ;;  %v13956_v36 = vld [vmem:[#allocation8 + $0x12c4] ss:$40 sps:$4 sm:$0xff]   ;;  %v15007_v34 = vld [vmem:[#allocation11 + $0x248] sm:$0xff]  }
 0x31d   :  { %9407 = vmatprep.mubr.bf16.mxu1 %v15471_v49  ;;  %9377 = vmatprep.subr.bf16.mxu1 %v13890_v5  ;;  %v13959_v37 = vld [vmem:[#allocation8 + $0x37c] ss:$40 sps:$4 sm:$0xff]   ;;  %v13954_v5 = vld [vmem:[#allocation8 + $0x12c0] ss:$40 sps:$4 sm:$0xff]  }
 0x31e   :  { %9457 = vmatprep.subr.bf16.mxu0 %v13893_v42  ;;  %v13957_v42 = vld [vmem:[#allocation8 + $0x378] ss:$40 sps:$4 sm:$0xff]  }
 0x31f   :  { %4370 = vmatmul.mubr.bf16.vlgmr.msra.gmra.mrb[8].mxu0 %v15023_v53  ;;  %v13963_v53 = vld [vmem:[#allocation8 + $0x3c8] ss:$40 sps:$4 sm:$0xff]  }
 0x320   :  { %9378 = vmatpush1.bf16.msra.mxu1 %v13888_v44  ;;  %9458 = vmatpush1.bf16.msra.mxu0 %v13891_v47  ;;  %v13962_v44 = vld [vmem:[#allocation8 + $0x1314] ss:$40 sps:$4 sm:$0xff]  }
 0x321   :  { %9489 = vmatprep.mubr.bf16.mxu0 %v15415_v8  ;;  %9379 = vmatprep.subr.bf16.mxu1 %v13896_v30  ;;  %v13965_v47 = vld [vmem:[#allocation8 + $0x3cc] ss:$40 sps:$4 sm:$0xff]  }
 0x322   :  { %9459 = vmatprep.subr.bf16.mxu0 %v13899_v52  ;;  %v15024_v30 = vld [vmem:[#allocation7] sm:$0xff] }
 0x323   :  { %v13960_v52 = vld [vmem:[#allocation8 + $0x1310] ss:$40 sps:$4 sm:$0xff]  }
 0x324   :  { %9380 = vmatpush1.bf16.msra.mxu1 %v13894_v51  ;;  %9460 = vmatpush1.bf16.msra.mxu0 %v13897_v46  ;;  %v710_v51 = vrot.slane %v15024_v30, %v709_v38  ;;  %v13968_v46 = vld [vmem:[#allocation8 + $0x1364] ss:$40 sps:$4 sm:$0xff]   ;;  %v14002_v30 = vld [vmem:[#allocation8 + $0x738] ss:$40 sps:$4 sm:$0xff]  }
 0x325   :  { %9381 = vmatprep.subr.bf16.mxu1 %v13902_v55  ;;  %9461 = vmatprep.subr.bf16.mxu0 %v13905_v56  ;;  %v13971_v55 = vld [vmem:[#allocation8 + $0x41c] ss:$40 sps:$4 sm:$0xff]  }
 0x326   :  { %v12727_v56 = vadd.f32 %v15464_v21, %v710_v51  ;;  %v13978_v21 = vld [vmem:[#allocation8 + $0x4b8] ss:$40 sps:$4 sm:$0xff]   ;;  %v14100_v51 = vld [vmem:[#allocation8 + $0x1684] ss:$40 sps:$4 sm:$0xff]  }
 0x328   :  { %9382 = vmatpush1.bf16.msra.mxu1 %v13900_v57  ;;  %9462 = vmatpush1.bf16.msra.mxu0 %v13903_v58  ;;  %v13966_v57 = vld [vmem:[#allocation8 + $0x1360] ss:$40 sps:$4 sm:$0xff]  }
 0x329   :  { %9383 = vmatprep.subr.bf16.mxu1 %v13908_v59  ;;  %9463 = vmatprep.subr.bf16.mxu0 %v13911_v60  ;;  %v13969_v58 = vld [vmem:[#allocation8 + $0x418] ss:$40 sps:$4 sm:$0xff]   ;;  %v13974_v59 = vld [vmem:[#allocation8 + $0x13b4] ss:$40 sps:$4 sm:$0xff]  }
 0x32a   :  { %v13977_v60 = vld [vmem:[#allocation8 + $0x46c] ss:$40 sps:$4 sm:$0xff]  }
 0x32c   :  { %9384 = vmatpush1.bf16.msra.mxu1 %v13906_v61  ;;  %9464 = vmatpush1.bf16.msra.mxu0 %v13909_v62  ;;  %v13972_v61 = vld [vmem:[#allocation8 + $0x13b0] ss:$40 sps:$4 sm:$0xff]   ;;  %v4384_v62 = vmax.f32 %v12727_v56, 0.0  ;;  %v14010_v56 = vld [vmem:[#allocation8 + $0x7dc] ss:$40 sps:$4 sm:$0xff]  }
 0x32d   :  { %9385 = vmatprep.subr.bf16.mxu1 %v13914_v63  ;;  %9465 = vmatprep.subr.bf16.mxu0 %v13917_v10  ;;  %v13975_v63 = vld [vmem:[#allocation8 + $0x468] ss:$40 sps:$4 sm:$0xff]   ;;  %v13980_v10 = vld [vmem:[#allocation8 + $0x4bc] ss:$40 sps:$4 sm:$0xff]  }
 0x330   :  { %9386 = vmatpush1.bf16.msra.mxu1 %v13912_v0  ;;  %9466 = vmatpush1.bf16.msra.mxu0 %v13915_v1  ;;  %v14052_v0 = vld [vmem:[#allocation8 + $0x1404] ss:$40 sps:$4 sm:$0xff]  }
 0x331   :  { %9387 = vmatprep.subr.bf16.mxu1 %v13920_v3  ;;  %9467 = vmatprep.subr.bf16.mxu0 %v13923_v15  ;;  %v13983_v1 = vld [vmem:[#allocation8 + $0x50c] ss:$40 sps:$4 sm:$0xff]   ;;  %v14050_v3 = vld [vmem:[#allocation8 + $0x1400] ss:$40 sps:$4 sm:$0xff]   ;;  %v15480_v15 = vpack.c.bf16 %v4384_v62, %v4384_v62 }
 0x332   :  { %v14118_v62 = vld [vmem:[#allocation8 + $0x1774] ss:$40 sps:$4 sm:$0xff]  }
 0x334   :  { %9388 = vmatpush1.bf16.msra.mxu1 %v13918_v6  ;;  %9468 = vmatpush1.bf16.msra.mxu0 %v13921_v7  ;;  %v14058_v6 = vld [vmem:[#allocation8 + $0x1454] ss:$40 sps:$4 sm:$0xff]   ;;  %v13981_v7 = vld [vmem:[#allocation8 + $0x508] ss:$40 sps:$4 sm:$0xff]  }
 0x335   :  { %9389 = vmatprep.subr.bf16.mxu1 %v13926_v12  ;;  %9469 = vmatprep.subr.bf16.mxu0 %v13929_v26  ;;  %v13986_v12 = vld [vmem:[#allocation8 + $0x55c] ss:$40 sps:$4 sm:$0xff]   ;;  %v14056_v26 = vld [vmem:[#allocation8 + $0x1450] ss:$40 sps:$4 sm:$0xff]  }
 0x338   :  { %9390 = vmatpush1.bf16.msra.mxu1 %v13924_v14  ;;  %9470 = vmatpush1.bf16.msra.mxu0 %v13927_v16  ;;  %v14064_v14 = vld [vmem:[#allocation8 + $0x14a4] ss:$40 sps:$4 sm:$0xff]   ;;  %v13984_v16 = vld [vmem:[#allocation8 + $0x558] ss:$40 sps:$4 sm:$0xff]  }
 0x339   :  { %9391 = vmatprep.subr.bf16.mxu1 %v13932_v17  ;;  %9471 = vmatprep.subr.bf16.mxu0 %v13935_v18  ;;  %v13989_v17 = vld [vmem:[#allocation8 + $0x5ac] ss:$40 sps:$4 sm:$0xff]   ;;  %v14062_v18 = vld [vmem:[#allocation8 + $0x14a0] ss:$40 sps:$4 sm:$0xff]  }
 0x33c   :  { %9392 = vmatpush1.bf16.msra.mxu1 %v13930_v20  ;;  %9472 = vmatpush1.bf16.msra.mxu0 %v13933_v22  ;;  %v14070_v20 = vld [vmem:[#allocation8 + $0x14f4] ss:$40 sps:$4 sm:$0xff]   ;;  %v13987_v22 = vld [vmem:[#allocation8 + $0x5a8] ss:$40 sps:$4 sm:$0xff]  }
 0x33d   :  { %9393 = vmatprep.subr.bf16.mxu1 %v13938_v23  ;;  %9473 = vmatprep.subr.bf16.mxu0 %v13941_v24  ;;  %v13992_v23 = vld [vmem:[#allocation8 + $0x5fc] ss:$40 sps:$4 sm:$0xff]   ;;  %v14068_v24 = vld [vmem:[#allocation8 + $0x14f0] ss:$40 sps:$4 sm:$0xff]  }
 0x340   :  { %9394 = vmatpush1.bf16.msra.mxu1 %v13936_v25  ;;  %9474 = vmatpush1.bf16.msra.mxu0 %v13939_v13  ;;  %v14076_v25 = vld [vmem:[#allocation8 + $0x1544] ss:$40 sps:$4 sm:$0xff]   ;;  %v13990_v13 = vld [vmem:[#allocation8 + $0x5f8] ss:$40 sps:$4 sm:$0xff]  }
 0x341   :  { %9395 = vmatprep.subr.bf16.mxu1 %v13944_v39  ;;  %9475 = vmatprep.subr.bf16.mxu0 %v13947_v48  ;;  %v13995_v39 = vld [vmem:[#allocation8 + $0x64c] ss:$40 sps:$4 sm:$0xff]   ;;  %v14074_v48 = vld [vmem:[#allocation8 + $0x1540] ss:$40 sps:$4 sm:$0xff]  }
 0x344   :  { %9396 = vmatpush1.bf16.msra.mxu1 %v13942_v28  ;;  %9476 = vmatpush1.bf16.msra.mxu0 %v13945_v45  ;;  %v14082_v28 = vld [vmem:[#allocation8 + $0x1594] ss:$40 sps:$4 sm:$0xff]   ;;  %v13993_v45 = vld [vmem:[#allocation8 + $0x648] ss:$40 sps:$4 sm:$0xff]  }
 0x345   :  { %9397 = vmatprep.subr.bf16.mxu1 %v13950_v50  ;;  %9477 = vmatprep.subr.bf16.mxu0 %v13953_v32  ;;  %v13998_v50 = vld [vmem:[#allocation8 + $0x69c] ss:$40 sps:$4 sm:$0xff]   ;;  %v14080_v32 = vld [vmem:[#allocation8 + $0x1590] ss:$40 sps:$4 sm:$0xff]  }
 0x348   :  { %9398 = vmatpush1.bf16.msra.mxu1 %v13948_v35  ;;  %9478 = vmatpush1.bf16.msra.mxu0 %v13951_v33  ;;  %v14088_v35 = vld [vmem:[#allocation8 + $0x15e4] ss:$40 sps:$4 sm:$0xff]   ;;  %v13996_v33 = vld [vmem:[#allocation8 + $0x698] ss:$40 sps:$4 sm:$0xff]  }
 0x349   :  { %9399 = vmatprep.subr.bf16.mxu1 %v13956_v36  ;;  %9479 = vmatprep.subr.bf16.mxu0 %v13959_v37  ;;  %v14001_v36 = vld [vmem:[#allocation8 + $0x6ec] ss:$40 sps:$4 sm:$0xff]   ;;  %v14086_v37 = vld [vmem:[#allocation8 + $0x15e0] ss:$40 sps:$4 sm:$0xff]  }
 0x34c   :  { %9400 = vmatpush1.bf16.msra.mxu1 %v13954_v5  ;;  %9480 = vmatpush1.bf16.msra.mxu0 %v13957_v42  ;;  %v13999_v5 = vld [vmem:[#allocation8 + $0x6e8] ss:$40 sps:$4 sm:$0xff]   ;;  %v14094_v42 = vld [vmem:[#allocation8 + $0x1634] ss:$40 sps:$4 sm:$0xff]  }
 0x34d   :  { %9401 = vmatprep.subr.bf16.mxu1 %v13962_v44  ;;  %9481 = vmatprep.subr.bf16.mxu0 %v13965_v47  ;;  %v14004_v44 = vld [vmem:[#allocation8 + $0x73c] ss:$40 sps:$4 sm:$0xff]   ;;  %v14092_v47 = vld [vmem:[#allocation8 + $0x1630] ss:$40 sps:$4 sm:$0xff]  }
 0x350   :  { %9402 = vmatpush1.bf16.msra.mxu1 %v13960_v52  ;;  %9482 = vmatpush1.bf16.msra.mxu0 %v13963_v53  ;;  %v14007_v52 = vld [vmem:[#allocation8 + $0x78c] ss:$40 sps:$4 sm:$0xff]   ;;  %v14098_v53 = vld [vmem:[#allocation8 + $0x1680] ss:$40 sps:$4 sm:$0xff]  }
 0x351   :  { %9403 = vmatprep.subr.bf16.mxu1 %v13968_v46  ;;  %9483 = vmatprep.subr.bf16.mxu0 %v13971_v55  ;;  %v14106_v46 = vld [vmem:[#allocation8 + $0x16d4] ss:$40 sps:$4 sm:$0xff]   ;;  %v14005_v55 = vld [vmem:[#allocation8 + $0x788] ss:$40 sps:$4 sm:$0xff]  }
 0x354   :  { %9404 = vmatpush1.bf16.msra.mxu1 %v13966_v57  ;;  %9484 = vmatpush1.bf16.msra.mxu0 %v13969_v58  ;;  %v14104_v57 = vld [vmem:[#allocation8 + $0x16d0] ss:$40 sps:$4 sm:$0xff]   ;;  %v14112_v58 = vld [vmem:[#allocation8 + $0x1724] ss:$40 sps:$4 sm:$0xff]  }
 0x355   :  { %9405 = vmatprep.subr.bf16.mxu1 %v13974_v59  ;;  %9485 = vmatprep.subr.bf16.mxu0 %v13977_v60  ;;  %v14008_v59 = vld [vmem:[#allocation8 + $0x7d8] ss:$40 sps:$4 sm:$0xff]   ;;  %v14013_v60 = vld [vmem:[#allocation8 + $0x82c] ss:$40 sps:$4 sm:$0xff]  }
 0x358   :  { %9406 = vmatpush1.bf16.msra.mxu1 %v13972_v61  ;;  %9486 = vmatpush1.bf16.msra.mxu0 %v13975_v63  ;;  %v14110_v61 = vld [vmem:[#allocation8 + $0x1720] ss:$40 sps:$4 sm:$0xff]  }
 0x359   :  { %9487 = vmatprep.subr.bf16.mxu0 %v13980_v10  ;;  %9416 = vmatprep.subr.bf16.mxu1 %v14052_v0  ;;  %v14011_v63 = vld [vmem:[#allocation8 + $0x828] ss:$40 sps:$4 sm:$0xff]   ;;  %v14016_v10 = vld [vmem:[#allocation8 + $0x87c] ss:$40 sps:$4 sm:$0xff]  }
 0x35a   :  { %v14116_v0 = vld [vmem:[#allocation8 + $0x1770] ss:$40 sps:$4 sm:$0xff]  }
 0x35b   :  { %9408 = vmatmul.mubr.bf16.vlgmr.msra.gmra.mrb[8].mxu1 %v15480_v15 }
 0x35c   :  { %9488 = vmatpush1.bf16.msra.mxu0 %v13978_v21  ;;  %9417 = vmatpush1.bf16.msra.mxu1 %v14050_v3  ;;  %v14124_v21 = vld [vmem:[#allocation8 + $0x17c4] ss:$40 sps:$4 sm:$0xff]  }
 0x35d   :  { %9498 = vmatprep.subr.bf16.mxu0 %v13983_v1  ;;  %9418 = vmatprep.subr.bf16.mxu1 %v14058_v6  ;;  %v14014_v1 = vld [vmem:[#allocation8 + $0x878] ss:$40 sps:$4 sm:$0xff]   ;;  %v14019_v3 = vld [vmem:[#allocation8 + $0x8cc] ss:$40 sps:$4 sm:$0xff]  }
 0x35e   :  { %v14122_v6 = vld [vmem:[#allocation8 + $0x17c0] ss:$40 sps:$4 sm:$0xff]  }
 0x35f   :  { %9490 = vmatmul.mubr.bf16.vlgmr.msra.gmra.mrb[12].mxu0 %v15430_v29 }
 0x360   :  { %9499 = vmatpush1.bf16.msra.mxu0 %v13981_v7  ;;  %9530 = vmatprep.mubr.bf16.mxu0 %v15432_v31  ;;  %v14130_v7 = vld [vmem:[#allocation8 + $0x1814] ss:$40 sps:$4 sm:$0xff]  }
 0x361   :  { %9500 = vmatprep.subr.bf16.mxu0 %v13986_v12  ;;  %9419 = vmatpush1.bf16.msra.mxu1 %v14056_v26  ;;  %v14017_v12 = vld [vmem:[#allocation8 + $0x8c8] ss:$40 sps:$4 sm:$0xff]   ;;  %v14022_v26 = vld [vmem:[#allocation8 + $0x91c] ss:$40 sps:$4 sm:$0xff]  }
 0x362   :  { %9420 = vmatprep.subr.bf16.mxu1 %v14064_v14  ;;  %v14128_v14 = vld [vmem:[#allocation8 + $0x1810] ss:$40 sps:$4 sm:$0xff]  }
 0x364   :  { %9501 = vmatpush1.bf16.msra.mxu0 %v13984_v16  ;;  %v14136_v16 = vld [vmem:[#allocation8 + $0x1864] ss:$40 sps:$4 sm:$0xff]  }
 0x365   :  { %9502 = vmatprep.subr.bf16.mxu0 %v13989_v17  ;;  %9421 = vmatpush1.bf16.msra.mxu1 %v14062_v18  ;;  %v14020_v17 = vld [vmem:[#allocation8 + $0x918] ss:$40 sps:$4 sm:$0xff]   ;;  %v14025_v18 = vld [vmem:[#allocation8 + $0x96c] ss:$40 sps:$4 sm:$0xff]  }
 0x366   :  { %9422 = vmatprep.subr.bf16.mxu1 %v14070_v20  ;;  %v14134_v20 = vld [vmem:[#allocation8 + $0x1860] ss:$40 sps:$4 sm:$0xff]  }
 0x368   :  { %9503 = vmatpush1.bf16.msra.mxu0 %v13987_v22  ;;  %v14142_v22 = vld [vmem:[#allocation8 + $0x18b4] ss:$40 sps:$4 sm:$0xff]  }
 0x369   :  { %9504 = vmatprep.subr.bf16.mxu0 %v13992_v23  ;;  %9423 = vmatpush1.bf16.msra.mxu1 %v14068_v24  ;;  %v14023_v23 = vld [vmem:[#allocation8 + $0x968] ss:$40 sps:$4 sm:$0xff]   ;;  %v14028_v24 = vld [vmem:[#allocation8 + $0x9bc] ss:$40 sps:$4 sm:$0xff]  }
 0x36a   :  { %9424 = vmatprep.subr.bf16.mxu1 %v14076_v25  ;;  %v14140_v25 = vld [vmem:[#allocation8 + $0x18b0] ss:$40 sps:$4 sm:$0xff]  }
 0x36c   :  { %9505 = vmatpush1.bf16.msra.mxu0 %v13990_v13  ;;  %v14148_v13 = vld [vmem:[#allocation8 + $0x14] ss:$40 sps:$4 sm:$0xff]  }
 0x36d   :  { %9506 = vmatprep.subr.bf16.mxu0 %v13995_v39  ;;  %9425 = vmatpush1.bf16.msra.mxu1 %v14074_v48  ;;  %v14026_v39 = vld [vmem:[#allocation8 + $0x9b8] ss:$40 sps:$4 sm:$0xff]   ;;  %v14031_v48 = vld [vmem:[#allocation8 + $0xa0c] ss:$40 sps:$4 sm:$0xff]  }
 0x36e   :  { %9426 = vmatprep.subr.bf16.mxu1 %v14082_v28  ;;  %v14029_v28 = vld [vmem:[#allocation8 + $0xa08] ss:$40 sps:$4 sm:$0xff]  }
 0x370   :  { %9507 = vmatpush1.bf16.msra.mxu0 %v13993_v45  ;;  %v14034_v45 = vld [vmem:[#allocation8 + $0xa5c] ss:$40 sps:$4 sm:$0xff]  }
 0x371   :  { %9508 = vmatprep.subr.bf16.mxu0 %v13998_v50  ;;  %9427 = vmatpush1.bf16.msra.mxu1 %v14080_v32  ;;  %v14032_v50 = vld [vmem:[#allocation8 + $0xa58] ss:$40 sps:$4 sm:$0xff]   ;;  %v14037_v32 = vld [vmem:[#allocation8 + $0xaac] ss:$40 sps:$4 sm:$0xff]  }
 0x372   :  { %9428 = vmatprep.subr.bf16.mxu1 %v14088_v35  ;;  %v14035_v35 = vld [vmem:[#allocation8 + $0xaa8] ss:$40 sps:$4 sm:$0xff]  }
 0x374   :  { %9509 = vmatpush1.bf16.msra.mxu0 %v13996_v33  ;;  %v14040_v33 = vld [vmem:[#allocation8 + $0xafc] ss:$40 sps:$4 sm:$0xff]  }
 0x375   :  { %9510 = vmatprep.subr.bf16.mxu0 %v14001_v36  ;;  %9429 = vmatpush1.bf16.msra.mxu1 %v14086_v37  ;;  %v14038_v36 = vld [vmem:[#allocation8 + $0xaf8] ss:$40 sps:$4 sm:$0xff]   ;;  %v14043_v37 = vld [vmem:[#allocation8 + $0xb4c] ss:$40 sps:$4 sm:$0xff]  }
 0x376   :  { %9430 = vmatprep.subr.bf16.mxu1 %v14094_v42  ;;  %v14046_v42 = vld [vmem:[#allocation8 + $0xb9c] ss:$40 sps:$4 sm:$0xff]  }
 0x378   :  { %9511 = vmatpush1.bf16.msra.mxu0 %v13999_v5  ;;  %v14041_v5 = vld [vmem:[#allocation8 + $0xb48] ss:$40 sps:$4 sm:$0xff]  }
 0x379   :  { %9512 = vmatprep.subr.bf16.mxu0 %v14004_v44  ;;  %9431 = vmatpush1.bf16.msra.mxu1 %v14092_v47  ;;  %v14044_v44 = vld [vmem:[#allocation8 + $0xb98] ss:$40 sps:$4 sm:$0xff]   ;;  %v14049_v47 = vld [vmem:[#allocation8 + $0xbec] ss:$40 sps:$4 sm:$0xff]  }
 0x37a   :  { %9432 = vmatprep.subr.bf16.mxu1 %v14100_v51  ;;  %v14055_v51 = vld [vmem:[#allocation8 + $0xc3c] ss:$40 sps:$4 sm:$0xff]  }
 0x37c   :  { %9513 = vmatpush1.bf16.msra.mxu0 %v14002_v30  ;;  %v14047_v30 = vld [vmem:[#allocation8 + $0xbe8] ss:$40 sps:$4 sm:$0xff]  }
 0x37d   :  { %9514 = vmatprep.subr.bf16.mxu0 %v14007_v52  ;;  %9433 = vmatpush1.bf16.msra.mxu1 %v14098_v53  ;;  %v14053_v52 = vld [vmem:[#allocation8 + $0xc38] ss:$40 sps:$4 sm:$0xff]   ;;  %v14061_v53 = vld [vmem:[#allocation8 + $0xc8c] ss:$40 sps:$4 sm:$0xff]  }
 0x37e   :  { %9434 = vmatprep.subr.bf16.mxu1 %v14106_v46  ;;  %v14059_v46 = vld [vmem:[#allocation8 + $0xc88] ss:$40 sps:$4 sm:$0xff]  }
 0x380   :  { %9515 = vmatpush1.bf16.msra.mxu0 %v14005_v55  ;;  %v14067_v55 = vld [vmem:[#allocation8 + $0xcdc] ss:$40 sps:$4 sm:$0xff]  }
 0x381   :  { %9516 = vmatprep.subr.bf16.mxu0 %v14010_v56  ;;  %9435 = vmatpush1.bf16.msra.mxu1 %v14104_v57  ;;  %v14065_v56 = vld [vmem:[#allocation8 + $0xcd8] ss:$40 sps:$4 sm:$0xff]   ;;  %v14073_v57 = vld [vmem:[#allocation8 + $0xd2c] ss:$40 sps:$4 sm:$0xff]  }
 0x382   :  { %9436 = vmatprep.subr.bf16.mxu1 %v14112_v58  ;;  %v14071_v58 = vld [vmem:[#allocation8 + $0xd28] ss:$40 sps:$4 sm:$0xff]  }
 0x384   :  { %9517 = vmatpush1.bf16.msra.mxu0 %v14008_v59  ;;  %v14079_v59 = vld [vmem:[#allocation8 + $0xd7c] ss:$40 sps:$4 sm:$0xff]  }
 0x385   :  { %9518 = vmatprep.subr.bf16.mxu0 %v14013_v60  ;;  %9437 = vmatpush1.bf16.msra.mxu1 %v14110_v61  ;;  %v14077_v60 = vld [vmem:[#allocation8 + $0xd78] ss:$40 sps:$4 sm:$0xff]   ;;  %v14085_v61 = vld [vmem:[#allocation8 + $0xdcc] ss:$40 sps:$4 sm:$0xff]  }
 0x386   :  { %9438 = vmatprep.subr.bf16.mxu1 %v14118_v62  ;;  %v14083_v62 = vld [vmem:[#allocation8 + $0xdc8] ss:$40 sps:$4 sm:$0xff]  }
 0x388   :  { %9519 = vmatpush1.bf16.msra.mxu0 %v14011_v63  ;;  %v14091_v63 = vld [vmem:[#allocation8 + $0xe1c] ss:$40 sps:$4 sm:$0xff]  }
 0x389   :  { %9520 = vmatprep.subr.bf16.mxu0 %v14016_v10  ;;  %9439 = vmatpush1.bf16.msra.mxu1 %v14116_v0  ;;  %v14089_v10 = vld [vmem:[#allocation8 + $0xe18] ss:$40 sps:$4 sm:$0xff]   ;;  %v14097_v0 = vld [vmem:[#allocation8 + $0xe6c] ss:$40 sps:$4 sm:$0xff]  }
 0x38a   :  { %9440 = vmatprep.subr.bf16.mxu1 %v14124_v21  ;;  %v14095_v21 = vld [vmem:[#allocation8 + $0xe68] ss:$40 sps:$4 sm:$0xff]  }
 0x38c   :  { %9521 = vmatpush1.bf16.msra.mxu0 %v14014_v1  ;;  %v14103_v1 = vld [vmem:[#allocation8 + $0xebc] ss:$40 sps:$4 sm:$0xff]  }
 0x38d   :  { %9522 = vmatprep.subr.bf16.mxu0 %v14019_v3  ;;  %9441 = vmatpush1.bf16.msra.mxu1 %v14122_v6  ;;  %v14101_v3 = vld [vmem:[#allocation8 + $0xeb8] ss:$40 sps:$4 sm:$0xff]   ;;  %v14109_v6 = vld [vmem:[#allocation8 + $0xf0c] ss:$40 sps:$4 sm:$0xff]  }
 0x38e   :  { %9442 = vmatprep.subr.bf16.mxu1 %v14130_v7  ;;  %v14107_v7 = vld [vmem:[#allocation8 + $0xf08] ss:$40 sps:$4 sm:$0xff]  }
 0x390   :  { %9523 = vmatpush1.bf16.msra.mxu0 %v14017_v12  ;;  %v14115_v12 = vld [vmem:[#allocation8 + $0xf5c] ss:$40 sps:$4 sm:$0xff]  }
 0x391   :  { %9524 = vmatprep.subr.bf16.mxu0 %v14022_v26  ;;  %9443 = vmatpush1.bf16.msra.mxu1 %v14128_v14  ;;  %v14113_v26 = vld [vmem:[#allocation8 + $0xf58] ss:$40 sps:$4 sm:$0xff]   ;;  %v14121_v14 = vld [vmem:[#allocation8 + $0xfac] ss:$40 sps:$4 sm:$0xff]  }
 0x392   :  { %9444 = vmatprep.subr.bf16.mxu1 %v14136_v16  ;;  %v14119_v16 = vld [vmem:[#allocation8 + $0xfa8] ss:$40 sps:$4 sm:$0xff]  }
 0x394   :  { %9525 = vmatpush1.bf16.msra.mxu0 %v14020_v17  ;;  %v14127_v17 = vld [vmem:[#allocation8 + $0xffc] ss:$40 sps:$4 sm:$0xff]  }
 0x395   :  { %9526 = vmatprep.subr.bf16.mxu0 %v14025_v18  ;;  %9445 = vmatpush1.bf16.msra.mxu1 %v14134_v20  ;;  %v14125_v18 = vld [vmem:[#allocation8 + $0xff8] ss:$40 sps:$4 sm:$0xff]   ;;  %v14133_v20 = vld [vmem:[#allocation8 + $0x104c] ss:$40 sps:$4 sm:$0xff]  }
 0x396   :  { %9446 = vmatprep.subr.bf16.mxu1 %v14142_v22  ;;  %v14131_v22 = vld [vmem:[#allocation8 + $0x1048] ss:$40 sps:$4 sm:$0xff]  }
 0x398   :  { %9527 = vmatpush1.bf16.msra.mxu0 %v14023_v23  ;;  %v680_v23 = vld [vmem:[#allocation7 + $0x8] sm:$0x3] }
 0x399   :  { %9528 = vmatprep.subr.bf16.mxu0 %v14028_v24  ;;  %9447 = vmatpush1.bf16.msra.mxu1 %v14140_v25  ;;  %v14139_v24 = vld [vmem:[#allocation8 + $0x109c] ss:$40 sps:$4 sm:$0xff]   ;;  %v718_v25 = vrot.slane %v680_v23, %v15420_v2 }
 0x39a   :  { %9662 = vmatprep.subr.bf16.mxu1 %v14148_v13  ;;  %v722_v13 = vrot.slane %v680_v23, %v15405_v40  ;;  %v14191_v23 = vld [vmem:[#allocation8 + $0x1368] ss:$40 sps:$4 sm:$0xff]  }
 0x39c   :  { %9529 = vmatpush1.bf16.msra.mxu0 %v14026_v39  ;;  %v14137_v39 = vld [vmem:[#allocation8 + $0x1098] ss:$40 sps:$4 sm:$0xff]  }
 0x39d   :  { %9539 = vmatprep.subr.bf16.mxu0 %v14031_v48  ;;  %v14145_v48 = vld [vmem:[#allocation8 + $0x10ec] ss:$40 sps:$4 sm:$0xff]  }
 0x39f   :  { %9531 = vmatmul.mubr.bf16.vlgmr.msra.gmra.mrb[12].mxu0 %v15445_v54 }
 0x3a0   :  { %9540 = vmatpush1.bf16.msra.mxu0 %v14029_v28  ;;  %9571 = vmatprep.mubr.bf16.mxu0 %v15466_v41 }
 0x3a1   :  { %9541 = vmatprep.subr.bf16.mxu0 %v14034_v45 }
 0x3a4   :  { %9542 = vmatpush1.bf16.msra.mxu0 %v14032_v50 }
 0x3a5   :  { %9543 = vmatprep.subr.bf16.mxu0 %v14037_v32 }
 0x3a8   :  { %9544 = vmatpush1.bf16.msra.mxu0 %v14035_v35 }
 0x3a9   :  { %9545 = vmatprep.subr.bf16.mxu0 %v14040_v33  ;;  %v14143_v33 = vld [vmem:[#allocation8 + $0x10e8] ss:$40 sps:$4 sm:$0xff]  }
 0x3ac   :  { %9546 = vmatpush1.bf16.msra.mxu0 %v14038_v36 }
 0x3ad   :  { %9547 = vmatprep.subr.bf16.mxu0 %v14043_v37 }
 0x3b0   :  { %9548 = vmatpush1.bf16.msra.mxu0 %v14041_v5  ;;  %v14151_v5 = vld [vmem:[#allocation8 + $0x113c] ss:$40 sps:$4 sm:$0xff]  }
 0x3b1   :  { %9549 = vmatprep.subr.bf16.mxu0 %v14046_v42 }
 0x3b4   :  { %9550 = vmatpush1.bf16.msra.mxu0 %v14044_v44 }
 0x3b5   :  { %9551 = vmatprep.subr.bf16.mxu0 %v14049_v47  ;;  %v14146_v47 = vld [vmem:[#allocation8 + $0x10] ss:$40 sps:$4 sm:$0xff]  }
 0x3b8   :  { %9552 = vmatpush1.bf16.msra.mxu0 %v14047_v30  ;;  %v14149_v30 = vld [vmem:[#allocation8 + $0x1138] ss:$40 sps:$4 sm:$0xff]  }
 0x3b9   :  { %9553 = vmatprep.subr.bf16.mxu0 %v14055_v51 }
 0x3bc   :  { %9554 = vmatpush1.bf16.msra.mxu0 %v14053_v52  ;;  %v14154_v52 = vld [vmem:[#allocation8 + $0x64] ss:$40 sps:$4 sm:$0xff]  }
 0x3bd   :  { %9555 = vmatprep.subr.bf16.mxu0 %v14061_v53  ;;  %v14157_v53 = vld [vmem:[#allocation8 + $0x118c] ss:$40 sps:$4 sm:$0xff]  }
 0x3c0   :  { %9556 = vmatpush1.bf16.msra.mxu0 %v14059_v46  ;;  %v14152_v46 = vld [vmem:[#allocation8 + $0x60] ss:$40 sps:$4 sm:$0xff]  }
 0x3c1   :  { %9557 = vmatprep.subr.bf16.mxu0 %v14067_v55  ;;  %v14155_v55 = vld [vmem:[#allocation8 + $0x1188] ss:$40 sps:$4 sm:$0xff]  }
 0x3c4   :  { %9558 = vmatpush1.bf16.msra.mxu0 %v14065_v56  ;;  %v14160_v56 = vld [vmem:[#allocation8 + $0xb4] ss:$40 sps:$4 sm:$0xff]  }
 0x3c5   :  { %9559 = vmatprep.subr.bf16.mxu0 %v14073_v57  ;;  %v14163_v57 = vld [vmem:[#allocation8 + $0x11dc] ss:$40 sps:$4 sm:$0xff]  }
 0x3c8   :  { %9560 = vmatpush1.bf16.msra.mxu0 %v14071_v58  ;;  %v14158_v58 = vld [vmem:[#allocation8 + $0xb0] ss:$40 sps:$4 sm:$0xff]  }
 0x3c9   :  { %9561 = vmatprep.subr.bf16.mxu0 %v14079_v59  ;;  %v14161_v59 = vld [vmem:[#allocation8 + $0x11d8] ss:$40 sps:$4 sm:$0xff]  }
 0x3cc   :  { %9562 = vmatpush1.bf16.msra.mxu0 %v14077_v60  ;;  %v14166_v60 = vld [vmem:[#allocation8 + $0x104] ss:$40 sps:$4 sm:$0xff]  }
 0x3cd   :  { %9563 = vmatprep.subr.bf16.mxu0 %v14085_v61  ;;  %v14169_v61 = vld [vmem:[#allocation8 + $0x122c] ss:$40 sps:$4 sm:$0xff]  }
 0x3d0   :  { %9564 = vmatpush1.bf16.msra.mxu0 %v14083_v62  ;;  %v14164_v62 = vld [vmem:[#allocation8 + $0x100] ss:$40 sps:$4 sm:$0xff]  }
 0x3d1   :  { %9565 = vmatprep.subr.bf16.mxu0 %v14091_v63  ;;  %v14167_v63 = vld [vmem:[#allocation8 + $0x1228] ss:$40 sps:$4 sm:$0xff]  }
 0x3d4   :  { %9566 = vmatpush1.bf16.msra.mxu0 %v14089_v10  ;;  %v14172_v10 = vld [vmem:[#allocation8 + $0x154] ss:$40 sps:$4 sm:$0xff]  }
 0x3d5   :  { %9567 = vmatprep.subr.bf16.mxu0 %v14097_v0  ;;  %v14175_v0 = vld [vmem:[#allocation8 + $0x127c] ss:$40 sps:$4 sm:$0xff]  }
 0x3d8   :  { %9568 = vmatpush1.bf16.msra.mxu0 %v14095_v21  ;;  %v14170_v21 = vld [vmem:[#allocation8 + $0x150] ss:$40 sps:$4 sm:$0xff]  }
 0x3d9   :  { %9569 = vmatprep.subr.bf16.mxu0 %v14103_v1  ;;  %v14173_v1 = vld [vmem:[#allocation8 + $0x1278] ss:$40 sps:$4 sm:$0xff]  }
 0x3dc   :  { %9570 = vmatpush1.bf16.msra.mxu0 %v14101_v3  ;;  %v14178_v3 = vld [vmem:[#allocation8 + $0x1a4] ss:$40 sps:$4 sm:$0xff]  }
 0x3dd   :  { %9580 = vmatprep.subr.bf16.mxu0 %v14109_v6  ;;  %v14181_v6 = vld [vmem:[#allocation8 + $0x12cc] ss:$40 sps:$4 sm:$0xff]  }
 0x3df   :  { %9572 = vmatmul.mubr.bf16.vlgmr.msra.gmra.mrb[12].mxu0 %v15468_v43 }
 0x3e0   :  { %9581 = vmatpush1.bf16.msra.mxu0 %v14107_v7  ;;  %9612 = vmatprep.mubr.bf16.mxu0 %v15471_v49  ;;  %v14176_v7 = vld [vmem:[#allocation8 + $0x1a0] ss:$40 sps:$4 sm:$0xff]  }
 0x3e1   :  { %9582 = vmatprep.subr.bf16.mxu0 %v14115_v12  ;;  %v14179_v12 = vld [vmem:[#allocation8 + $0x12c8] ss:$40 sps:$4 sm:$0xff]  }
 0x3e4   :  { %9583 = vmatpush1.bf16.msra.mxu0 %v14113_v26  ;;  %v14184_v26 = vld [vmem:[#allocation8 + $0x1f4] ss:$40 sps:$4 sm:$0xff]  }
 0x3e5   :  { %9584 = vmatprep.subr.bf16.mxu0 %v14121_v14  ;;  %v14187_v14 = vld [vmem:[#allocation8 + $0x131c] ss:$40 sps:$4 sm:$0xff]  }
 0x3e8   :  { %9585 = vmatpush1.bf16.msra.mxu0 %v14119_v16  ;;  %v14182_v16 = vld [vmem:[#allocation8 + $0x1f0] ss:$40 sps:$4 sm:$0xff]  }
 0x3e9   :  { %9586 = vmatprep.subr.bf16.mxu0 %v14127_v17  ;;  %v14185_v17 = vld [vmem:[#allocation8 + $0x1318] ss:$40 sps:$4 sm:$0xff]  }
 0x3ec   :  { %9587 = vmatpush1.bf16.msra.mxu0 %v14125_v18  ;;  %v14190_v18 = vld [vmem:[#allocation8 + $0x244] ss:$40 sps:$4 sm:$0xff]  }
 0x3ed   :  { %9588 = vmatprep.subr.bf16.mxu0 %v14133_v20  ;;  %v14193_v20 = vld [vmem:[#allocation8 + $0x136c] ss:$40 sps:$4 sm:$0xff]  }
 0x3f0   :  { %9589 = vmatpush1.bf16.msra.mxu0 %v14131_v22  ;;  %v14188_v22 = vld [vmem:[#allocation8 + $0x240] ss:$40 sps:$4 sm:$0xff]  }
 0x3f1   :  { %9590 = vmatprep.subr.bf16.mxu0 %v14139_v24  ;;  %v14196_v24 = vld [vmem:[#allocation8 + $0x294] ss:$40 sps:$4 sm:$0xff]  }
 0x3f2   :  { %v4371_v28 = vpop.f32.mrb[8].mxu0 }
 0x3f3   :  { %v12729_v45 = vadd.f32 %v4371_v28, %v718_v25  ;;  %v4373_v50 = vpop.f32.mrb[9].mxu0  ;;  %v14199_v25 = vld [vmem:[#allocation8 + $0x13bc] ss:$40 sps:$4 sm:$0xff]   ;;  %v14205_v28 = vld [vmem:[#allocation8 + $0x140c] ss:$40 sps:$4 sm:$0xff]  }
 0x3f4   :  { %v12730_v32 = vadd.f32 %v4373_v50, %v722_v13  ;;  %v4375_v35 = vpop.f32.mrb[10].mxu0  ;;  %9591 = vmatpush1.bf16.msra.mxu0 %v14137_v39  ;;  %v14194_v13 = vld [vmem:[#allocation8 + $0x290] ss:$40 sps:$4 sm:$0xff]  }
 0x3f5   :  { %v4386_v36 = vmax.f32 %v12729_v45, 0.0  ;;  %v4376_v37 = vpop.f32.mrb[11].mxu0  ;;  %9592 = vmatprep.subr.bf16.mxu0 %v14145_v48  ;;  %v14197_v39 = vld [vmem:[#allocation8 + $0x13b8] ss:$40 sps:$4 sm:$0xff]   ;;  %v14202_v48 = vld [vmem:[#allocation8 + $0x2e4] ss:$40 sps:$4 sm:$0xff]  }
 0x3f6   :  { %v4387_v42 = vmax.f32 %v12730_v32, 0.0  ;;  %v14200_v45 = vld [vmem:[#allocation8 + $0x2e0] ss:$40 sps:$4 sm:$0xff]   ;;  %v14208_v32 = vld [vmem:[#allocation8 + $0x334] ss:$40 sps:$4 sm:$0xff]  }
 0x3f7   :  { %v15493_v51 = vpack.c.bf16 %v4386_v36, %v4386_v36  ;;  %v14203_v50 = vld [vmem:[#allocation8 + $0x1408] ss:$40 sps:$4 sm:$0xff]   ;;  %v14211_v35 = vld [vmem:[#allocation8 + $0x145c] ss:$40 sps:$4 sm:$0xff]   ;;  %v14209_v36 = vld [vmem:[#allocation8 + $0x1458] ss:$40 sps:$4 sm:$0xff]  }
 0x3f8   :  { %v15491_v44 = vpack.c.bf16 %v4387_v42, %v4387_v42  ;;  %9593 = vmatpush1.bf16.msra.mxu0 %v14143_v33  ;;  %v14206_v33 = vld [vmem:[#allocation8 + $0x330] ss:$40 sps:$4 sm:$0xff]   ;;  %v14214_v37 = vld [vmem:[#allocation8 + $0x384] ss:$40 sps:$4 sm:$0xff]   ;;  %v14212_v42 = vld [vmem:[#allocation8 + $0x380] ss:$40 sps:$4 sm:$0xff]  }
 0x3f9   :  { %9594 = vmatprep.subr.bf16.mxu0 %v14151_v5  ;;  %v14217_v5 = vld [vmem:[#allocation8 + $0x14ac] ss:$40 sps:$4 sm:$0xff]  }
 0x3fa   :  { %9448 = vmatprep.mubr.bf16.mxu1 %v15491_v44 }
 0x3fb   :  { %9449 = vmatmul.mubr.bf16.vlgmr.msra.gmra.mrb[8].mxu1 %v15493_v51 }
 0x3fc   :  { %9663 = vmatpush1.bf16.msra.mxu1 %v14146_v47  ;;  %9595 = vmatpush1.bf16.msra.mxu0 %v14149_v30  ;;  %v14215_v47 = vld [vmem:[#allocation8 + $0x14a8] ss:$40 sps:$4 sm:$0xff]   ;;  %v14220_v30 = vld [vmem:[#allocation8 + $0x3d4] ss:$40 sps:$4 sm:$0xff]  }
 0x3fd   :  { %9694 = vmatprep.mubr.bf16.mxu1 %v15415_v8  ;;  %9664 = vmatprep.subr.bf16.mxu1 %v14154_v52  ;;  %v14223_v52 = vld [vmem:[#allocation8 + $0x14fc] ss:$40 sps:$4 sm:$0xff]  }
 0x3fe   :  { %9596 = vmatprep.subr.bf16.mxu0 %v14157_v53  ;;  %v14218_v53 = vld [vmem:[#allocation8 + $0x3d0] ss:$40 sps:$4 sm:$0xff]  }
 0x400   :  { %9665 = vmatpush1.bf16.msra.mxu1 %v14152_v46  ;;  %9597 = vmatpush1.bf16.msra.mxu0 %v14155_v55  ;;  %v14221_v46 = vld [vmem:[#allocation8 + $0x14f8] ss:$40 sps:$4 sm:$0xff]   ;;  %v14226_v55 = vld [vmem:[#allocation8 + $0x424] ss:$40 sps:$4 sm:$0xff]  }
 0x401   :  { %9666 = vmatprep.subr.bf16.mxu1 %v14160_v56  ;;  %9598 = vmatprep.subr.bf16.mxu0 %v14163_v57  ;;  %v14229_v56 = vld [vmem:[#allocation8 + $0x154c] ss:$40 sps:$4 sm:$0xff]   ;;  %v14224_v57 = vld [vmem:[#allocation8 + $0x420] ss:$40 sps:$4 sm:$0xff]  }
 0x404   :  { %9667 = vmatpush1.bf16.msra.mxu1 %v14158_v58  ;;  %9599 = vmatpush1.bf16.msra.mxu0 %v14161_v59  ;;  %v14227_v58 = vld [vmem:[#allocation8 + $0x1548] ss:$40 sps:$4 sm:$0xff]   ;;  %v14232_v59 = vld [vmem:[#allocation8 + $0x474] ss:$40 sps:$4 sm:$0xff]  }
 0x405   :  { %9668 = vmatprep.subr.bf16.mxu1 %v14166_v60  ;;  %9600 = vmatprep.subr.bf16.mxu0 %v14169_v61  ;;  %v14235_v60 = vld [vmem:[#allocation8 + $0x159c] ss:$40 sps:$4 sm:$0xff]   ;;  %v14230_v61 = vld [vmem:[#allocation8 + $0x470] ss:$40 sps:$4 sm:$0xff]  }
 0x408   :  { %9669 = vmatpush1.bf16.msra.mxu1 %v14164_v62  ;;  %9601 = vmatpush1.bf16.msra.mxu0 %v14167_v63  ;;  %v14233_v62 = vld [vmem:[#allocation8 + $0x1598] ss:$40 sps:$4 sm:$0xff]   ;;  %v14238_v63 = vld [vmem:[#allocation8 + $0x4c4] ss:$40 sps:$4 sm:$0xff]  }
 0x409   :  { %9670 = vmatprep.subr.bf16.mxu1 %v14172_v10  ;;  %9602 = vmatprep.subr.bf16.mxu0 %v14175_v0  ;;  %v14241_v10 = vld [vmem:[#allocation8 + $0x15ec] ss:$40 sps:$4 sm:$0xff]   ;;  %v14236_v0 = vld [vmem:[#allocation8 + $0x4c0] ss:$40 sps:$4 sm:$0xff]  }
 0x40c   :  { %9671 = vmatpush1.bf16.msra.mxu1 %v14170_v21  ;;  %9603 = vmatpush1.bf16.msra.mxu0 %v14173_v1  ;;  %v14239_v21 = vld [vmem:[#allocation8 + $0x15e8] ss:$40 sps:$4 sm:$0xff]   ;;  %v14244_v1 = vld [vmem:[#allocation8 + $0x514] ss:$40 sps:$4 sm:$0xff]  }
 0x40d   :  { %9672 = vmatprep.subr.bf16.mxu1 %v14178_v3  ;;  %9604 = vmatprep.subr.bf16.mxu0 %v14181_v6  ;;  %v14247_v3 = vld [vmem:[#allocation8 + $0x163c] ss:$40 sps:$4 sm:$0xff]   ;;  %v14242_v6 = vld [vmem:[#allocation8 + $0x510] ss:$40 sps:$4 sm:$0xff]  }
 0x410   :  { %9673 = vmatpush1.bf16.msra.mxu1 %v14176_v7  ;;  %9605 = vmatpush1.bf16.msra.mxu0 %v14179_v12  ;;  %v14245_v7 = vld [vmem:[#allocation8 + $0x1638] ss:$40 sps:$4 sm:$0xff]   ;;  %v14250_v12 = vld [vmem:[#allocation8 + $0x564] ss:$40 sps:$4 sm:$0xff]  }
 0x411   :  { %9674 = vmatprep.subr.bf16.mxu1 %v14184_v26  ;;  %9606 = vmatprep.subr.bf16.mxu0 %v14187_v14  ;;  %v14253_v26 = vld [vmem:[#allocation8 + $0x168c] ss:$40 sps:$4 sm:$0xff]   ;;  %v14248_v14 = vld [vmem:[#allocation8 + $0x560] ss:$40 sps:$4 sm:$0xff]  }
 0x414   :  { %9675 = vmatpush1.bf16.msra.mxu1 %v14182_v16  ;;  %9607 = vmatpush1.bf16.msra.mxu0 %v14185_v17  ;;  %v14251_v16 = vld [vmem:[#allocation8 + $0x1688] ss:$40 sps:$4 sm:$0xff]   ;;  %v14256_v17 = vld [vmem:[#allocation8 + $0x5b4] ss:$40 sps:$4 sm:$0xff]  }
 0x415   :  { %9676 = vmatprep.subr.bf16.mxu1 %v14190_v18  ;;  %9608 = vmatprep.subr.bf16.mxu0 %v14193_v20  ;;  %v14259_v18 = vld [vmem:[#allocation8 + $0x16dc] ss:$40 sps:$4 sm:$0xff]   ;;  %v14254_v20 = vld [vmem:[#allocation8 + $0x5b0] ss:$40 sps:$4 sm:$0xff]  }
 0x418   :  { %9677 = vmatpush1.bf16.msra.mxu1 %v14188_v22  ;;  %9609 = vmatpush1.bf16.msra.mxu0 %v14191_v23  ;;  %v14257_v22 = vld [vmem:[#allocation8 + $0x16d8] ss:$40 sps:$4 sm:$0xff]   ;;  %v14262_v23 = vld [vmem:[#allocation8 + $0x604] ss:$40 sps:$4 sm:$0xff]  }
 0x419   :  { %9678 = vmatprep.subr.bf16.mxu1 %v14196_v24  ;;  %9610 = vmatprep.subr.bf16.mxu0 %v14199_v25  ;;  %v14265_v24 = vld [vmem:[#allocation8 + $0x172c] ss:$40 sps:$4 sm:$0xff]   ;;  %v14260_v25 = vld [vmem:[#allocation8 + $0x600] ss:$40 sps:$4 sm:$0xff]  }
 0x41c   :  { %9679 = vmatpush1.bf16.msra.mxu1 %v14194_v13  ;;  %9611 = vmatpush1.bf16.msra.mxu0 %v14197_v39  ;;  %v14263_v13 = vld [vmem:[#allocation8 + $0x1728] ss:$40 sps:$4 sm:$0xff]   ;;  %v14268_v39 = vld [vmem:[#allocation8 + $0x654] ss:$40 sps:$4 sm:$0xff]  }
 0x41d   :  { %9680 = vmatprep.subr.bf16.mxu1 %v14202_v48  ;;  %9621 = vmatprep.subr.bf16.mxu0 %v14205_v28  ;;  %v14271_v48 = vld [vmem:[#allocation8 + $0x177c] ss:$40 sps:$4 sm:$0xff]   ;;  %v14266_v28 = vld [vmem:[#allocation8 + $0x650] ss:$40 sps:$4 sm:$0xff]  }
 0x41f   :  { %9613 = vmatmul.mubr.bf16.vlgmr.msra.gmra.mrb[12].mxu0 %v15480_v15 }
 0x420   :  { %9681 = vmatpush1.bf16.msra.mxu1 %v14200_v45  ;;  %9622 = vmatpush1.bf16.msra.mxu0 %v14203_v50  ;;  %v14269_v45 = vld [vmem:[#allocation8 + $0x1778] ss:$40 sps:$4 sm:$0xff]   ;;  %v14274_v50 = vld [vmem:[#allocation8 + $0x6a4] ss:$40 sps:$4 sm:$0xff]  }
 0x421   :  { %9653 = vmatprep.mubr.bf16.mxu0 %v15491_v44  ;;  %9682 = vmatprep.subr.bf16.mxu1 %v14208_v32  ;;  %v14277_v32 = vld [vmem:[#allocation8 + $0x17cc] ss:$40 sps:$4 sm:$0xff]  }
 0x422   :  { %9623 = vmatprep.subr.bf16.mxu0 %v14211_v35  ;;  %v14272_v35 = vld [vmem:[#allocation8 + $0x6a0] ss:$40 sps:$4 sm:$0xff]  }
 0x424   :  { %9683 = vmatpush1.bf16.msra.mxu1 %v14206_v33  ;;  %9624 = vmatpush1.bf16.msra.mxu0 %v14209_v36  ;;  %v14275_v33 = vld [vmem:[#allocation8 + $0x17c8] ss:$40 sps:$4 sm:$0xff]   ;;  %v14280_v36 = vld [vmem:[#allocation8 + $0x6f4] ss:$40 sps:$4 sm:$0xff]  }
 0x425   :  { %9684 = vmatprep.subr.bf16.mxu1 %v14214_v37  ;;  %9625 = vmatprep.subr.bf16.mxu0 %v14217_v5  ;;  %v14283_v37 = vld [vmem:[#allocation8 + $0x181c] ss:$40 sps:$4 sm:$0xff]   ;;  %v14278_v5 = vld [vmem:[#allocation8 + $0x6f0] ss:$40 sps:$4 sm:$0xff]  }
 0x428   :  { %9685 = vmatpush1.bf16.msra.mxu1 %v14212_v42  ;;  %9626 = vmatpush1.bf16.msra.mxu0 %v14215_v47  ;;  %v14281_v42 = vld [vmem:[#allocation8 + $0x1818] ss:$40 sps:$4 sm:$0xff]   ;;  %v14286_v47 = vld [vmem:[#allocation8 + $0x744] ss:$40 sps:$4 sm:$0xff]  }
 0x429   :  { %9686 = vmatprep.subr.bf16.mxu1 %v14220_v30  ;;  %9627 = vmatprep.subr.bf16.mxu0 %v14223_v52  ;;  %v14289_v30 = vld [vmem:[#allocation8 + $0x186c] ss:$40 sps:$4 sm:$0xff]   ;;  %v14284_v52 = vld [vmem:[#allocation8 + $0x740] ss:$40 sps:$4 sm:$0xff]  }
 0x42c   :  { %9687 = vmatpush1.bf16.msra.mxu1 %v14218_v53  ;;  %9628 = vmatpush1.bf16.msra.mxu0 %v14221_v46  ;;  %v14287_v53 = vld [vmem:[#allocation8 + $0x1868] ss:$40 sps:$4 sm:$0xff]   ;;  %v14292_v46 = vld [vmem:[#allocation8 + $0x794] ss:$40 sps:$4 sm:$0xff]  }
 0x42d   :  { %9688 = vmatprep.subr.bf16.mxu1 %v14226_v55  ;;  %9629 = vmatprep.subr.bf16.mxu0 %v14229_v56  ;;  %v14295_v55 = vld [vmem:[#allocation8 + $0x18bc] ss:$40 sps:$4 sm:$0xff]   ;;  %v14290_v56 = vld [vmem:[#allocation8 + $0x790] ss:$40 sps:$4 sm:$0xff]  }
 0x430   :  { %9689 = vmatpush1.bf16.msra.mxu1 %v14224_v57  ;;  %9630 = vmatpush1.bf16.msra.mxu0 %v14227_v58  ;;  %v14293_v57 = vld [vmem:[#allocation8 + $0x18b8] ss:$40 sps:$4 sm:$0xff]   ;;  %v14298_v58 = vld [vmem:[#allocation8 + $0x7e4] ss:$40 sps:$4 sm:$0xff]  }
 0x431   :  { %9690 = vmatprep.subr.bf16.mxu1 %v14232_v59  ;;  %9631 = vmatprep.subr.bf16.mxu0 %v14235_v60  ;;  %v14301_v59 = vld [vmem:[#allocation8 + $0x1c] ss:$40 sps:$4 sm:$0xff]   ;;  %v14296_v60 = vld [vmem:[#allocation8 + $0x7e0] ss:$40 sps:$4 sm:$0xff]  }
 0x434   :  { %9691 = vmatpush1.bf16.msra.mxu1 %v14230_v61  ;;  %9632 = vmatpush1.bf16.msra.mxu0 %v14233_v62  ;;  %v14299_v61 = vld [vmem:[#allocation8 + $0x18] ss:$40 sps:$4 sm:$0xff]   ;;  %v14304_v62 = vld [vmem:[#allocation8 + $0x834] ss:$40 sps:$4 sm:$0xff]  }
 0x435   :  { %9692 = vmatprep.subr.bf16.mxu1 %v14238_v63  ;;  %9633 = vmatprep.subr.bf16.mxu0 %v14241_v10  ;;  %v14307_v63 = vld [vmem:[#allocation8 + $0x6c] ss:$40 sps:$4 sm:$0xff]   ;;  %v14302_v10 = vld [vmem:[#allocation8 + $0x830] ss:$40 sps:$4 sm:$0xff]  }
 0x438   :  { %9693 = vmatpush1.bf16.msra.mxu1 %v14236_v0  ;;  %9634 = vmatpush1.bf16.msra.mxu0 %v14239_v21  ;;  %v14305_v0 = vld [vmem:[#allocation8 + $0x68] ss:$40 sps:$4 sm:$0xff]   ;;  %v14310_v21 = vld [vmem:[#allocation8 + $0x884] ss:$40 sps:$4 sm:$0xff]  }
 0x439   :  { %9703 = vmatprep.subr.bf16.mxu1 %v14244_v1  ;;  %9635 = vmatprep.subr.bf16.mxu0 %v14247_v3  ;;  %v14313_v1 = vld [vmem:[#allocation8 + $0xbc] ss:$40 sps:$4 sm:$0xff]   ;;  %v14308_v3 = vld [vmem:[#allocation8 + $0x880] ss:$40 sps:$4 sm:$0xff]  }
 0x43b   :  { %9695 = vmatmul.mubr.bf16.vlgmr.msra.gmra.mrb[12].mxu1 %v15430_v29 }
 0x43c   :  { %9704 = vmatpush1.bf16.msra.mxu1 %v14242_v6  ;;  %9735 = vmatprep.mubr.bf16.mxu1 %v15432_v31  ;;  %v14311_v6 = vld [vmem:[#allocation8 + $0xb8] ss:$40 sps:$4 sm:$0xff]  }
 0x43d   :  { %9636 = vmatpush1.bf16.msra.mxu0 %v14245_v7  ;;  %9705 = vmatprep.subr.bf16.mxu1 %v14250_v12  ;;  %v14316_v7 = vld [vmem:[#allocation8 + $0x8d4] ss:$40 sps:$4 sm:$0xff]  }
 0x43e   :  { %9637 = vmatprep.subr.bf16.mxu0 %v14253_v26  ;;  %v14319_v12 = vld [vmem:[#allocation8 + $0x10c] ss:$40 sps:$4 sm:$0xff]   ;;  %v14314_v26 = vld [vmem:[#allocation8 + $0x8d0] ss:$40 sps:$4 sm:$0xff]  }
 0x440   :  { %9706 = vmatpush1.bf16.msra.mxu1 %v14248_v14  ;;  %v14317_v14 = vld [vmem:[#allocation8 + $0x108] ss:$40 sps:$4 sm:$0xff]  }
 0x441   :  { %9638 = vmatpush1.bf16.msra.mxu0 %v14251_v16  ;;  %9707 = vmatprep.subr.bf16.mxu1 %v14256_v17  ;;  %v14322_v16 = vld [vmem:[#allocation8 + $0x924] ss:$40 sps:$4 sm:$0xff]  }
 0x442   :  { %9639 = vmatprep.subr.bf16.mxu0 %v14259_v18  ;;  %v14325_v17 = vld [vmem:[#allocation8 + $0x15c] ss:$40 sps:$4 sm:$0xff]   ;;  %v14320_v18 = vld [vmem:[#allocation8 + $0x920] ss:$40 sps:$4 sm:$0xff]  }
 0x444   :  { %9708 = vmatpush1.bf16.msra.mxu1 %v14254_v20  ;;  %v14323_v20 = vld [vmem:[#allocation8 + $0x158] ss:$40 sps:$4 sm:$0xff]  }
 0x445   :  { %9640 = vmatpush1.bf16.msra.mxu0 %v14257_v22  ;;  %9709 = vmatprep.subr.bf16.mxu1 %v14262_v23  ;;  %v14328_v22 = vld [vmem:[#allocation8 + $0x974] ss:$40 sps:$4 sm:$0xff]  }
 0x446   :  { %9641 = vmatprep.subr.bf16.mxu0 %v14265_v24  ;;  %v14331_v23 = vld [vmem:[#allocation8 + $0x1ac] ss:$40 sps:$4 sm:$0xff]   ;;  %v14326_v24 = vld [vmem:[#allocation8 + $0x970] ss:$40 sps:$4 sm:$0xff]  }
 0x448   :  { %9710 = vmatpush1.bf16.msra.mxu1 %v14260_v25  ;;  %v14329_v25 = vld [vmem:[#allocation8 + $0x1a8] ss:$40 sps:$4 sm:$0xff]  }
 0x449   :  { %9642 = vmatpush1.bf16.msra.mxu0 %v14263_v13  ;;  %9711 = vmatprep.subr.bf16.mxu1 %v14268_v39  ;;  %v14334_v13 = vld [vmem:[#allocation8 + $0x9c4] ss:$40 sps:$4 sm:$0xff]  }
 0x44a   :  { %9643 = vmatprep.subr.bf16.mxu0 %v14271_v48  ;;  %v14337_v39 = vld [vmem:[#allocation8 + $0x1fc] ss:$40 sps:$4 sm:$0xff]   ;;  %v14332_v48 = vld [vmem:[#allocation8 + $0x9c0] ss:$40 sps:$4 sm:$0xff]  }
 0x44c   :  { %9712 = vmatpush1.bf16.msra.mxu1 %v14266_v28  ;;  %v14335_v28 = vld [vmem:[#allocation8 + $0x1f8] ss:$40 sps:$4 sm:$0xff]  }
 0x44d   :  { %9644 = vmatpush1.bf16.msra.mxu0 %v14269_v45  ;;  %9713 = vmatprep.subr.bf16.mxu1 %v14274_v50  ;;  %v14340_v45 = vld [vmem:[#allocation8 + $0xa14] ss:$40 sps:$4 sm:$0xff]  }
 0x44e   :  { %9645 = vmatprep.subr.bf16.mxu0 %v14277_v32  ;;  %v14343_v50 = vld [vmem:[#allocation8 + $0x24c] ss:$40 sps:$4 sm:$0xff]   ;;  %v14338_v32 = vld [vmem:[#allocation8 + $0xa10] ss:$40 sps:$4 sm:$0xff]  }
 0x450   :  { %9714 = vmatpush1.bf16.msra.mxu1 %v14272_v35  ;;  %v14341_v35 = vld [vmem:[#allocation8 + $0x248] ss:$40 sps:$4 sm:$0xff]  }
 0x451   :  { %9646 = vmatpush1.bf16.msra.mxu0 %v14275_v33  ;;  %9715 = vmatprep.subr.bf16.mxu1 %v14280_v36  ;;  %v14346_v33 = vld [vmem:[#allocation8 + $0xa64] ss:$40 sps:$4 sm:$0xff]  }
 0x452   :  { %9647 = vmatprep.subr.bf16.mxu0 %v14283_v37  ;;  %v14349_v36 = vld [vmem:[#allocation8 + $0x29c] ss:$40 sps:$4 sm:$0xff]   ;;  %v14344_v37 = vld [vmem:[#allocation8 + $0xa60] ss:$40 sps:$4 sm:$0xff]  }
 0x454   :  { %9716 = vmatpush1.bf16.msra.mxu1 %v14278_v5  ;;  %v14347_v5 = vld [vmem:[#allocation8 + $0x298] ss:$40 sps:$4 sm:$0xff]  }
 0x455   :  { %9648 = vmatpush1.bf16.msra.mxu0 %v14281_v42  ;;  %9717 = vmatprep.subr.bf16.mxu1 %v14286_v47  ;;  %v14352_v42 = vld [vmem:[#allocation8 + $0xab4] ss:$40 sps:$4 sm:$0xff]  }
 0x456   :  { %9649 = vmatprep.subr.bf16.mxu0 %v14289_v30  ;;  %v14355_v47 = vld [vmem:[#allocation8 + $0x2ec] ss:$40 sps:$4 sm:$0xff]   ;;  %v14350_v30 = vld [vmem:[#allocation8 + $0xab0] ss:$40 sps:$4 sm:$0xff]  }
 0x458   :  { %9718 = vmatpush1.bf16.msra.mxu1 %v14284_v52  ;;  %v14353_v52 = vld [vmem:[#allocation8 + $0x2e8] ss:$40 sps:$4 sm:$0xff]  }
 0x459   :  { %9650 = vmatpush1.bf16.msra.mxu0 %v14287_v53  ;;  %9719 = vmatprep.subr.bf16.mxu1 %v14292_v46  ;;  %v14358_v53 = vld [vmem:[#allocation8 + $0xb04] ss:$40 sps:$4 sm:$0xff]  }
 0x45a   :  { %9651 = vmatprep.subr.bf16.mxu0 %v14295_v55  ;;  %v14361_v46 = vld [vmem:[#allocation8 + $0x33c] ss:$40 sps:$4 sm:$0xff]   ;;  %v14356_v55 = vld [vmem:[#allocation8 + $0xb00] ss:$40 sps:$4 sm:$0xff]  }
 0x45c   :  { %9720 = vmatpush1.bf16.msra.mxu1 %v14290_v56  ;;  %v14359_v56 = vld [vmem:[#allocation8 + $0x338] ss:$40 sps:$4 sm:$0xff]  }
 0x45d   :  { %9652 = vmatpush1.bf16.msra.mxu0 %v14293_v57  ;;  %9721 = vmatprep.subr.bf16.mxu1 %v14298_v58  ;;  %v14364_v57 = vld [vmem:[#allocation8 + $0xb54] ss:$40 sps:$4 sm:$0xff]  }
 0x45e   :  { %9867 = vmatprep.subr.bf16.mxu0 %v14301_v59  ;;  %v14367_v58 = vld [vmem:[#allocation8 + $0x38c] ss:$40 sps:$4 sm:$0xff]   ;;  %v14362_v59 = vld [vmem:[#allocation8 + $0xb50] ss:$40 sps:$4 sm:$0xff]  }
 0x460   :  { %9654 = vmatmul.mubr.bf16.vlgmr.msra.gmra.mrb[12].mxu0 %v15493_v51  ;;  %9722 = vmatpush1.bf16.msra.mxu1 %v14296_v60  ;;  %v14365_v60 = vld [vmem:[#allocation8 + $0x388] ss:$40 sps:$4 sm:$0xff]  }
 0x461   :  { %9868 = vmatpush1.bf16.msra.mxu0 %v14299_v61  ;;  %9899 = vmatprep.mubr.bf16.mxu0 %v15415_v8  ;;  %v14370_v61 = vld [vmem:[#allocation8 + $0xba4] ss:$40 sps:$4 sm:$0xff]  }
 0x462   :  { %9723 = vmatprep.subr.bf16.mxu1 %v14304_v62  ;;  %9869 = vmatprep.subr.bf16.mxu0 %v14307_v63  ;;  %v14373_v62 = vld [vmem:[#allocation8 + $0x3dc] ss:$40 sps:$4 sm:$0xff]   ;;  %v14368_v63 = vld [vmem:[#allocation8 + $0xba0] ss:$40 sps:$4 sm:$0xff]  }
 0x464   :  { %9724 = vmatpush1.bf16.msra.mxu1 %v14302_v10  ;;  %v14371_v10 = vld [vmem:[#allocation8 + $0x3d8] ss:$40 sps:$4 sm:$0xff]  }
 0x465   :  { %9870 = vmatpush1.bf16.msra.mxu0 %v14305_v0  ;;  %9725 = vmatprep.subr.bf16.mxu1 %v14310_v21  ;;  %v14376_v0 = vld [vmem:[#allocation8 + $0xbf4] ss:$40 sps:$4 sm:$0xff]  }
 0x466   :  { %9871 = vmatprep.subr.bf16.mxu0 %v14313_v1  ;;  %v14379_v21 = vld [vmem:[#allocation8 + $0x42c] ss:$40 sps:$4 sm:$0xff]   ;;  %v14374_v1 = vld [vmem:[#allocation8 + $0xbf0] ss:$40 sps:$4 sm:$0xff]  }
 0x468   :  { %9726 = vmatpush1.bf16.msra.mxu1 %v14308_v3  ;;  %v14377_v3 = vld [vmem:[#allocation8 + $0x428] ss:$40 sps:$4 sm:$0xff]  }
 0x469   :  { %9872 = vmatpush1.bf16.msra.mxu0 %v14311_v6  ;;  %9727 = vmatprep.subr.bf16.mxu1 %v14316_v7  ;;  %v14382_v6 = vld [vmem:[#allocation8 + $0xc44] ss:$40 sps:$4 sm:$0xff]  }
 0x46a   :  { %9873 = vmatprep.subr.bf16.mxu0 %v14319_v12  ;;  %v14385_v7 = vld [vmem:[#allocation8 + $0x47c] ss:$40 sps:$4 sm:$0xff]   ;;  %v14380_v12 = vld [vmem:[#allocation8 + $0xc40] ss:$40 sps:$4 sm:$0xff]  }
 0x46c   :  { %9728 = vmatpush1.bf16.msra.mxu1 %v14314_v26  ;;  %v14383_v26 = vld [vmem:[#allocation8 + $0x478] ss:$40 sps:$4 sm:$0xff]  }
 0x46d   :  { %9874 = vmatpush1.bf16.msra.mxu0 %v14317_v14  ;;  %9729 = vmatprep.subr.bf16.mxu1 %v14322_v16  ;;  %v14388_v14 = vld [vmem:[#allocation8 + $0xc94] ss:$40 sps:$4 sm:$0xff]  }
 0x46e   :  { %9875 = vmatprep.subr.bf16.mxu0 %v14325_v17  ;;  %v14391_v16 = vld [vmem:[#allocation8 + $0x4cc] ss:$40 sps:$4 sm:$0xff]   ;;  %v14386_v17 = vld [vmem:[#allocation8 + $0xc90] ss:$40 sps:$4 sm:$0xff]  }
 0x470   :  { %9730 = vmatpush1.bf16.msra.mxu1 %v14320_v18  ;;  %v14389_v18 = vld [vmem:[#allocation8 + $0x4c8] ss:$40 sps:$4 sm:$0xff]  }
 0x471   :  { %9876 = vmatpush1.bf16.msra.mxu0 %v14323_v20  ;;  %9731 = vmatprep.subr.bf16.mxu1 %v14328_v22  ;;  %v14394_v20 = vld [vmem:[#allocation8 + $0xce4] ss:$40 sps:$4 sm:$0xff]  }
 0x472   :  { %9877 = vmatprep.subr.bf16.mxu0 %v14331_v23  ;;  %v14397_v22 = vld [vmem:[#allocation8 + $0x51c] ss:$40 sps:$4 sm:$0xff]   ;;  %v14392_v23 = vld [vmem:[#allocation8 + $0xce0] ss:$40 sps:$4 sm:$0xff]  }
 0x474   :  { %9732 = vmatpush1.bf16.msra.mxu1 %v14326_v24  ;;  %v14395_v24 = vld [vmem:[#allocation8 + $0x518] ss:$40 sps:$4 sm:$0xff]  }
 0x475   :  { %9878 = vmatpush1.bf16.msra.mxu0 %v14329_v25  ;;  %9733 = vmatprep.subr.bf16.mxu1 %v14334_v13  ;;  %v14400_v25 = vld [vmem:[#allocation8 + $0xd34] ss:$40 sps:$4 sm:$0xff]  }
 0x476   :  { %9879 = vmatprep.subr.bf16.mxu0 %v14337_v39  ;;  %v14403_v13 = vld [vmem:[#allocation8 + $0x56c] ss:$40 sps:$4 sm:$0xff]   ;;  %v14398_v39 = vld [vmem:[#allocation8 + $0xd30] ss:$40 sps:$4 sm:$0xff]  }
 0x478   :  { %9734 = vmatpush1.bf16.msra.mxu1 %v14332_v48  ;;  %v14401_v48 = vld [vmem:[#allocation8 + $0x568] ss:$40 sps:$4 sm:$0xff]  }
 0x479   :  { %9880 = vmatpush1.bf16.msra.mxu0 %v14335_v28  ;;  %9744 = vmatprep.subr.bf16.mxu1 %v14340_v45  ;;  %v14406_v28 = vld [vmem:[#allocation8 + $0xd84] ss:$40 sps:$4 sm:$0xff]  }
 0x47a   :  { %9881 = vmatprep.subr.bf16.mxu0 %v14343_v50  ;;  %v14409_v45 = vld [vmem:[#allocation8 + $0x5bc] ss:$40 sps:$4 sm:$0xff]   ;;  %v14404_v50 = vld [vmem:[#allocation8 + $0xd80] ss:$40 sps:$4 sm:$0xff]  }
 0x47b   :  { %9736 = vmatmul.mubr.bf16.vlgmr.msra.gmra.mrb[12].mxu1 %v15445_v54 }
 0x47c   :  { %9745 = vmatpush1.bf16.msra.mxu1 %v14338_v32  ;;  %9776 = vmatprep.mubr.bf16.mxu1 %v15466_v41  ;;  %v14407_v32 = vld [vmem:[#allocation8 + $0x5b8] ss:$40 sps:$4 sm:$0xff]  }
 0x47d   :  { %9882 = vmatpush1.bf16.msra.mxu0 %v14341_v35  ;;  %9746 = vmatprep.subr.bf16.mxu1 %v14346_v33  ;;  %v14412_v35 = vld [vmem:[#allocation8 + $0xdd4] ss:$40 sps:$4 sm:$0xff]  }
 0x47e   :  { %9883 = vmatprep.subr.bf16.mxu0 %v14349_v36  ;;  %v14415_v33 = vld [vmem:[#allocation8 + $0x60c] ss:$40 sps:$4 sm:$0xff]   ;;  %v14410_v36 = vld [vmem:[#allocation8 + $0xdd0] ss:$40 sps:$4 sm:$0xff]  }
 0x480   :  { %9747 = vmatpush1.bf16.msra.mxu1 %v14344_v37  ;;  %v14413_v37 = vld [vmem:[#allocation8 + $0x608] ss:$40 sps:$4 sm:$0xff]  }
 0x481   :  { %9884 = vmatpush1.bf16.msra.mxu0 %v14347_v5  ;;  %9748 = vmatprep.subr.bf16.mxu1 %v14352_v42  ;;  %v14418_v5 = vld [vmem:[#allocation8 + $0xe24] ss:$40 sps:$4 sm:$0xff]  }
 0x482   :  { %9885 = vmatprep.subr.bf16.mxu0 %v14355_v47  ;;  %v14421_v42 = vld [vmem:[#allocation8 + $0x65c] ss:$40 sps:$4 sm:$0xff]   ;;  %v14416_v47 = vld [vmem:[#allocation8 + $0xe20] ss:$40 sps:$4 sm:$0xff]  }
 0x484   :  { %9749 = vmatpush1.bf16.msra.mxu1 %v14350_v30  ;;  %v14419_v30 = vld [vmem:[#allocation8 + $0x658] ss:$40 sps:$4 sm:$0xff]  }
 0x485   :  { %9886 = vmatpush1.bf16.msra.mxu0 %v14353_v52  ;;  %9750 = vmatprep.subr.bf16.mxu1 %v14358_v53  ;;  %v14424_v52 = vld [vmem:[#allocation8 + $0xe74] ss:$40 sps:$4 sm:$0xff]  }
 0x486   :  { %9887 = vmatprep.subr.bf16.mxu0 %v14361_v46  ;;  %v14427_v53 = vld [vmem:[#allocation8 + $0x6ac] ss:$40 sps:$4 sm:$0xff]   ;;  %v14422_v46 = vld [vmem:[#allocation8 + $0xe70] ss:$40 sps:$4 sm:$0xff]  }
 0x488   :  { %9751 = vmatpush1.bf16.msra.mxu1 %v14356_v55  ;;  %v14425_v55 = vld [vmem:[#allocation8 + $0x6a8] ss:$40 sps:$4 sm:$0xff]  }
 0x489   :  { %9888 = vmatpush1.bf16.msra.mxu0 %v14359_v56  ;;  %9752 = vmatprep.subr.bf16.mxu1 %v14364_v57  ;;  %v14430_v56 = vld [vmem:[#allocation8 + $0xec4] ss:$40 sps:$4 sm:$0xff]  }
 0x48a   :  { %9889 = vmatprep.subr.bf16.mxu0 %v14367_v58  ;;  %v14433_v57 = vld [vmem:[#allocation8 + $0x6fc] ss:$40 sps:$4 sm:$0xff]   ;;  %v14428_v58 = vld [vmem:[#allocation8 + $0xec0] ss:$40 sps:$4 sm:$0xff]  }
 0x48c   :  { %9753 = vmatpush1.bf16.msra.mxu1 %v14362_v59  ;;  %v14431_v59 = vld [vmem:[#allocation8 + $0x6f8] ss:$40 sps:$4 sm:$0xff]  }
 0x48d   :  { %9890 = vmatpush1.bf16.msra.mxu0 %v14365_v60  ;;  %9754 = vmatprep.subr.bf16.mxu1 %v14370_v61  ;;  %v14436_v60 = vld [vmem:[#allocation8 + $0xf14] ss:$40 sps:$4 sm:$0xff]  }
 0x48e   :  { %9891 = vmatprep.subr.bf16.mxu0 %v14373_v62  ;;  %v14439_v61 = vld [vmem:[#allocation8 + $0x74c] ss:$40 sps:$4 sm:$0xff]   ;;  %v14434_v62 = vld [vmem:[#allocation8 + $0xf10] ss:$40 sps:$4 sm:$0xff]  }
 0x490   :  { %9755 = vmatpush1.bf16.msra.mxu1 %v14368_v63  ;;  %v14437_v63 = vld [vmem:[#allocation8 + $0x748] ss:$40 sps:$4 sm:$0xff]  }
 0x491   :  { %9892 = vmatpush1.bf16.msra.mxu0 %v14371_v10  ;;  %9756 = vmatprep.subr.bf16.mxu1 %v14376_v0  ;;  %v14442_v10 = vld [vmem:[#allocation8 + $0xf64] ss:$40 sps:$4 sm:$0xff]  }
 0x492   :  { %9893 = vmatprep.subr.bf16.mxu0 %v14379_v21  ;;  %v14445_v0 = vld [vmem:[#allocation8 + $0x79c] ss:$40 sps:$4 sm:$0xff]   ;;  %v14440_v21 = vld [vmem:[#allocation8 + $0xf60] ss:$40 sps:$4 sm:$0xff]  }
 0x494   :  { %9757 = vmatpush1.bf16.msra.mxu1 %v14374_v1  ;;  %v14443_v1 = vld [vmem:[#allocation8 + $0x798] ss:$40 sps:$4 sm:$0xff]  }
 0x495   :  { %9894 = vmatpush1.bf16.msra.mxu0 %v14377_v3  ;;  %9758 = vmatprep.subr.bf16.mxu1 %v14382_v6  ;;  %v14448_v3 = vld [vmem:[#allocation8 + $0xfb4] ss:$40 sps:$4 sm:$0xff]  }
 0x496   :  { %9895 = vmatprep.subr.bf16.mxu0 %v14385_v7  ;;  %v14451_v6 = vld [vmem:[#allocation8 + $0x7ec] ss:$40 sps:$4 sm:$0xff]   ;;  %v14446_v7 = vld [vmem:[#allocation8 + $0xfb0] ss:$40 sps:$4 sm:$0xff]  }
 0x498   :  { %9759 = vmatpush1.bf16.msra.mxu1 %v14380_v12  ;;  %v14449_v12 = vld [vmem:[#allocation8 + $0x7e8] ss:$40 sps:$4 sm:$0xff]  }
 0x499   :  { %9896 = vmatpush1.bf16.msra.mxu0 %v14383_v26  ;;  %9760 = vmatprep.subr.bf16.mxu1 %v14388_v14  ;;  %v14454_v26 = vld [vmem:[#allocation8 + $0x1004] ss:$40 sps:$4 sm:$0xff]  }
 0x49a   :  { %9897 = vmatprep.subr.bf16.mxu0 %v14391_v16  ;;  %v14457_v14 = vld [vmem:[#allocation8 + $0x83c] ss:$40 sps:$4 sm:$0xff]   ;;  %v14452_v16 = vld [vmem:[#allocation8 + $0x1000] ss:$40 sps:$4 sm:$0xff]  }
 0x49c   :  { %9761 = vmatpush1.bf16.msra.mxu1 %v14386_v17  ;;  %v14455_v17 = vld [vmem:[#allocation8 + $0x838] ss:$40 sps:$4 sm:$0xff]  }
 0x49d   :  { %9898 = vmatpush1.bf16.msra.mxu0 %v14389_v18  ;;  %9762 = vmatprep.subr.bf16.mxu1 %v14394_v20  ;;  %v14460_v18 = vld [vmem:[#allocation8 + $0x1054] ss:$40 sps:$4 sm:$0xff]  }
 0x49e   :  { %9908 = vmatprep.subr.bf16.mxu0 %v14397_v22  ;;  %v14463_v20 = vld [vmem:[#allocation8 + $0x88c] ss:$40 sps:$4 sm:$0xff]   ;;  %v14458_v22 = vld [vmem:[#allocation8 + $0x1050] ss:$40 sps:$4 sm:$0xff]  }
 0x4a0   :  { %9763 = vmatpush1.bf16.msra.mxu1 %v14392_v23  ;;  %9900 = vmatmul.mubr.bf16.vlgmr.msra.gmra.mrb[16].mxu0 %v15430_v29  ;;  %v14461_v23 = vld [vmem:[#allocation8 + $0x888] ss:$40 sps:$4 sm:$0xff]  }
 0x4a1   :  { %9909 = vmatpush1.bf16.msra.mxu0 %v14395_v24  ;;  %9940 = vmatprep.mubr.bf16.mxu0 %v15432_v31  ;;  %v14466_v24 = vld [vmem:[#allocation8 + $0x10a4] ss:$40 sps:$4 sm:$0xff]  }
 0x4a2   :  { %9764 = vmatprep.subr.bf16.mxu1 %v14400_v25  ;;  %9910 = vmatprep.subr.bf16.mxu0 %v14403_v13  ;;  %v14469_v25 = vld [vmem:[#allocation8 + $0x8dc] ss:$40 sps:$4 sm:$0xff]   ;;  %v14464_v13 = vld [vmem:[#allocation8 + $0x10a0] ss:$40 sps:$4 sm:$0xff]  }
 0x4a4   :  { %9765 = vmatpush1.bf16.msra.mxu1 %v14398_v39  ;;  %v14467_v39 = vld [vmem:[#allocation8 + $0x8d8] ss:$40 sps:$4 sm:$0xff]  }
 0x4a5   :  { %9911 = vmatpush1.bf16.msra.mxu0 %v14401_v48  ;;  %9766 = vmatprep.subr.bf16.mxu1 %v14406_v28  ;;  %v14472_v48 = vld [vmem:[#allocation8 + $0x10f4] ss:$40 sps:$4 sm:$0xff]  }
 0x4a6   :  { %9912 = vmatprep.subr.bf16.mxu0 %v14409_v45  ;;  %v14475_v45 = vld [vmem:[#allocation8 + $0x92c] ss:$40 sps:$4 sm:$0xff]  }
 0x4a8   :  { %9767 = vmatpush1.bf16.msra.mxu1 %v14404_v50 }
 0x4a9   :  { %9913 = vmatpush1.bf16.msra.mxu0 %v14407_v32  ;;  %9768 = vmatprep.subr.bf16.mxu1 %v14412_v35  ;;  %v14470_v35 = vld [vmem:[#allocation8 + $0x10f0] ss:$40 sps:$4 sm:$0xff]  }
 0x4aa   :  { %9914 = vmatprep.subr.bf16.mxu0 %v14415_v33 }
 0x4ac   :  { %9769 = vmatpush1.bf16.msra.mxu1 %v14410_v36  ;;  %v14473_v36 = vld [vmem:[#allocation8 + $0x928] ss:$40 sps:$4 sm:$0xff]  }
 0x4ad   :  { %9915 = vmatpush1.bf16.msra.mxu0 %v14413_v37  ;;  %9770 = vmatprep.subr.bf16.mxu1 %v14418_v5  ;;  %v14478_v37 = vld [vmem:[#allocation8 + $0x1144] ss:$40 sps:$4 sm:$0xff]  }
 0x4ae   :  { %9916 = vmatprep.subr.bf16.mxu0 %v14421_v42  ;;  %v14481_v5 = vld [vmem:[#allocation8 + $0x97c] ss:$40 sps:$4 sm:$0xff]   ;;  %v14476_v42 = vld [vmem:[#allocation8 + $0x1140] ss:$40 sps:$4 sm:$0xff]  }
 0x4b0   :  { %9771 = vmatpush1.bf16.msra.mxu1 %v14416_v47  ;;  %v14479_v47 = vld [vmem:[#allocation8 + $0x978] ss:$40 sps:$4 sm:$0xff]  }
 0x4b1   :  { %9917 = vmatpush1.bf16.msra.mxu0 %v14419_v30  ;;  %9772 = vmatprep.subr.bf16.mxu1 %v14424_v52  ;;  %v14484_v30 = vld [vmem:[#allocation8 + $0x1194] ss:$40 sps:$4 sm:$0xff]  }
 0x4b2   :  { %9918 = vmatprep.subr.bf16.mxu0 %v14427_v53  ;;  %v14487_v52 = vld [vmem:[#allocation8 + $0x9cc] ss:$40 sps:$4 sm:$0xff]   ;;  %v14482_v53 = vld [vmem:[#allocation8 + $0x1190] ss:$40 sps:$4 sm:$0xff]  }
 0x4b4   :  { %9773 = vmatpush1.bf16.msra.mxu1 %v14422_v46  ;;  %v14485_v46 = vld [vmem:[#allocation8 + $0x9c8] ss:$40 sps:$4 sm:$0xff]  }
 0x4b5   :  { %9919 = vmatpush1.bf16.msra.mxu0 %v14425_v55  ;;  %9774 = vmatprep.subr.bf16.mxu1 %v14430_v56  ;;  %v14490_v55 = vld [vmem:[#allocation8 + $0x11e4] ss:$40 sps:$4 sm:$0xff]  }
 0x4b6   :  { %9920 = vmatprep.subr.bf16.mxu0 %v14433_v57  ;;  %v14493_v56 = vld [vmem:[#allocation8 + $0xa1c] ss:$40 sps:$4 sm:$0xff]   ;;  %v14488_v57 = vld [vmem:[#allocation8 + $0x11e0] ss:$40 sps:$4 sm:$0xff]  }
 0x4b8   :  { %9775 = vmatpush1.bf16.msra.mxu1 %v14428_v58  ;;  %v14491_v58 = vld [vmem:[#allocation8 + $0xa18] ss:$40 sps:$4 sm:$0xff]  }
 0x4b9   :  { %9921 = vmatpush1.bf16.msra.mxu0 %v14431_v59  ;;  %9785 = vmatprep.subr.bf16.mxu1 %v14436_v60  ;;  %v14496_v59 = vld [vmem:[#allocation8 + $0x1234] ss:$40 sps:$4 sm:$0xff]  }
 0x4ba   :  { %9922 = vmatprep.subr.bf16.mxu0 %v14439_v61  ;;  %v14499_v60 = vld [vmem:[#allocation8 + $0xa6c] ss:$40 sps:$4 sm:$0xff]   ;;  %v14494_v61 = vld [vmem:[#allocation8 + $0x1230] ss:$40 sps:$4 sm:$0xff]  }
 0x4bb   :  { %9777 = vmatmul.mubr.bf16.vlgmr.msra.gmra.mrb[12].mxu1 %v15468_v43 }
 0x4bc   :  { %9786 = vmatpush1.bf16.msra.mxu1 %v14434_v62  ;;  %9817 = vmatprep.mubr.bf16.mxu1 %v15471_v49  ;;  %v14497_v62 = vld [vmem:[#allocation8 + $0xa68] ss:$40 sps:$4 sm:$0xff]  }
 0x4bd   :  { %9923 = vmatpush1.bf16.msra.mxu0 %v14437_v63  ;;  %9787 = vmatprep.subr.bf16.mxu1 %v14442_v10  ;;  %v14502_v63 = vld [vmem:[#allocation8 + $0x1284] ss:$40 sps:$4 sm:$0xff]  }
 0x4be   :  { %9924 = vmatprep.subr.bf16.mxu0 %v14445_v0  ;;  %v14505_v10 = vld [vmem:[#allocation8 + $0xabc] ss:$40 sps:$4 sm:$0xff]   ;;  %v14500_v0 = vld [vmem:[#allocation8 + $0x1280] ss:$40 sps:$4 sm:$0xff]  }
 0x4c0   :  { %9788 = vmatpush1.bf16.msra.mxu1 %v14440_v21  ;;  %v14503_v21 = vld [vmem:[#allocation8 + $0xab8] ss:$40 sps:$4 sm:$0xff]  }
 0x4c1   :  { %9925 = vmatpush1.bf16.msra.mxu0 %v14443_v1  ;;  %9789 = vmatprep.subr.bf16.mxu1 %v14448_v3  ;;  %v14508_v1 = vld [vmem:[#allocation8 + $0x12d4] ss:$40 sps:$4 sm:$0xff]  }
 0x4c2   :  { %9926 = vmatprep.subr.bf16.mxu0 %v14451_v6  ;;  %v14511_v3 = vld [vmem:[#allocation8 + $0xb0c] ss:$40 sps:$4 sm:$0xff]   ;;  %v14506_v6 = vld [vmem:[#allocation8 + $0x12d0] ss:$40 sps:$4 sm:$0xff]  }
 0x4c4   :  { %9790 = vmatpush1.bf16.msra.mxu1 %v14446_v7  ;;  %v14509_v7 = vld [vmem:[#allocation8 + $0xb08] ss:$40 sps:$4 sm:$0xff]  }
 0x4c5   :  { %9927 = vmatpush1.bf16.msra.mxu0 %v14449_v12  ;;  %9791 = vmatprep.subr.bf16.mxu1 %v14454_v26  ;;  %v14514_v12 = vld [vmem:[#allocation8 + $0x1324] ss:$40 sps:$4 sm:$0xff]  }
 0x4c6   :  { %9928 = vmatprep.subr.bf16.mxu0 %v14457_v14  ;;  %v14517_v26 = vld [vmem:[#allocation8 + $0xb5c] ss:$40 sps:$4 sm:$0xff]   ;;  %v14512_v14 = vld [vmem:[#allocation8 + $0x1320] ss:$40 sps:$4 sm:$0xff]  }
 0x4c8   :  { %9792 = vmatpush1.bf16.msra.mxu1 %v14452_v16  ;;  %v14515_v16 = vld [vmem:[#allocation8 + $0xb58] ss:$40 sps:$4 sm:$0xff]  }
 0x4c9   :  { %9929 = vmatpush1.bf16.msra.mxu0 %v14455_v17  ;;  %9793 = vmatprep.subr.bf16.mxu1 %v14460_v18  ;;  %v14520_v17 = vld [vmem:[#allocation8 + $0x1374] ss:$40 sps:$4 sm:$0xff]  }
 0x4ca   :  { %9930 = vmatprep.subr.bf16.mxu0 %v14463_v20  ;;  %v14523_v18 = vld [vmem:[#allocation8 + $0xbac] ss:$40 sps:$4 sm:$0xff]   ;;  %v14518_v20 = vld [vmem:[#allocation8 + $0x1370] ss:$40 sps:$4 sm:$0xff]  }
 0x4cc   :  { %9794 = vmatpush1.bf16.msra.mxu1 %v14458_v22  ;;  %v14521_v22 = vld [vmem:[#allocation8 + $0xba8] ss:$40 sps:$4 sm:$0xff]  }
 0x4cd   :  { %9931 = vmatpush1.bf16.msra.mxu0 %v14461_v23  ;;  %9795 = vmatprep.subr.bf16.mxu1 %v14466_v24  ;;  %v14526_v23 = vld [vmem:[#allocation8 + $0x13c4] ss:$40 sps:$4 sm:$0xff]  }
 0x4ce   :  { %v15510_v28 = vpop.f32.mrb[8].mxu1  ;;  %9932 = vmatprep.subr.bf16.mxu0 %v14469_v25  ;;  %v14529_v24 = vld [vmem:[#allocation8 + $0xbfc] ss:$40 sps:$4 sm:$0xff]   ;;  %v14524_v25 = vld [vmem:[#allocation8 + $0x13c0] ss:$40 sps:$4 sm:$0xff]  }
 0x4cf   :  { %v15512_v50 = vpop.f32.mrb[9].mxu1 }
 0x4d0   :  { %9796 = vmatpush1.bf16.msra.mxu1 %v14464_v13  ;;  %v9454_v32 = vpop.f32.mrb[10].mxu1  ;;  %v14527_v13 = vld [vmem:[#allocation8 + $0xbf8] ss:$40 sps:$4 sm:$0xff]  }
 0x4d1   :  { %9933 = vmatpush1.bf16.msra.mxu0 %v14467_v39  ;;  %v9455_v33 = vpop.f32.mrb[11].mxu1  ;;  %9797 = vmatprep.subr.bf16.mxu1 %v14472_v48  ;;  %v14532_v39 = vld [vmem:[#allocation8 + $0x1414] ss:$40 sps:$4 sm:$0xff]   ;;  %v14533_v32 = vld [vmem:[#allocation8 + $0xc48] ss:$40 sps:$4 sm:$0xff]  }
 0x4d2   :  { %9934 = vmatprep.subr.bf16.mxu0 %v14475_v45  ;;  %v14535_v48 = vld [vmem:[#allocation8 + $0xc4c] ss:$40 sps:$4 sm:$0xff]   ;;  %v14530_v45 = vld [vmem:[#allocation8 + $0x1410] ss:$40 sps:$4 sm:$0xff]   ;;  %v14541_v33 = vld [vmem:[#allocation8 + $0xc9c] ss:$40 sps:$4 sm:$0xff]  }
 0x4d4   :  { %9798 = vmatpush1.bf16.msra.mxu1 %v14470_v35  ;;  %v14538_v35 = vld [vmem:[#allocation8 + $0x1464] ss:$40 sps:$4 sm:$0xff]  }
 0x4d5   :  { %9935 = vmatpush1.bf16.msra.mxu0 %v14473_v36  ;;  %9799 = vmatprep.subr.bf16.mxu1 %v14478_v37  ;;  %v14536_v36 = vld [vmem:[#allocation8 + $0x1460] ss:$40 sps:$4 sm:$0xff]  }
 0x4d6   :  { %9936 = vmatprep.subr.bf16.mxu0 %v14481_v5  ;;  %v14539_v37 = vld [vmem:[#allocation8 + $0xc98] ss:$40 sps:$4 sm:$0xff]   ;;  %v14544_v5 = vld [vmem:[#allocation8 + $0x14b4] ss:$40 sps:$4 sm:$0xff]  }
 0x4d8   :  { %9800 = vmatpush1.bf16.msra.mxu1 %v14476_v42  ;;  %v14547_v42 = vld [vmem:[#allocation8 + $0xcec] ss:$40 sps:$4 sm:$0xff]  }
 0x4d9   :  { %9937 = vmatpush1.bf16.msra.mxu0 %v14479_v47  ;;  %9801 = vmatprep.subr.bf16.mxu1 %v14484_v30  ;;  %v14542_v47 = vld [vmem:[#allocation8 + $0x14b0] ss:$40 sps:$4 sm:$0xff]  }
 0x4da   :  { %9938 = vmatprep.subr.bf16.mxu0 %v14487_v52  ;;  %v14545_v30 = vld [vmem:[#allocation8 + $0xce8] ss:$40 sps:$4 sm:$0xff]   ;;  %v14550_v52 = vld [vmem:[#allocation8 + $0x1504] ss:$40 sps:$4 sm:$0xff]  }
 0x4dc   :  { %9802 = vmatpush1.bf16.msra.mxu1 %v14482_v53  ;;  %v14553_v53 = vld [vmem:[#allocation8 + $0xd3c] ss:$40 sps:$4 sm:$0xff]  }
 0x4dd   :  { %9939 = vmatpush1.bf16.msra.mxu0 %v14485_v46  ;;  %9803 = vmatprep.subr.bf16.mxu1 %v14490_v55  ;;  %v14548_v46 = vld [vmem:[#allocation8 + $0x1500] ss:$40 sps:$4 sm:$0xff]  }
 0x4de   :  { %9949 = vmatprep.subr.bf16.mxu0 %v14493_v56  ;;  %v14551_v55 = vld [vmem:[#allocation8 + $0xd38] ss:$40 sps:$4 sm:$0xff]   ;;  %v14556_v56 = vld [vmem:[#allocation8 + $0x1554] ss:$40 sps:$4 sm:$0xff]  }
 0x4e0   :  { %9804 = vmatpush1.bf16.msra.mxu1 %v14488_v57  ;;  %9941 = vmatmul.mubr.bf16.vlgmr.msra.gmra.mrb[16].mxu0 %v15445_v54  ;;  %v14559_v57 = vld [vmem:[#allocation8 + $0xd8c] ss:$40 sps:$4 sm:$0xff]  }
 0x4e1   :  { %9950 = vmatpush1.bf16.msra.mxu0 %v14491_v58  ;;  %9981 = vmatprep.mubr.bf16.mxu0 %v15466_v41  ;;  %v14554_v58 = vld [vmem:[#allocation8 + $0x1550] ss:$40 sps:$4 sm:$0xff]  }
 0x4e2   :  { %9805 = vmatprep.subr.bf16.mxu1 %v14496_v59  ;;  %9951 = vmatprep.subr.bf16.mxu0 %v14499_v60  ;;  %v14557_v59 = vld [vmem:[#allocation8 + $0xd88] ss:$40 sps:$4 sm:$0xff]   ;;  %v14562_v60 = vld [vmem:[#allocation8 + $0x15a4] ss:$40 sps:$4 sm:$0xff]  }
 0x4e4   :  { %9806 = vmatpush1.bf16.msra.mxu1 %v14494_v61  ;;  %v14565_v61 = vld [vmem:[#allocation8 + $0xddc] ss:$40 sps:$4 sm:$0xff]  }
 0x4e5   :  { %9952 = vmatpush1.bf16.msra.mxu0 %v14497_v62  ;;  %9807 = vmatprep.subr.bf16.mxu1 %v14502_v63  ;;  %v14560_v62 = vld [vmem:[#allocation8 + $0x15a0] ss:$40 sps:$4 sm:$0xff]  }
 0x4e6   :  { %9953 = vmatprep.subr.bf16.mxu0 %v14505_v10  ;;  %v14563_v63 = vld [vmem:[#allocation8 + $0xdd8] ss:$40 sps:$4 sm:$0xff]   ;;  %v14568_v10 = vld [vmem:[#allocation8 + $0x15f4] ss:$40 sps:$4 sm:$0xff]  }
 0x4e8   :  { %9808 = vmatpush1.bf16.msra.mxu1 %v14500_v0  ;;  %v14571_v0 = vld [vmem:[#allocation8 + $0xe2c] ss:$40 sps:$4 sm:$0xff]  }
 0x4e9   :  { %9954 = vmatpush1.bf16.msra.mxu0 %v14503_v21  ;;  %9809 = vmatprep.subr.bf16.mxu1 %v14508_v1  ;;  %v14566_v21 = vld [vmem:[#allocation8 + $0x15f0] ss:$40 sps:$4 sm:$0xff]  }
 0x4ea   :  { %9955 = vmatprep.subr.bf16.mxu0 %v14511_v3  ;;  %v14569_v1 = vld [vmem:[#allocation8 + $0xe28] ss:$40 sps:$4 sm:$0xff]   ;;  %v14574_v3 = vld [vmem:[#allocation8 + $0x1644] ss:$40 sps:$4 sm:$0xff]  }
 0x4ec   :  { %9810 = vmatpush1.bf16.msra.mxu1 %v14506_v6  ;;  %v14577_v6 = vld [vmem:[#allocation8 + $0xe7c] ss:$40 sps:$4 sm:$0xff]  }
 0x4ed   :  { %9956 = vmatpush1.bf16.msra.mxu0 %v14509_v7  ;;  %9811 = vmatprep.subr.bf16.mxu1 %v14514_v12  ;;  %v14572_v7 = vld [vmem:[#allocation8 + $0x1640] ss:$40 sps:$4 sm:$0xff]  }
 0x4ee   :  { %9957 = vmatprep.subr.bf16.mxu0 %v14517_v26  ;;  %v14575_v12 = vld [vmem:[#allocation8 + $0xe78] ss:$40 sps:$4 sm:$0xff]   ;;  %v14580_v26 = vld [vmem:[#allocation8 + $0x1694] ss:$40 sps:$4 sm:$0xff]  }
 0x4f0   :  { %9812 = vmatpush1.bf16.msra.mxu1 %v14512_v14  ;;  %v14583_v14 = vld [vmem:[#allocation8 + $0xecc] ss:$40 sps:$4 sm:$0xff]  }
 0x4f1   :  { %9958 = vmatpush1.bf16.msra.mxu0 %v14515_v16  ;;  %9813 = vmatprep.subr.bf16.mxu1 %v14520_v17  ;;  %v14578_v16 = vld [vmem:[#allocation8 + $0x1690] ss:$40 sps:$4 sm:$0xff]  }
 0x4f2   :  { %9959 = vmatprep.subr.bf16.mxu0 %v14523_v18  ;;  %v14581_v17 = vld [vmem:[#allocation8 + $0xec8] ss:$40 sps:$4 sm:$0xff]   ;;  %v14586_v18 = vld [vmem:[#allocation8 + $0x16e4] ss:$40 sps:$4 sm:$0xff]  }
 0x4f4   :  { %9814 = vmatpush1.bf16.msra.mxu1 %v14518_v20  ;;  %v14589_v20 = vld [vmem:[#allocation8 + $0xf1c] ss:$40 sps:$4 sm:$0xff]  }
 0x4f5   :  { %9960 = vmatpush1.bf16.msra.mxu0 %v14521_v22  ;;  %9815 = vmatprep.subr.bf16.mxu1 %v14526_v23  ;;  %v14584_v22 = vld [vmem:[#allocation8 + $0x16e0] ss:$40 sps:$4 sm:$0xff]  }
 0x4f6   :  { %9961 = vmatprep.subr.bf16.mxu0 %v14529_v24  ;;  %v14587_v23 = vld [vmem:[#allocation8 + $0xf18] ss:$40 sps:$4 sm:$0xff]   ;;  %v14592_v24 = vld [vmem:[#allocation8 + $0x1734] ss:$40 sps:$4 sm:$0xff]  }
 0x4f8   :  { %9816 = vmatpush1.bf16.msra.mxu1 %v14524_v25  ;;  %v14595_v25 = vld [vmem:[#allocation8 + $0xf6c] ss:$40 sps:$4 sm:$0xff]  }
 0x4f9   :  { %9962 = vmatpush1.bf16.msra.mxu0 %v14527_v13  ;;  %9826 = vmatprep.subr.bf16.mxu1 %v14532_v39  ;;  %v14590_v13 = vld [vmem:[#allocation8 + $0x1730] ss:$40 sps:$4 sm:$0xff]  }
 0x4fa   :  { %9963 = vmatprep.subr.bf16.mxu0 %v14535_v48  ;;  %v14593_v39 = vld [vmem:[#allocation8 + $0xf68] ss:$40 sps:$4 sm:$0xff]   ;;  %v14598_v48 = vld [vmem:[#allocation8 + $0x1784] ss:$40 sps:$4 sm:$0xff]  }
 0x4fb   :  { %9818 = vmatmul.mubr.bf16.vlgmr.msra.gmra.mrb[12].mxu1 %v15480_v15 }
 0x4fc   :  { %9827 = vmatpush1.bf16.msra.mxu1 %v14530_v45  ;;  %9858 = vmatprep.mubr.bf16.mxu1 %v15491_v44  ;;  %v14601_v45 = vld [vmem:[#allocation8 + $0xfbc] ss:$40 sps:$4 sm:$0xff]  }
 0x4fd   :  { %9964 = vmatpush1.bf16.msra.mxu0 %v14533_v32  ;;  %9828 = vmatprep.subr.bf16.mxu1 %v14538_v35  ;;  %v14596_v32 = vld [vmem:[#allocation8 + $0x1780] ss:$40 sps:$4 sm:$0xff]  }
 0x4fe   :  { %9965 = vmatprep.subr.bf16.mxu0 %v14541_v33  ;;  %v14599_v35 = vld [vmem:[#allocation8 + $0xfb8] ss:$40 sps:$4 sm:$0xff]   ;;  %v14604_v33 = vld [vmem:[#allocation8 + $0x17d4] ss:$40 sps:$4 sm:$0xff]  }
 0x500   :  { %9829 = vmatpush1.bf16.msra.mxu1 %v14536_v36  ;;  %v14607_v36 = vld [vmem:[#allocation8 + $0x100c] ss:$40 sps:$4 sm:$0xff]  }
 0x501   :  { %9966 = vmatpush1.bf16.msra.mxu0 %v14539_v37  ;;  %9830 = vmatprep.subr.bf16.mxu1 %v14544_v5  ;;  %v14602_v37 = vld [vmem:[#allocation8 + $0x17d0] ss:$40 sps:$4 sm:$0xff]  }
 0x502   :  { %9967 = vmatprep.subr.bf16.mxu0 %v14547_v42  ;;  %v14605_v5 = vld [vmem:[#allocation8 + $0x1008] ss:$40 sps:$4 sm:$0xff]   ;;  %v14610_v42 = vld [vmem:[#allocation8 + $0x1824] ss:$40 sps:$4 sm:$0xff]  }
 0x504   :  { %9831 = vmatpush1.bf16.msra.mxu1 %v14542_v47  ;;  %v14613_v47 = vld [vmem:[#allocation8 + $0x105c] ss:$40 sps:$4 sm:$0xff]  }
 0x505   :  { %9968 = vmatpush1.bf16.msra.mxu0 %v14545_v30  ;;  %9832 = vmatprep.subr.bf16.mxu1 %v14550_v52  ;;  %v14608_v30 = vld [vmem:[#allocation8 + $0x1820] ss:$40 sps:$4 sm:$0xff]  }
 0x506   :  { %9969 = vmatprep.subr.bf16.mxu0 %v14553_v53  ;;  %v14611_v52 = vld [vmem:[#allocation8 + $0x1058] ss:$40 sps:$4 sm:$0xff]   ;;  %v14616_v53 = vld [vmem:[#allocation8 + $0x1874] ss:$40 sps:$4 sm:$0xff]  }
 0x508   :  { %9833 = vmatpush1.bf16.msra.mxu1 %v14548_v46  ;;  %v14619_v46 = vld [vmem:[#allocation8 + $0x10ac] ss:$40 sps:$4 sm:$0xff]  }
 0x509   :  { %9970 = vmatpush1.bf16.msra.mxu0 %v14551_v55  ;;  %9834 = vmatprep.subr.bf16.mxu1 %v14556_v56  ;;  %v14614_v55 = vld [vmem:[#allocation8 + $0x1870] ss:$40 sps:$4 sm:$0xff]  }
 0x50a   :  { %9971 = vmatprep.subr.bf16.mxu0 %v14559_v57  ;;  %v14617_v56 = vld [vmem:[#allocation8 + $0x10a8] ss:$40 sps:$4 sm:$0xff]   ;;  %v14622_v57 = vld [vmem:[#allocation8 + $0x18c4] ss:$40 sps:$4 sm:$0xff]  }
 0x50c   :  { %9835 = vmatpush1.bf16.msra.mxu1 %v14554_v58  ;;  %v14625_v58 = vld [vmem:[#allocation8 + $0x10fc] ss:$40 sps:$4 sm:$0xff]  }
 0x50d   :  { %9972 = vmatpush1.bf16.msra.mxu0 %v14557_v59  ;;  %9836 = vmatprep.subr.bf16.mxu1 %v14562_v60 }
 0x50e   :  { %9973 = vmatprep.subr.bf16.mxu0 %v14565_v61  ;;  %v14620_v61 = vld [vmem:[#allocation8 + $0x18c0] ss:$40 sps:$4 sm:$0xff]  }
 0x510   :  { %9837 = vmatpush1.bf16.msra.mxu1 %v14560_v62 }
 0x511   :  { %9974 = vmatpush1.bf16.msra.mxu0 %v14563_v63  ;;  %9838 = vmatprep.subr.bf16.mxu1 %v14568_v10  ;;  %v14623_v63 = vld [vmem:[#allocation8 + $0x10f8] ss:$40 sps:$4 sm:$0xff]   ;;  %v14628_v10 = vld [vmem:[#allocation8 + $0x24] ss:$40 sps:$4 sm:$0xff]  }
 0x512   :  { %9975 = vmatprep.subr.bf16.mxu0 %v14571_v0 }
 0x514   :  { %9839 = vmatpush1.bf16.msra.mxu1 %v14566_v21  ;;  %v14631_v21 = vld [vmem:[#allocation8 + $0x114c] ss:$40 sps:$4 sm:$0xff]  }
 0x515   :  { %9976 = vmatpush1.bf16.msra.mxu0 %v14569_v1  ;;  %9840 = vmatprep.subr.bf16.mxu1 %v14574_v3  ;;  %v14626_v1 = vld [vmem:[#allocation8 + $0x20] ss:$40 sps:$4 sm:$0xff]  }
 0x516   :  { %9977 = vmatprep.subr.bf16.mxu0 %v14577_v6  ;;  %v14629_v3 = vld [vmem:[#allocation8 + $0x1148] ss:$40 sps:$4 sm:$0xff]   ;;  %v14634_v6 = vld [vmem:[#allocation8 + $0x74] ss:$40 sps:$4 sm:$0xff]  }
 0x518   :  { %9841 = vmatpush1.bf16.msra.mxu1 %v14572_v7  ;;  %v14637_v7 = vld [vmem:[#allocation8 + $0x119c] ss:$40 sps:$4 sm:$0xff]  }
 0x519   :  { %9978 = vmatpush1.bf16.msra.mxu0 %v14575_v12  ;;  %9842 = vmatprep.subr.bf16.mxu1 %v14580_v26  ;;  %v14632_v12 = vld [vmem:[#allocation8 + $0x70] ss:$40 sps:$4 sm:$0xff]  }
 0x51a   :  { %9979 = vmatprep.subr.bf16.mxu0 %v14583_v14  ;;  %v14635_v26 = vld [vmem:[#allocation8 + $0x1198] ss:$40 sps:$4 sm:$0xff]   ;;  %v14640_v14 = vld [vmem:[#allocation8 + $0xc4] ss:$40 sps:$4 sm:$0xff]  }
 0x51c   :  { %9843 = vmatpush1.bf16.msra.mxu1 %v14578_v16  ;;  %v14643_v16 = vld [vmem:[#allocation8 + $0x11ec] ss:$40 sps:$4 sm:$0xff]  }
 0x51d   :  { %9980 = vmatpush1.bf16.msra.mxu0 %v14581_v17  ;;  %9844 = vmatprep.subr.bf16.mxu1 %v14586_v18  ;;  %v14638_v17 = vld [vmem:[#allocation8 + $0xc0] ss:$40 sps:$4 sm:$0xff]  }
 0x51e   :  { %9990 = vmatprep.subr.bf16.mxu0 %v14589_v20  ;;  %v14641_v18 = vld [vmem:[#allocation8 + $0x11e8] ss:$40 sps:$4 sm:$0xff]   ;;  %v14646_v20 = vld [vmem:[#allocation8 + $0x114] ss:$40 sps:$4 sm:$0xff]  }
 0x520   :  { %9845 = vmatpush1.bf16.msra.mxu1 %v14584_v22  ;;  %9982 = vmatmul.mubr.bf16.vlgmr.msra.gmra.mrb[16].mxu0 %v15468_v43  ;;  %v14649_v22 = vld [vmem:[#allocation8 + $0x123c] ss:$40 sps:$4 sm:$0xff]  }
 0x521   :  { %9991 = vmatpush1.bf16.msra.mxu0 %v14587_v23  ;;  %10022 = vmatprep.mubr.bf16.mxu0 %v15471_v49  ;;  %v14644_v23 = vld [vmem:[#allocation8 + $0x110] ss:$40 sps:$4 sm:$0xff]  }
 0x522   :  { %9846 = vmatprep.subr.bf16.mxu1 %v14592_v24  ;;  %9992 = vmatprep.subr.bf16.mxu0 %v14595_v25  ;;  %v14652_v24 = vld [vmem:[#allocation8 + $0x164] ss:$40 sps:$4 sm:$0xff]  }
 0x523   :  { %v14655_v25 = vld [vmem:[#allocation8 + $0x128c] ss:$40 sps:$4 sm:$0xff]  }
 0x524   :  { %9847 = vmatpush1.bf16.msra.mxu1 %v14590_v13  ;;  %v14650_v13 = vld [vmem:[#allocation8 + $0x160] ss:$40 sps:$4 sm:$0xff]  }
 0x525   :  { %9993 = vmatpush1.bf16.msra.mxu0 %v14593_v39  ;;  %9848 = vmatprep.subr.bf16.mxu1 %v14598_v48  ;;  %v14653_v39 = vld [vmem:[#allocation8 + $0x1288] ss:$40 sps:$4 sm:$0xff]   ;;  %v14658_v48 = vld [vmem:[#allocation8 + $0x1b4] ss:$40 sps:$4 sm:$0xff]  }
 0x526   :  { %9994 = vmatprep.subr.bf16.mxu0 %v14601_v45  ;;  %v14661_v45 = vld [vmem:[#allocation8 + $0x12dc] ss:$40 sps:$4 sm:$0xff]  }
 0x528   :  { %9849 = vmatpush1.bf16.msra.mxu1 %v14596_v32  ;;  %v14656_v32 = vld [vmem:[#allocation8 + $0x1b0] ss:$40 sps:$4 sm:$0xff]  }
 0x529   :  { %9995 = vmatpush1.bf16.msra.mxu0 %v14599_v35  ;;  %9850 = vmatprep.subr.bf16.mxu1 %v14604_v33  ;;  %v14659_v35 = vld [vmem:[#allocation8 + $0x12d8] ss:$40 sps:$4 sm:$0xff]   ;;  %v14664_v33 = vld [vmem:[#allocation8 + $0x204] ss:$40 sps:$4 sm:$0xff]  }
 0x52a   :  { %9996 = vmatprep.subr.bf16.mxu0 %v14607_v36  ;;  %v14667_v36 = vld [vmem:[#allocation8 + $0x132c] ss:$40 sps:$4 sm:$0xff]  }
 0x52c   :  { %9851 = vmatpush1.bf16.msra.mxu1 %v14602_v37  ;;  %v14662_v37 = vld [vmem:[#allocation8 + $0x200] ss:$40 sps:$4 sm:$0xff]  }
 0x52d   :  { %9997 = vmatpush1.bf16.msra.mxu0 %v14605_v5  ;;  %9852 = vmatprep.subr.bf16.mxu1 %v14610_v42  ;;  %v14665_v5 = vld [vmem:[#allocation8 + $0x1328] ss:$40 sps:$4 sm:$0xff]   ;;  %v14670_v42 = vld [vmem:[#allocation8 + $0x254] ss:$40 sps:$4 sm:$0xff]  }
 0x52e   :  { %9998 = vmatprep.subr.bf16.mxu0 %v14613_v47  ;;  %v14673_v47 = vld [vmem:[#allocation8 + $0x137c] ss:$40 sps:$4 sm:$0xff]  }
 0x530   :  { %9853 = vmatpush1.bf16.msra.mxu1 %v14608_v30  ;;  %v14668_v30 = vld [vmem:[#allocation8 + $0x250] ss:$40 sps:$4 sm:$0xff]  }
 0x531   :  { %9999 = vmatpush1.bf16.msra.mxu0 %v14611_v52  ;;  %9854 = vmatprep.subr.bf16.mxu1 %v14616_v53  ;;  %v14671_v52 = vld [vmem:[#allocation8 + $0x1378] ss:$40 sps:$4 sm:$0xff]   ;;  %v14676_v53 = vld [vmem:[#allocation8 + $0x2a4] ss:$40 sps:$4 sm:$0xff]  }
 0x532   :  { %10000 = vmatprep.subr.bf16.mxu0 %v14619_v46  ;;  %v14679_v46 = vld [vmem:[#allocation8 + $0x13cc] ss:$40 sps:$4 sm:$0xff]  }
 0x533   :  { %v15520_v59 = vpop.f32.mrb[12].mxu0 }
 0x534   :  { %v15522_v60 = vpop.f32.mrb[13].mxu0  ;;  %9855 = vmatpush1.bf16.msra.mxu1 %v14614_v55  ;;  %v14674_v55 = vld [vmem:[#allocation8 + $0x2a0] ss:$40 sps:$4 sm:$0xff]  }
 0x535   :  { %v9659_v62 = vpop.f32.mrb[14].mxu0  ;;  %10001 = vmatpush1.bf16.msra.mxu0 %v14617_v56  ;;  %9856 = vmatprep.subr.bf16.mxu1 %v14622_v57  ;;  %v14677_v56 = vld [vmem:[#allocation8 + $0x13c8] ss:$40 sps:$4 sm:$0xff]   ;;  %v14682_v57 = vld [vmem:[#allocation8 + $0x2f4] ss:$40 sps:$4 sm:$0xff]  }
 0x536   :  { %v9660_v0 = vpop.f32.mrb[15].mxu0  ;;  %10002 = vmatprep.subr.bf16.mxu0 %v14625_v58  ;;  %v14685_v58 = vld [vmem:[#allocation8 + $0x141c] ss:$40 sps:$4 sm:$0xff]   ;;  %v14683_v62 = vld [vmem:[#allocation8 + $0x1418] ss:$40 sps:$4 sm:$0xff]  }
 0x537   :  { %v14686_v0 = vld [vmem:[#allocation8 + $0x340] ss:$40 sps:$4 sm:$0xff]  }
 0x538   :  { %9857 = vmatpush1.bf16.msra.mxu1 %v14620_v61  ;;  %v14680_v61 = vld [vmem:[#allocation8 + $0x2f0] ss:$40 sps:$4 sm:$0xff]  }
 0x539   :  { %10003 = vmatpush1.bf16.msra.mxu0 %v14623_v63  ;;  %10072 = vmatprep.subr.bf16.mxu1 %v14628_v10  ;;  %v14688_v63 = vld [vmem:[#allocation8 + $0x344] ss:$40 sps:$4 sm:$0xff]  }
 0x53a   :  { %10004 = vmatprep.subr.bf16.mxu0 %v14631_v21  ;;  %v14691_v10 = vld [vmem:[#allocation8 + $0x146c] ss:$40 sps:$4 sm:$0xff]   ;;  %v14689_v21 = vld [vmem:[#allocation8 + $0x1468] ss:$40 sps:$4 sm:$0xff]  }
 0x53b   :  { %9859 = vmatmul.mubr.bf16.vlgmr.msra.gmra.mrb[12].mxu1 %v15493_v51 }
 0x53c   :  { %10073 = vmatpush1.bf16.msra.mxu1 %v14626_v1  ;;  %10104 = vmatprep.mubr.bf16.mxu1 %v15415_v8  ;;  %v14647_v8 = vld [vmem:[#allocation8 + $0x1238] ss:$40 sps:$4 sm:$0xff]   ;;  %v14694_v1 = vld [vmem:[#allocation8 + $0x394] ss:$40 sps:$4 sm:$0xff]  }
 0x53d   :  { %10005 = vmatpush1.bf16.msra.mxu0 %v14629_v3  ;;  %10074 = vmatprep.subr.bf16.mxu1 %v14634_v6  ;;  %v14697_v3 = vld [vmem:[#allocation8 + $0x14bc] ss:$40 sps:$4 sm:$0xff]   ;;  %v14692_v6 = vld [vmem:[#allocation8 + $0x390] ss:$40 sps:$4 sm:$0xff]  }
 0x53e   :  { %10006 = vmatprep.subr.bf16.mxu0 %v14637_v7  ;;  %v14695_v7 = vld [vmem:[#allocation8 + $0x14b8] ss:$40 sps:$4 sm:$0xff]  }
 0x540   :  { %10075 = vmatpush1.bf16.msra.mxu1 %v14632_v12  ;;  %v14700_v12 = vld [vmem:[#allocation8 + $0x3e4] ss:$40 sps:$4 sm:$0xff]  }
 0x541   :  { %10007 = vmatpush1.bf16.msra.mxu0 %v14635_v26  ;;  %10076 = vmatprep.subr.bf16.mxu1 %v14640_v14  ;;  %v14703_v26 = vld [vmem:[#allocation8 + $0x150c] ss:$40 sps:$4 sm:$0xff]   ;;  %v14698_v14 = vld [vmem:[#allocation8 + $0x3e0] ss:$40 sps:$4 sm:$0xff]  }
 0x542   :  { %10008 = vmatprep.subr.bf16.mxu0 %v14643_v16  ;;  %v14701_v16 = vld [vmem:[#allocation8 + $0x1508] ss:$40 sps:$4 sm:$0xff]  }
 0x544   :  { %10077 = vmatpush1.bf16.msra.mxu1 %v14638_v17  ;;  %v14706_v17 = vld [vmem:[#allocation8 + $0x434] ss:$40 sps:$4 sm:$0xff]  }
 0x545   :  { %10009 = vmatpush1.bf16.msra.mxu0 %v14641_v18  ;;  %10078 = vmatprep.subr.bf16.mxu1 %v14646_v20  ;;  %v14709_v18 = vld [vmem:[#allocation8 + $0x155c] ss:$40 sps:$4 sm:$0xff]   ;;  %v14704_v20 = vld [vmem:[#allocation8 + $0x430] ss:$40 sps:$4 sm:$0xff]  }
 0x546   :  { %10010 = vmatprep.subr.bf16.mxu0 %v14649_v22  ;;  %v14707_v22 = vld [vmem:[#allocation8 + $0x1558] ss:$40 sps:$4 sm:$0xff]  }
 0x548   :  { %10079 = vmatpush1.bf16.msra.mxu1 %v14644_v23  ;;  %v14712_v23 = vld [vmem:[#allocation8 + $0x484] ss:$40 sps:$4 sm:$0xff]  }
 0x549   :  { %10011 = vmatpush1.bf16.msra.mxu0 %v14647_v8  ;;  %10080 = vmatprep.subr.bf16.mxu1 %v14652_v24  ;;  %v14715_v8 = vld [vmem:[#allocation8 + $0x15ac] ss:$40 sps:$4 sm:$0xff]   ;;  %v14710_v24 = vld [vmem:[#allocation8 + $0x480] ss:$40 sps:$4 sm:$0xff]  }
 0x54a   :  { %10012 = vmatprep.subr.bf16.mxu0 %v14655_v25  ;;  %v14713_v25 = vld [vmem:[#allocation8 + $0x15a8] ss:$40 sps:$4 sm:$0xff]  }
 0x54c   :  { %10081 = vmatpush1.bf16.msra.mxu1 %v14650_v13  ;;  %v14718_v13 = vld [vmem:[#allocation8 + $0x4d4] ss:$40 sps:$4 sm:$0xff]  }
 0x54d   :  { %10013 = vmatpush1.bf16.msra.mxu0 %v14653_v39  ;;  %10082 = vmatprep.subr.bf16.mxu1 %v14658_v48  ;;  %v14721_v39 = vld [vmem:[#allocation8 + $0x15fc] ss:$40 sps:$4 sm:$0xff]   ;;  %v14716_v48 = vld [vmem:[#allocation8 + $0x4d0] ss:$40 sps:$4 sm:$0xff]  }
 0x54e   :  { %10014 = vmatprep.subr.bf16.mxu0 %v14661_v45  ;;  %v14719_v45 = vld [vmem:[#allocation8 + $0x15f8] ss:$40 sps:$4 sm:$0xff]  }
 0x550   :  { %10083 = vmatpush1.bf16.msra.mxu1 %v14656_v32  ;;  %v14724_v32 = vld [vmem:[#allocation8 + $0x524] ss:$40 sps:$4 sm:$0xff]  }
 0x551   :  { %10015 = vmatpush1.bf16.msra.mxu0 %v14659_v35  ;;  %10084 = vmatprep.subr.bf16.mxu1 %v14664_v33  ;;  %v14727_v35 = vld [vmem:[#allocation8 + $0x164c] ss:$40 sps:$4 sm:$0xff]   ;;  %v14722_v33 = vld [vmem:[#allocation8 + $0x520] ss:$40 sps:$4 sm:$0xff]  }
 0x552   :  { %10016 = vmatprep.subr.bf16.mxu0 %v14667_v36  ;;  %v14725_v36 = vld [vmem:[#allocation8 + $0x1648] ss:$40 sps:$4 sm:$0xff]  }
 0x554   :  { %10085 = vmatpush1.bf16.msra.mxu1 %v14662_v37  ;;  %v14730_v37 = vld [vmem:[#allocation8 + $0x574] ss:$40 sps:$4 sm:$0xff]  }
 0x555   :  { %10017 = vmatpush1.bf16.msra.mxu0 %v14665_v5  ;;  %10086 = vmatprep.subr.bf16.mxu1 %v14670_v42  ;;  %v14733_v5 = vld [vmem:[#allocation8 + $0x169c] ss:$40 sps:$4 sm:$0xff]   ;;  %v14728_v42 = vld [vmem:[#allocation8 + $0x570] ss:$40 sps:$4 sm:$0xff]  }
 0x556   :  { %10018 = vmatprep.subr.bf16.mxu0 %v14673_v47  ;;  %v14731_v47 = vld [vmem:[#allocation8 + $0x1698] ss:$40 sps:$4 sm:$0xff]  }
 0x558   :  { %10087 = vmatpush1.bf16.msra.mxu1 %v14668_v30  ;;  %v14736_v30 = vld [vmem:[#allocation8 + $0x5c4] ss:$40 sps:$4 sm:$0xff]  }
 0x559   :  { %10019 = vmatpush1.bf16.msra.mxu0 %v14671_v52  ;;  %10088 = vmatprep.subr.bf16.mxu1 %v14676_v53  ;;  %v14739_v52 = vld [vmem:[#allocation8 + $0x16ec] ss:$40 sps:$4 sm:$0xff]   ;;  %v14734_v53 = vld [vmem:[#allocation8 + $0x5c0] ss:$40 sps:$4 sm:$0xff]  }
 0x55a   :  { %10020 = vmatprep.subr.bf16.mxu0 %v14679_v46  ;;  %v14737_v46 = vld [vmem:[#allocation8 + $0x16e8] ss:$40 sps:$4 sm:$0xff]  }
 0x55c   :  { %10089 = vmatpush1.bf16.msra.mxu1 %v14674_v55  ;;  %v14742_v55 = vld [vmem:[#allocation8 + $0x614] ss:$40 sps:$4 sm:$0xff]  }
 0x55d   :  { %10021 = vmatpush1.bf16.msra.mxu0 %v14677_v56  ;;  %10090 = vmatprep.subr.bf16.mxu1 %v14682_v57  ;;  %v14745_v56 = vld [vmem:[#allocation8 + $0x173c] ss:$40 sps:$4 sm:$0xff]  }
 0x55e   :  { %10031 = vmatprep.subr.bf16.mxu0 %v14685_v58  ;;  %v14748_v57 = vld [vmem:[#allocation8 + $0x664] ss:$40 sps:$4 sm:$0xff]  }
 0x55f   :  { %v14751_v58 = vld [vmem:[#allocation8 + $0x178c] ss:$40 sps:$4 sm:$0xff]  }
 0x560   :  { %10023 = vmatmul.mubr.bf16.vlgmr.msra.gmra.mrb[16].mxu0 %v15480_v15  ;;  %10091 = vmatpush1.bf16.msra.mxu1 %v14680_v61  ;;  %v14746_v61 = vld [vmem:[#allocation8 + $0x660] ss:$40 sps:$4 sm:$0xff]  }
 0x561   :  { %10032 = vmatpush1.bf16.msra.mxu0 %v14683_v62  ;;  %10063 = vmatprep.mubr.bf16.mxu0 %v15491_v44  ;;  %v14749_v62 = vld [vmem:[#allocation8 + $0x1788] ss:$40 sps:$4 sm:$0xff]  }
 0x562   :  { %10092 = vmatprep.subr.bf16.mxu1 %v14688_v63  ;;  %10033 = vmatprep.subr.bf16.mxu0 %v14691_v10  ;;  %v14754_v63 = vld [vmem:[#allocation8 + $0x6b4] ss:$40 sps:$4 sm:$0xff]  }
 0x563   :  { %v14757_v10 = vld [vmem:[#allocation8 + $0x17dc] ss:$40 sps:$4 sm:$0xff]  }
 0x564   :  { %10093 = vmatpush1.bf16.msra.mxu1 %v14686_v0  ;;  %v14752_v0 = vld [vmem:[#allocation8 + $0x6b0] ss:$40 sps:$4 sm:$0xff]  }
 0x565   :  { %10034 = vmatpush1.bf16.msra.mxu0 %v14689_v21  ;;  %10094 = vmatprep.subr.bf16.mxu1 %v14694_v1  ;;  %v14755_v21 = vld [vmem:[#allocation8 + $0x17d8] ss:$40 sps:$4 sm:$0xff]   ;;  %v14760_v1 = vld [vmem:[#allocation8 + $0x704] ss:$40 sps:$4 sm:$0xff]  }
 0x566   :  { %10035 = vmatprep.subr.bf16.mxu0 %v14697_v3  ;;  %v14763_v3 = vld [vmem:[#allocation8 + $0x182c] ss:$40 sps:$4 sm:$0xff]  }
 0x568   :  { %10095 = vmatpush1.bf16.msra.mxu1 %v14692_v6  ;;  %v15530_v6 = vld [vmem:[#allocation10] sm:$0xff] }
 0x569   :  { %10036 = vmatpush1.bf16.msra.mxu0 %v14695_v7  ;;  %10096 = vmatprep.subr.bf16.mxu1 %v14700_v12  ;;  %v14758_v7 = vld [vmem:[#allocation8 + $0x700] ss:$40 sps:$4 sm:$0xff]  }
 0x56a   :  { %10037 = vmatprep.subr.bf16.mxu0 %v14703_v26  ;;  %v14761_v12 = vld [vmem:[#allocation8 + $0x1828] ss:$40 sps:$4 sm:$0xff]   ;;  %v14766_v26 = vld [vmem:[#allocation8 + $0x754] ss:$40 sps:$4 sm:$0xff]  }
 0x56c   :  { %10097 = vmatpush1.bf16.msra.mxu1 %v14698_v14  ;;  %v14769_v14 = vld [vmem:[#allocation8 + $0x187c] ss:$40 sps:$4 sm:$0xff]  }
 0x56d   :  { %10038 = vmatpush1.bf16.msra.mxu0 %v14701_v16  ;;  %10098 = vmatprep.subr.bf16.mxu1 %v14706_v17  ;;  %v5209_v16 = vrot.slane %v15530_v6, %v15405_v40  ;;  %v14764_v17 = vld [vmem:[#allocation8 + $0x750] ss:$40 sps:$4 sm:$0xff]  }
 0x56e   :  { %10039 = vmatprep.subr.bf16.mxu0 %v14709_v18  ;;  %v14767_v18 = vld [vmem:[#allocation8 + $0x1878] ss:$40 sps:$4 sm:$0xff]  }
 0x570   :  { %10099 = vmatpush1.bf16.msra.mxu1 %v14704_v20  ;;  %v14772_v20 = vld [vmem:[#allocation8 + $0x7a4] ss:$40 sps:$4 sm:$0xff]  }
 0x571   :  { %10040 = vmatpush1.bf16.msra.mxu0 %v14707_v22  ;;  %10100 = vmatprep.subr.bf16.mxu1 %v14712_v23  ;;  %v14775_v22 = vld [vmem:[#allocation8 + $0x18cc] ss:$40 sps:$4 sm:$0xff]   ;;  %v12732_v23 = vadd.f32 %v15512_v50, %v5209_v16  ;;  %v14781_v50 = vld [vmem:[#allocation8 + $0x840] ss:$40 sps:$4 sm:$0xff]  }
 0x572   :  { %10041 = vmatprep.subr.bf16.mxu0 %v14715_v8  ;;  %v14770_v8 = vld [vmem:[#allocation8 + $0x7a0] ss:$40 sps:$4 sm:$0xff]  }
 0x573   :  { %v14811_v16 = vld [vmem:[#allocation8 + $0xa20] ss:$40 sps:$4 sm:$0xff]  }
 0x574   :  { %10101 = vmatpush1.bf16.msra.mxu1 %v14710_v24  ;;  %v14773_v24 = vld [vmem:[#allocation8 + $0x18c8] ss:$40 sps:$4 sm:$0xff]  }
 0x575   :  { %10042 = vmatpush1.bf16.msra.mxu0 %v14713_v25  ;;  %10102 = vmatprep.subr.bf16.mxu1 %v14718_v13  ;;  %v14778_v25 = vld [vmem:[#allocation8 + $0x7f4] ss:$40 sps:$4 sm:$0xff]   ;;  %v14779_v13 = vld [vmem:[#allocation11 + $0x40] sm:$0xff]  }
 0x576   :  { %10043 = vmatprep.subr.bf16.mxu0 %v14721_v39  ;;  %v10278_v39 = vmax.f32 %v12732_v23, 0.0  ;;  %v14820_v23 = vld [vmem:[#allocation11 + $0x80] sm:$0xff]  }
 0x578   :  { %10103 = vmatpush1.bf16.msra.mxu1 %v14716_v48  ;;  %v14776_v48 = vld [vmem:[#allocation8 + $0x7f0] ss:$40 sps:$4 sm:$0xff]  }
 0x579   :  { %10044 = vmatpush1.bf16.msra.mxu0 %v14719_v45  ;;  %10113 = vmatprep.subr.bf16.mxu1 %v14724_v32  ;;  %v14780_v45 = vld [vmem:[#allocation11] sm:$0xff]  }
 0x57a   :  { %10045 = vmatprep.subr.bf16.mxu0 %v14727_v35  ;;  %v14783_v32 = vld [vmem:[#allocation8 + $0x844] ss:$40 sps:$4 sm:$0xff]   ;;  %v14784_v35 = vld [vmem:[#allocation11 + $0x48] sm:$0xff]  }
 0x57b   :  { %10105 = vmatmul.mubr.bf16.vlgmr.msra.gmra.mrb[16].mxu1 %v15430_v29  ;;  %v14740_v29 = vld [vmem:[#allocation8 + $0x610] ss:$40 sps:$4 sm:$0xff]  }
 0x57c   :  { %10114 = vmatpush1.bf16.msra.mxu1 %v14722_v33  ;;  %10145 = vmatprep.mubr.bf16.mxu1 %v15432_v31  ;;  %v14743_v31 = vld [vmem:[#allocation8 + $0x1738] ss:$40 sps:$4 sm:$0xff]   ;;  %v10288_v33 = vpack.c.bf16 %v10278_v39, %v10278_v39 }
 0x57d   :  { %10046 = vmatpush1.bf16.msra.mxu0 %v14725_v36  ;;  %10115 = vmatprep.subr.bf16.mxu1 %v14730_v37  ;;  %v14785_v36 = vld [vmem:[#allocation11 + $0x8] sm:$0xff]  }
 0x57e   :  { %10047 = vmatprep.subr.bf16.mxu0 %v14733_v5  ;;  %v14788_v37 = vld [vmem:[#allocation8 + $0x894] ss:$40 sps:$4 sm:$0xff]  }
 0x57f   :  { %v14789_v5 = vld [vmem:[#allocation11 + $0x50] sm:$0xff]   ;;  %v14825_v39 = vld [vmem:[#allocation11 + $0x88] sm:$0xff]  }
 0x580   :  { %10116 = vmatpush1.bf16.msra.mxu1 %v14728_v42  ;;  %v14786_v42 = vld [vmem:[#allocation8 + $0x890] ss:$40 sps:$4 sm:$0xff]  }
 0x581   :  { %10048 = vmatpush1.bf16.msra.mxu0 %v14731_v47  ;;  %10117 = vmatprep.subr.bf16.mxu1 %v14736_v30  ;;  %v14790_v47 = vld [vmem:[#allocation11 + $0x10] sm:$0xff]   ;;  %v14793_v30 = vld [vmem:[#allocation8 + $0x8e4] ss:$40 sps:$4 sm:$0xff]  }
 0x582   :  { %10049 = vmatprep.subr.bf16.mxu0 %v14739_v52  ;;  %v14794_v52 = vld [vmem:[#allocation11 + $0x58] sm:$0xff]  }
 0x584   :  { %10118 = vmatpush1.bf16.msra.mxu1 %v14734_v53  ;;  %v14791_v53 = vld [vmem:[#allocation8 + $0x8e0] ss:$40 sps:$4 sm:$0xff]  }
 0x585   :  { %10050 = vmatpush1.bf16.msra.mxu0 %v14737_v46  ;;  %10119 = vmatprep.subr.bf16.mxu1 %v14742_v55  ;;  %v14795_v46 = vld [vmem:[#allocation11 + $0x18] sm:$0xff]   ;;  %v14798_v55 = vld [vmem:[#allocation8 + $0x934] ss:$40 sps:$4 sm:$0xff]  }
 0x586   :  { %10051 = vmatprep.subr.bf16.mxu0 %v14745_v56  ;;  %v14799_v56 = vld [vmem:[#allocation11 + $0x60] sm:$0xff]  }
 0x588   :  { %10120 = vmatpush1.bf16.msra.mxu1 %v14740_v29  ;;  %v14796_v29 = vld [vmem:[#allocation8 + $0x930] ss:$40 sps:$4 sm:$0xff]  }
 0x589   :  { %10052 = vmatpush1.bf16.msra.mxu0 %v14743_v31  ;;  %10121 = vmatprep.subr.bf16.mxu1 %v14748_v57  ;;  %v14800_v31 = vld [vmem:[#allocation11 + $0x20] sm:$0xff]  }
 0x58a   :  { %10053 = vmatprep.subr.bf16.mxu0 %v14751_v58  ;;  %v14803_v57 = vld [vmem:[#allocation8 + $0x984] ss:$40 sps:$4 sm:$0xff]   ;;  %v14804_v58 = vld [vmem:[#allocation11 + $0x68] sm:$0xff]  }
 0x58c   :  { %10122 = vmatpush1.bf16.msra.mxu1 %v14746_v61  ;;  %v14801_v61 = vld [vmem:[#allocation8 + $0x980] ss:$40 sps:$4 sm:$0xff]  }
 0x58d   :  { %10054 = vmatpush1.bf16.msra.mxu0 %v14749_v62  ;;  %10123 = vmatprep.subr.bf16.mxu1 %v14754_v63  ;;  %v14805_v62 = vld [vmem:[#allocation11 + $0x28] sm:$0xff]  }
 0x58e   :  { %10055 = vmatprep.subr.bf16.mxu0 %v14757_v10  ;;  %v14808_v63 = vld [vmem:[#allocation8 + $0x9d4] ss:$40 sps:$4 sm:$0xff]   ;;  %v5205_v10 = vrot.slane %v15530_v6, %v15420_v2 }
 0x590   :  { %10124 = vmatpush1.bf16.msra.mxu1 %v14752_v0  ;;  %v14809_v0 = vld [vmem:[#allocation11 + $0x70] sm:$0xff]  }
 0x591   :  { %10056 = vmatpush1.bf16.msra.mxu0 %v14755_v21  ;;  %10125 = vmatprep.subr.bf16.mxu1 %v14760_v1  ;;  %v5217_v21 = vrot.slane %v15530_v6, %v697_v4  ;;  %v14806_v1 = vld [vmem:[#allocation8 + $0x9d0] ss:$40 sps:$4 sm:$0xff]  }
 0x592   :  { %10057 = vmatprep.subr.bf16.mxu0 %v14763_v3  ;;  %v14810_v3 = vld [vmem:[#allocation11 + $0x30] sm:$0xff]   ;;  %v14819_v4 = vld [vmem:[#allocation11 + $0xc0] sm:$0xff]  }
 0x594   :  { %10126 = vmatpush1.bf16.msra.mxu1 %v14758_v7  ;;  %v14813_v7 = vld [vmem:[#allocation8 + $0xa24] ss:$40 sps:$4 sm:$0xff]  }
 0x595   :  { %10058 = vmatpush1.bf16.msra.mxu0 %v14761_v12  ;;  %10127 = vmatprep.subr.bf16.mxu1 %v14766_v26  ;;  %v12731_v12 = vadd.f32 %v15510_v28, %v5205_v10  ;;  %v14814_v26 = vld [vmem:[#allocation11 + $0x78] sm:$0xff]   ;;  %v14816_v28 = vld [vmem:[#allocation8 + $0xa70] ss:$40 sps:$4 sm:$0xff]   ;;  %v14858_v10 = vld [vmem:[#allocation8 + $0xcf4] ss:$40 sps:$4 sm:$0xff]  }
 0x596   :  { %10059 = vmatprep.subr.bf16.mxu0 %v14769_v14  ;;  %v12734_v14 = vadd.f32 %v15522_v60, %v5217_v21  ;;  %v14856_v21 = vld [vmem:[#allocation8 + $0xcf0] ss:$40 sps:$4 sm:$0xff]  }
 0x598   :  { %10128 = vmatpush1.bf16.msra.mxu1 %v14764_v17  ;;  %v14815_v17 = vld [vmem:[#allocation11 + $0x38] sm:$0xff]  }
 0x599   :  { %10060 = vmatpush1.bf16.msra.mxu0 %v14767_v18  ;;  %10129 = vmatprep.subr.bf16.mxu1 %v14772_v20  ;;  %v14818_v18 = vld [vmem:[#allocation8 + $0xa74] ss:$40 sps:$4 sm:$0xff]   ;;  %v10277_v20 = vmax.f32 %v12731_v12, 0.0  ;;  %v14859_v12 = vld [vmem:[#allocation8 + $0xd40] ss:$40 sps:$4 sm:$0xff]  }
 0x59a   :  { %10061 = vmatprep.subr.bf16.mxu0 %v14775_v22  ;;  %v10280_v22 = vmax.f32 %v12734_v14, 0.0  ;;  %v14883_v14 = vld [vmem:[#allocation11 + $0x108] sm:$0xff]  }
 0x59b   :  { %v10287_v60 = vpack.c.bf16 %v10277_v20, %v10277_v20  ;;  %v14888_v20 = vld [vmem:[#allocation11 + $0x110] sm:$0xff]  }
 0x59c   :  { %10130 = vmatpush1.bf16.msra.mxu1 %v14770_v8  ;;  %v14823_v8 = vld [vmem:[#allocation8 + $0xac4] ss:$40 sps:$4 sm:$0xff]  }
 0x59d   :  { %10062 = vmatpush1.bf16.msra.mxu0 %v14773_v24  ;;  %10131 = vmatprep.subr.bf16.mxu1 %v14778_v25  ;;  %v14824_v24 = vld [vmem:[#allocation11 + $0xc8] sm:$0xff]   ;;  %v10290_v25 = vpack.c.bf16 %v10280_v22, %v10280_v22  ;;  %v14865_v22 = vld [vmem:[#allocation8 + $0xde0] ss:$40 sps:$4 sm:$0xff]  }
 0x59e   :  { %12611 = vmatprep.subr.bf16.mxu0 %v14779_v13  ;;  %v14821_v13 = vld [vmem:[#allocation8 + $0xac0] ss:$40 sps:$4 sm:$0xff]  }
 0x5a0   :  { %10064 = vmatmul.mubr.bf16.vlgmr.msra.gmra.mrb[16].mxu0 %v15493_v51  ;;  %10132 = vmatpush1.bf16.msra.mxu1 %v14776_v48  ;;  %v14828_v48 = vld [vmem:[#allocation8 + $0xb14] ss:$40 sps:$4 sm:$0xff]  }
 0x5a1   :  { %12612 = vmatpush3.bf16.msra.mxu0 %v14780_v45  ;;  %10976 = vmatprep.mubr.bf16.mxu0 %v10288_v33  ;;  %v14830_v45 = vld [vmem:[#allocation11 + $0x90] sm:$0xff]  }
 0x5a2   :  { %10133 = vmatprep.subr.bf16.mxu1 %v14783_v32  ;;  %12613 = vmatprep.subr.bf16.mxu0 %v14784_v35  ;;  %v14833_v32 = vld [vmem:[#allocation8 + $0xb64] ss:$40 sps:$4 sm:$0xff]   ;;  %v14831_v33 = vld [vmem:[#allocation8 + $0xb60] ss:$40 sps:$4 sm:$0xff]  }
 0x5a3   :  { %v14834_v35 = vld [vmem:[#allocation11 + $0xd8] sm:$0xff]  }
 0x5a4   :  { %10134 = vmatpush1.bf16.msra.mxu1 %v14781_v50  ;;  %v14835_v50 = vld [vmem:[#allocation11 + $0x98] sm:$0xff]  }
 0x5a5   :  { %12614 = vmatpush3.bf16.msra.mxu0 %v14785_v36  ;;  %10135 = vmatprep.subr.bf16.mxu1 %v14788_v37  ;;  %v14838_v36 = vld [vmem:[#allocation8 + $0xbb4] ss:$40 sps:$4 sm:$0xff]   ;;  %v14839_v37 = vld [vmem:[#allocation11 + $0xe0] sm:$0xff]  }
 0x5a6   :  { %12615 = vmatprep.subr.bf16.mxu0 %v14789_v5  ;;  %v14836_v5 = vld [vmem:[#allocation8 + $0xbb0] ss:$40 sps:$4 sm:$0xff]  }
 0x5a8   :  { %10136 = vmatpush1.bf16.msra.mxu1 %v14786_v42  ;;  %v14840_v42 = vld [vmem:[#allocation11 + $0xa0] sm:$0xff]  }
 0x5a9   :  { %12616 = vmatpush3.bf16.msra.mxu0 %v14790_v47  ;;  %10137 = vmatprep.subr.bf16.mxu1 %v14793_v30  ;;  %v14843_v47 = vld [vmem:[#allocation8 + $0xc04] ss:$40 sps:$4 sm:$0xff]   ;;  %v14844_v30 = vld [vmem:[#allocation11 + $0xe8] sm:$0xff]  }
 0x5aa   :  { %12617 = vmatprep.subr.bf16.mxu0 %v14794_v52  ;;  %v14841_v52 = vld [vmem:[#allocation8 + $0xc00] ss:$40 sps:$4 sm:$0xff]  }
 0x5ac   :  { %10138 = vmatpush1.bf16.msra.mxu1 %v14791_v53  ;;  %v14845_v53 = vld [vmem:[#allocation11 + $0xa8] sm:$0xff]  }
 0x5ad   :  { %12618 = vmatpush3.bf16.msra.mxu0 %v14795_v46  ;;  %10139 = vmatprep.subr.bf16.mxu1 %v14798_v55  ;;  %v14848_v46 = vld [vmem:[#allocation8 + $0xc54] ss:$40 sps:$4 sm:$0xff]   ;;  %v5213_v55 = vrot.slane %v15530_v6, %v693_v27  ;;  %v14877_v27 = vld [vmem:[#allocation11 + $0x140] sm:$0xff]  }
 0x5ae   :  { %12619 = vmatprep.subr.bf16.mxu0 %v14799_v56  ;;  %v14849_v56 = vld [vmem:[#allocation11 + $0xf0] sm:$0xff]  }
 0x5b0   :  { %10140 = vmatpush1.bf16.msra.mxu1 %v14796_v29  ;;  %v14846_v29 = vld [vmem:[#allocation8 + $0xc50] ss:$40 sps:$4 sm:$0xff]  }
 0x5b1   :  { %12620 = vmatpush3.bf16.msra.mxu0 %v14800_v31  ;;  %10141 = vmatprep.subr.bf16.mxu1 %v14803_v57  ;;  %v14850_v31 = vld [vmem:[#allocation11 + $0xb0] sm:$0xff]   ;;  %v14853_v57 = vld [vmem:[#allocation8 + $0xca4] ss:$40 sps:$4 sm:$0xff]  }
 0x5b2   :  { %12621 = vmatprep.subr.bf16.mxu0 %v14804_v58  ;;  %v12733_v58 = vadd.f32 %v15520_v59, %v5213_v55  ;;  %v14882_v59 = vld [vmem:[#allocation11 + $0x148] sm:$0xff]   ;;  %v14899_v55 = vld [vmem:[#allocation8 + $0x1060] ss:$40 sps:$4 sm:$0xff]  }
 0x5b4   :  { %10142 = vmatpush1.bf16.msra.mxu1 %v14801_v61  ;;  %v14854_v61 = vld [vmem:[#allocation11 + $0xf8] sm:$0xff]  }
 0x5b5   :  { %12622 = vmatpush3.bf16.msra.mxu0 %v14805_v62  ;;  %10143 = vmatprep.subr.bf16.mxu1 %v14808_v63  ;;  %v14851_v62 = vld [vmem:[#allocation8 + $0xca0] ss:$40 sps:$4 sm:$0xff]  }
 0x5b6   :  { %12623 = vmatprep.subr.bf16.mxu0 %v14809_v0  ;;  %v14855_v63 = vld [vmem:[#allocation11 + $0xb8] sm:$0xff]   ;;  %v10279_v0 = vmax.f32 %v12733_v58, 0.0 }
 0x5b8   :  { %10144 = vmatpush1.bf16.msra.mxu1 %v14806_v1  ;;  %v14861_v1 = vld [vmem:[#allocation8 + $0xd44] ss:$40 sps:$4 sm:$0xff]  }
 0x5b9   :  { %12624 = vmatpush3.bf16.msra.mxu0 %v14810_v3  ;;  %10154 = vmatprep.subr.bf16.mxu1 %v14813_v7  ;;  %v14878_v3 = vld [vmem:[#allocation11 + $0x100] sm:$0xff]   ;;  %v10289_v7 = vpack.c.bf16 %v10279_v0, %v10279_v0 }
 0x5ba   :  { %12625 = vmatprep.subr.bf16.mxu0 %v14814_v26  ;;  %v14864_v26 = vld [vmem:[#allocation8 + $0xd94] ss:$40 sps:$4 sm:$0xff]  }
 0x5bb   :  { %10146 = vmatmul.mubr.bf16.vlgmr.msra.gmra.mrb[16].mxu1 %v15445_v54  ;;  %v14829_v54 = vld [vmem:[#allocation11 + $0xd0] sm:$0xff]  }
 0x5bc   :  { %10155 = vmatpush1.bf16.msra.mxu1 %v14811_v16  ;;  %10186 = vmatprep.mubr.bf16.mxu1 %v15466_v41  ;;  %v14826_v41 = vld [vmem:[#allocation8 + $0xb10] ss:$40 sps:$4 sm:$0xff]  }
 0x5bd   :  { %12626 = vmatpush3.bf16.msra.mxu0 %v14815_v17  ;;  %10156 = vmatprep.subr.bf16.mxu1 %v14818_v18  ;;  %v14887_v16 = vld [vmem:[#allocation11 + $0x150] sm:$0xff]   ;;  %v14867_v18 = vld [vmem:[#allocation8 + $0xde4] ss:$40 sps:$4 sm:$0xff]  }
 0x5be   :  { %12633 = vmatprep.subr.bf16.mxu0 %v14819_v4  ;;  %v14862_v17 = vld [vmem:[#allocation8 + $0xd90] ss:$40 sps:$4 sm:$0xff]   ;;  %v14892_v4 = vld [vmem:[#allocation11 + $0x158] sm:$0xff]  }
 0x5c0   :  { %10157 = vmatpush1.bf16.msra.mxu1 %v14816_v28  ;;  %10977 = vmatmul.mubr.bf16.vlgmr.msra.gmra.mrb[20].mxu0 %v10287_v60  ;;  %v14870_v28 = vld [vmem:[#allocation8 + $0xe34] ss:$40 sps:$4 sm:$0xff]   ;;  %v14897_v60 = vld [vmem:[#allocation11 + $0x160] sm:$0xff]  }
 0x5c1   :  { %12634 = vmatpush3.bf16.msra.mxu0 %v14820_v23  ;;  %11016 = vmatprep.mubr.bf16.mxu0 %v10290_v25  ;;  %v14893_v23 = vld [vmem:[#allocation11 + $0x118] sm:$0xff]   ;;  %v14898_v25 = vld [vmem:[#allocation11 + $0x120] sm:$0xff]  }
 0x5c2   :  { %10158 = vmatprep.subr.bf16.mxu1 %v14823_v8  ;;  %12635 = vmatprep.subr.bf16.mxu0 %v14824_v24  ;;  %v14868_v8 = vld [vmem:[#allocation8 + $0xe30] ss:$40 sps:$4 sm:$0xff]   ;;  %v14873_v24 = vld [vmem:[#allocation8 + $0xe84] ss:$40 sps:$4 sm:$0xff]  }
 0x5c4   :  { %10159 = vmatpush1.bf16.msra.mxu1 %v14821_v13  ;;  %v14902_v13 = vld [vmem:[#allocation11 + $0x168] sm:$0xff]  }
 0x5c5   :  { %12636 = vmatpush3.bf16.msra.mxu0 %v14825_v39  ;;  %10160 = vmatprep.subr.bf16.mxu1 %v14828_v48  ;;  %v14871_v39 = vld [vmem:[#allocation8 + $0xe80] ss:$40 sps:$4 sm:$0xff]   ;;  %v14876_v48 = vld [vmem:[#allocation8 + $0xed4] ss:$40 sps:$4 sm:$0xff]  }
 0x5c6   :  { %12637 = vmatprep.subr.bf16.mxu0 %v14829_v54  ;;  %v14903_v54 = vld [vmem:[#allocation11 + $0x128] sm:$0xff]  }
 0x5c8   :  { %10161 = vmatpush1.bf16.msra.mxu1 %v14826_v41  ;;  %v14907_v41 = vld [vmem:[#allocation11 + $0x170] sm:$0xff]  }
 0x5c9   :  { %12638 = vmatpush3.bf16.msra.mxu0 %v14830_v45  ;;  %10162 = vmatprep.subr.bf16.mxu1 %v14833_v32  ;;  %v14874_v45 = vld [vmem:[#allocation8 + $0xed0] ss:$40 sps:$4 sm:$0xff]   ;;  %v14881_v32 = vld [vmem:[#allocation8 + $0xf24] ss:$40 sps:$4 sm:$0xff]  }
 0x5ca   :  { %12639 = vmatprep.subr.bf16.mxu0 %v14834_v35  ;;  %v14908_v35 = vld [vmem:[#allocation11 + $0x130] sm:$0xff]  }
 0x5cc   :  { %10163 = vmatpush1.bf16.msra.mxu1 %v14831_v33  ;;  %v14912_v33 = vld [vmem:[#allocation11 + $0x178] sm:$0xff]  }
 0x5cd   :  { %12640 = vmatpush3.bf16.msra.mxu0 %v14835_v50  ;;  %10164 = vmatprep.subr.bf16.mxu1 %v14838_v36  ;;  %v14879_v50 = vld [vmem:[#allocation8 + $0xf20] ss:$40 sps:$4 sm:$0xff]   ;;  %v14886_v36 = vld [vmem:[#allocation8 + $0xf74] ss:$40 sps:$4 sm:$0xff]  }
 0x5ce   :  { %12641 = vmatprep.subr.bf16.mxu0 %v14839_v37  ;;  %v14913_v37 = vld [vmem:[#allocation11 + $0x138] sm:$0xff]  }
 0x5d0   :  { %10165 = vmatpush1.bf16.msra.mxu1 %v14836_v5  ;;  %v14968_v5 = vld [vmem:[#allocation11 + $0x1c0] sm:$0xff]  }
 0x5d1   :  { %12642 = vmatpush3.bf16.msra.mxu0 %v14840_v42  ;;  %10166 = vmatprep.subr.bf16.mxu1 %v14843_v47  ;;  %v14884_v42 = vld [vmem:[#allocation8 + $0xf70] ss:$40 sps:$4 sm:$0xff]   ;;  %v14891_v47 = vld [vmem:[#allocation8 + $0xfc4] ss:$40 sps:$4 sm:$0xff]  }
 0x5d2   :  { %12643 = vmatprep.subr.bf16.mxu0 %v14844_v30  ;;  %v14889_v30 = vld [vmem:[#allocation8 + $0xfc0] ss:$40 sps:$4 sm:$0xff]  }
 0x5d4   :  { %10167 = vmatpush1.bf16.msra.mxu1 %v14841_v52  ;;  %v14896_v52 = vld [vmem:[#allocation8 + $0x1014] ss:$40 sps:$4 sm:$0xff]  }
 0x5d5   :  { %12644 = vmatpush3.bf16.msra.mxu0 %v14845_v53  ;;  %10168 = vmatprep.subr.bf16.mxu1 %v14848_v46  ;;  %v14894_v53 = vld [vmem:[#allocation8 + $0x1010] ss:$40 sps:$4 sm:$0xff]   ;;  %v14901_v46 = vld [vmem:[#allocation8 + $0x1064] ss:$40 sps:$4 sm:$0xff]  }
 0x5d6   :  { %12645 = vmatprep.subr.bf16.mxu0 %v14849_v56  ;;  %v5225_v56 = vrot.slane %v15530_v6, %v705_v19 }
 0x5d8   :  { %10169 = vmatpush1.bf16.msra.mxu1 %v14846_v29  ;;  %v14904_v29 = vld [vmem:[#allocation8 + $0x10b0] ss:$40 sps:$4 sm:$0xff]  }
 0x5d9   :  { %12646 = vmatpush3.bf16.msra.mxu0 %v14850_v31  ;;  %10170 = vmatprep.subr.bf16.mxu1 %v14853_v57  ;;  %v14911_v31 = vld [vmem:[#allocation8 + $0x1104] ss:$40 sps:$4 sm:$0xff]  }
 0x5da   :  { %12647 = vmatprep.subr.bf16.mxu0 %v14854_v61 }
 0x5dc   :  { %10171 = vmatpush1.bf16.msra.mxu1 %v14851_v62 }
 0x5dd   :  { %12648 = vmatpush3.bf16.msra.mxu0 %v14855_v63  ;;  %10172 = vmatprep.subr.bf16.mxu1 %v14858_v10  ;;  %v14909_v10 = vld [vmem:[#allocation8 + $0x1100] ss:$40 sps:$4 sm:$0xff]  }
 0x5de   :  { %12655 = vmatprep.subr.bf16.mxu0 %v14877_v27 }
 0x5e0   :  { %10173 = vmatpush1.bf16.msra.mxu1 %v14856_v21  ;;  %11017 = vmatmul.mubr.bf16.vlgmr.msra.gmra.mrb[24].mxu0 %v10289_v7  ;;  %v14916_v21 = vld [vmem:[#allocation8 + $0x1154] ss:$40 sps:$4 sm:$0xff]   ;;  %v14969_v7 = vld [vmem:[#allocation11 + $0x180] sm:$0xff]  }
 0x5e1   :  { %10174 = vmatprep.subr.bf16.mxu1 %v14861_v1  ;;  %12656 = vmatpush3.bf16.msra.mxu0 %v14878_v3  ;;  %v14914_v3 = vld [vmem:[#allocation8 + $0x1150] ss:$40 sps:$4 sm:$0xff]  }
 0x5e2   :  { %12657 = vmatprep.subr.bf16.mxu0 %v14882_v59  ;;  %v14919_v59 = vld [vmem:[#allocation8 + $0x11a4] ss:$40 sps:$4 sm:$0xff]  }
 0x5e4   :  { %10175 = vmatpush1.bf16.msra.mxu1 %v14859_v12  ;;  %v14973_v12 = vld [vmem:[#allocation11 + $0x1c8] sm:$0xff]  }
 0x5e5   :  { %10176 = vmatprep.subr.bf16.mxu1 %v14864_v26  ;;  %12658 = vmatpush3.bf16.msra.mxu0 %v14883_v14  ;;  %v14917_v26 = vld [vmem:[#allocation8 + $0x11a0] ss:$40 sps:$4 sm:$0xff]   ;;  %v14974_v14 = vld [vmem:[#allocation11 + $0x188] sm:$0xff]  }
 0x5e6   :  { %12659 = vmatprep.subr.bf16.mxu0 %v14887_v16  ;;  %v14922_v16 = vld [vmem:[#allocation8 + $0x11f4] ss:$40 sps:$4 sm:$0xff]  }
 0x5e8   :  { %10177 = vmatpush1.bf16.msra.mxu1 %v14862_v17  ;;  %v14978_v17 = vld [vmem:[#allocation11 + $0x1d0] sm:$0xff]  }
 0x5e9   :  { %10178 = vmatprep.subr.bf16.mxu1 %v14867_v18  ;;  %12660 = vmatpush3.bf16.msra.mxu0 %v14888_v20  ;;  %v14920_v18 = vld [vmem:[#allocation8 + $0x11f0] ss:$40 sps:$4 sm:$0xff]  }
 0x5ea   :  { %12661 = vmatprep.subr.bf16.mxu0 %v14892_v4  ;;  %v14979_v20 = vld [vmem:[#allocation11 + $0x190] sm:$0xff]   ;;  %v14925_v4 = vld [vmem:[#allocation8 + $0x1244] ss:$40 sps:$4 sm:$0xff]  }
 0x5ec   :  { %10179 = vmatpush1.bf16.msra.mxu1 %v14865_v22  ;;  %v14983_v22 = vld [vmem:[#allocation11 + $0x1d8] sm:$0xff]  }
 0x5ed   :  { %10180 = vmatprep.subr.bf16.mxu1 %v14870_v28  ;;  %12662 = vmatpush3.bf16.msra.mxu0 %v14893_v23  ;;  %v14923_v28 = vld [vmem:[#allocation8 + $0x1240] ss:$40 sps:$4 sm:$0xff]  }
 0x5ee   :  { %12663 = vmatprep.subr.bf16.mxu0 %v14897_v60  ;;  %v14984_v23 = vld [vmem:[#allocation11 + $0x198] sm:$0xff]   ;;  %v14928_v60 = vld [vmem:[#allocation8 + $0x1294] ss:$40 sps:$4 sm:$0xff]  }
 0x5f0   :  { %10181 = vmatpush1.bf16.msra.mxu1 %v14868_v8  ;;  %v14988_v8 = vld [vmem:[#allocation11 + $0x1e0] sm:$0xff]  }
 0x5f1   :  { %10182 = vmatprep.subr.bf16.mxu1 %v14873_v24  ;;  %12664 = vmatpush3.bf16.msra.mxu0 %v14898_v25  ;;  %v14926_v24 = vld [vmem:[#allocation8 + $0x1290] ss:$40 sps:$4 sm:$0xff]  }
 0x5f2   :  { %12665 = vmatprep.subr.bf16.mxu0 %v14902_v13  ;;  %v14989_v25 = vld [vmem:[#allocation11 + $0x1a0] sm:$0xff]  }
 0x5f3   :  { %v14931_v13 = vld [vmem:[#allocation8 + $0x12e4] ss:$40 sps:$4 sm:$0xff]  }
 0x5f4   :  { %10183 = vmatpush1.bf16.msra.mxu1 %v14871_v39  ;;  %v14993_v39 = vld [vmem:[#allocation11 + $0x1e8] sm:$0xff]  }
 0x5f5   :  { %10184 = vmatprep.subr.bf16.mxu1 %v14876_v48  ;;  %12666 = vmatpush3.bf16.msra.mxu0 %v14903_v54  ;;  %v14929_v48 = vld [vmem:[#allocation8 + $0x12e0] ss:$40 sps:$4 sm:$0xff]   ;;  %v14994_v54 = vld [vmem:[#allocation11 + $0x1a8] sm:$0xff]  }
 0x5f6   :  { %12667 = vmatprep.subr.bf16.mxu0 %v14907_v41  ;;  %v14934_v41 = vld [vmem:[#allocation8 + $0x1334] ss:$40 sps:$4 sm:$0xff]  }
 0x5f8   :  { %10185 = vmatpush1.bf16.msra.mxu1 %v14874_v45  ;;  %v14998_v45 = vld [vmem:[#allocation11 + $0x1f0] sm:$0xff]  }
 0x5f9   :  { %10195 = vmatprep.subr.bf16.mxu1 %v14881_v32  ;;  %12668 = vmatpush3.bf16.msra.mxu0 %v14908_v35  ;;  %v14932_v32 = vld [vmem:[#allocation8 + $0x1330] ss:$40 sps:$4 sm:$0xff]  }
 0x5fa   :  { %12669 = vmatprep.subr.bf16.mxu0 %v14912_v33  ;;  %v14999_v35 = vld [vmem:[#allocation11 + $0x1b0] sm:$0xff]   ;;  %v14937_v33 = vld [vmem:[#allocation8 + $0x1384] ss:$40 sps:$4 sm:$0xff]  }
 0x5fb   :  { %10187 = vmatmul.mubr.bf16.vlgmr.msra.gmra.mrb[16].mxu1 %v15468_v43  ;;  %v14906_v43 = vld [vmem:[#allocation8 + $0x10b4] ss:$40 sps:$4 sm:$0xff]  }
 0x5fc   :  { %10196 = vmatpush1.bf16.msra.mxu1 %v14879_v50  ;;  %10227 = vmatprep.mubr.bf16.mxu1 %v15471_v49  ;;  %v5221_v49 = vrot.slane %v15530_v6, %v701_v9  ;;  %v15003_v50 = vld [vmem:[#allocation11 + $0x1f8] sm:$0xff]  }
 0x5fd   :  { %10197 = vmatprep.subr.bf16.mxu1 %v14886_v36  ;;  %12670 = vmatpush3.bf16.msra.mxu0 %v14913_v37  ;;  %v14935_v36 = vld [vmem:[#allocation8 + $0x1380] ss:$40 sps:$4 sm:$0xff]  }
 0x5fe   :  { %12677 = vmatprep.subr.bf16.mxu0 %v14968_v5  ;;  %v15004_v37 = vld [vmem:[#allocation11 + $0x1b8] sm:$0xff]   ;;  %v14940_v5 = vld [vmem:[#allocation8 + $0x13d4] ss:$40 sps:$4 sm:$0xff]  }
 0x600   :  { %10198 = vmatpush1.bf16.msra.mxu1 %v14884_v42  ;;  %v14938_v42 = vld [vmem:[#allocation8 + $0x13d0] ss:$40 sps:$4 sm:$0xff]  }
 0x601   :  { %10199 = vmatprep.subr.bf16.mxu1 %v14891_v47  ;;  %v14943_v47 = vld [vmem:[#allocation8 + $0x1424] ss:$40 sps:$4 sm:$0xff]  }
 0x604   :  { %10200 = vmatpush1.bf16.msra.mxu1 %v14889_v30  ;;  %v14941_v30 = vld [vmem:[#allocation8 + $0x1420] ss:$40 sps:$4 sm:$0xff]  }
 0x605   :  { %10201 = vmatprep.subr.bf16.mxu1 %v14896_v52  ;;  %v14946_v52 = vld [vmem:[#allocation8 + $0x1474] ss:$40 sps:$4 sm:$0xff]  }
 0x608   :  { %10202 = vmatpush1.bf16.msra.mxu1 %v14894_v53  ;;  %v14944_v53 = vld [vmem:[#allocation8 + $0x1470] ss:$40 sps:$4 sm:$0xff]  }
 0x609   :  { %10203 = vmatprep.subr.bf16.mxu1 %v14901_v46  ;;  %v14949_v46 = vld [vmem:[#allocation8 + $0x14c4] ss:$40 sps:$4 sm:$0xff]  }
 0x60c   :  { %10204 = vmatpush1.bf16.msra.mxu1 %v14899_v55  ;;  %v14947_v55 = vld [vmem:[#allocation8 + $0x14c0] ss:$40 sps:$4 sm:$0xff]  }
 0x60d   :  { %10205 = vmatprep.subr.bf16.mxu1 %v14906_v43  ;;  %v14952_v43 = vld [vmem:[#allocation8 + $0x1514] ss:$40 sps:$4 sm:$0xff]  }
 0x60e   :  { %v9860_v57 = vpop.f32.mrb[12].mxu1 }
 0x60f   :  { %v12735_v58 = vadd.f32 %v9860_v57, %v5221_v49  ;;  %v9862_v61 = vpop.f32.mrb[13].mxu1  ;;  %v14950_v49 = vld [vmem:[#allocation8 + $0x1510] ss:$40 sps:$4 sm:$0xff]   ;;  %v14961_v57 = vld [vmem:[#allocation8 + $0x1604] ss:$40 sps:$4 sm:$0xff]  }
 0x610   :  { %v12736_v62 = vadd.f32 %v9862_v61, %v5225_v56  ;;  %v9864_v63 = vpop.f32.mrb[14].mxu1  ;;  %10206 = vmatpush1.bf16.msra.mxu1 %v14904_v29  ;;  %v14955_v56 = vld [vmem:[#allocation8 + $0x1564] ss:$40 sps:$4 sm:$0xff]   ;;  %v14953_v29 = vld [vmem:[#allocation8 + $0x1560] ss:$40 sps:$4 sm:$0xff]  }
 0x611   :  { %v10281_v0 = vmax.f32 %v12735_v58, 0.0  ;;  %v9865_v27 = vpop.f32.mrb[15].mxu1  ;;  %10207 = vmatprep.subr.bf16.mxu1 %v14911_v31  ;;  %v14958_v31 = vld [vmem:[#allocation8 + $0x15b4] ss:$40 sps:$4 sm:$0xff]   ;;  %v14962_v61 = vld [vmem:[#allocation8 + $0x1650] ss:$40 sps:$4 sm:$0xff]  }
 0x612   :  { %v10282_v9 = vmax.f32 %v12736_v62, 0.0  ;;  %v14964_v58 = vld [vmem:[#allocation8 + $0x1654] ss:$40 sps:$4 sm:$0xff]   ;;  %v14967_v62 = vld [vmem:[#allocation8 + $0x16a4] ss:$40 sps:$4 sm:$0xff]  }
 0x613   :  { %v10291_v19 = vpack.c.bf16 %v10281_v0, %v10281_v0  ;;  %v14965_v63 = vld [vmem:[#allocation8 + $0x16a0] ss:$40 sps:$4 sm:$0xff]   ;;  %v14970_v0 = vld [vmem:[#allocation8 + $0x16f0] ss:$40 sps:$4 sm:$0xff]   ;;  %v14977_v27 = vld [vmem:[#allocation8 + $0x1744] ss:$40 sps:$4 sm:$0xff]  }
 0x614   :  { %v10292_v1 = vpack.c.bf16 %v10282_v9, %v10282_v9  ;;  %10208 = vmatpush1.bf16.msra.mxu1 %v14909_v10  ;;  %v14972_v10 = vld [vmem:[#allocation8 + $0x16f4] ss:$40 sps:$4 sm:$0xff]  }
 0x615   :  { %10209 = vmatprep.subr.bf16.mxu1 %v14916_v21  ;;  %v14975_v21 = vld [vmem:[#allocation8 + $0x1740] ss:$40 sps:$4 sm:$0xff]   ;;  %v14982_v9 = vld [vmem:[#allocation8 + $0x1794] ss:$40 sps:$4 sm:$0xff]  }
 0x616   :  { %11056 = vmatprep.mubr.bf16.mxu0 %v10292_v1  ;;  %v14980_v1 = vld [vmem:[#allocation8 + $0x1790] ss:$40 sps:$4 sm:$0xff]  }
 0x617   :  { %11057 = vmatmul.mubr.bf16.vlgmr.msra.gmra.mrb[28].mxu0 %v10291_v19  ;;  %v14992_v19 = vld [vmem:[#allocation8 + $0x1834] ss:$40 sps:$4 sm:$0xff]  }
 0x618   :  { %10210 = vmatpush1.bf16.msra.mxu1 %v14914_v3  ;;  %12678 = vmatpush3.bf16.msra.mxu0 %v14969_v7  ;;  %v14987_v3 = vld [vmem:[#allocation8 + $0x17e4] ss:$40 sps:$4 sm:$0xff]   ;;  %v14985_v7 = vld [vmem:[#allocation8 + $0x17e0] ss:$40 sps:$4 sm:$0xff]  }
 0x619   :  { %10211 = vmatprep.subr.bf16.mxu1 %v14919_v59  ;;  %12679 = vmatprep.subr.bf16.mxu0 %v14973_v12  ;;  %v14990_v59 = vld [vmem:[#allocation8 + $0x1830] ss:$40 sps:$4 sm:$0xff]   ;;  %v14997_v12 = vld [vmem:[#allocation8 + $0x1884] ss:$40 sps:$4 sm:$0xff]  }
 0x61c   :  { %10212 = vmatpush1.bf16.msra.mxu1 %v14917_v26  ;;  %12680 = vmatpush3.bf16.msra.mxu0 %v14974_v14  ;;  %v5229_v26 = vrot.slane %v15530_v6, %v709_v38  ;;  %v14995_v14 = vld [vmem:[#allocation8 + $0x1880] ss:$40 sps:$4 sm:$0xff]  }
 0x61d   :  { %10213 = vmatprep.subr.bf16.mxu1 %v14922_v16  ;;  %12681 = vmatprep.subr.bf16.mxu0 %v14978_v17  ;;  %v5233_v16 = vrot.slane %v15530_v6, %v713_v11  ;;  %v15002_v17 = vld [vmem:[#allocation8 + $0x18d4] ss:$40 sps:$4 sm:$0xff]   ;;  %v15006_v38 = vld [vmem:[#allocation11 + $0x200] sm:$0xff]  }
 0x61e   :  { %v15008_v11 = vld [vmem:[#allocation11 + $0x208] sm:$0xff]   ;;  %v15009_v6 = vld [vmem:[#allocation11 + $0x250] sm:$0xff]  }
 0x620   :  { %10214 = vmatpush1.bf16.msra.mxu1 %v14920_v18  ;;  %12682 = vmatpush3.bf16.msra.mxu0 %v14979_v20 }
 0x621   :  { %10215 = vmatprep.subr.bf16.mxu1 %v14925_v4  ;;  %12683 = vmatprep.subr.bf16.mxu0 %v14983_v22  ;;  %v15000_v22 = vld [vmem:[#allocation8 + $0x18d0] ss:$40 sps:$4 sm:$0xff]  }
 0x624   :  { %10216 = vmatpush1.bf16.msra.mxu1 %v14923_v28  ;;  %12684 = vmatpush3.bf16.msra.mxu0 %v14984_v23 }
 0x625   :  { %10217 = vmatprep.subr.bf16.mxu1 %v14928_v60  ;;  %12685 = vmatprep.subr.bf16.mxu0 %v14988_v8  ;;  %v15005_v60 = vld [vmem:[#allocation11 + $0x240] sm:$0xff]  }
 0x628   :  { %10218 = vmatpush1.bf16.msra.mxu1 %v14926_v24  ;;  %12686 = vmatpush3.bf16.msra.mxu0 %v14989_v25 }
 0x629   :  { %10219 = vmatprep.subr.bf16.mxu1 %v14931_v13  ;;  %12687 = vmatprep.subr.bf16.mxu0 %v14993_v39 }
 0x62c   :  { %10220 = vmatpush1.bf16.msra.mxu1 %v14929_v48  ;;  %12688 = vmatpush3.bf16.msra.mxu0 %v14994_v54  ;;  %v15010_v48 = vld [vmem:[#allocation11 + $0x210] sm:$0xff]   ;;  %v15011_v54 = vld [vmem:[#allocation11 + $0x258] sm:$0xff]  }
 0x62d   :  { %10221 = vmatprep.subr.bf16.mxu1 %v14934_v41  ;;  %12689 = vmatprep.subr.bf16.mxu0 %v14998_v45  ;;  %v15012_v41 = vld [vmem:[#allocation11 + $0x218] sm:$0xff]   ;;  %v15013_v45 = vld [vmem:[#allocation11 + $0x260] sm:$0xff]  }
 0x630   :  { %10222 = vmatpush1.bf16.msra.mxu1 %v14932_v32  ;;  %12690 = vmatpush3.bf16.msra.mxu0 %v14999_v35  ;;  %v15014_v32 = vld [vmem:[#allocation11 + $0x220] sm:$0xff]   ;;  %v15015_v35 = vld [vmem:[#allocation11 + $0x268] sm:$0xff]  }
 0x631   :  { %10223 = vmatprep.subr.bf16.mxu1 %v14937_v33  ;;  %12691 = vmatprep.subr.bf16.mxu0 %v15003_v50 }
 0x634   :  { %10224 = vmatpush1.bf16.msra.mxu1 %v14935_v36  ;;  %12692 = vmatpush3.bf16.msra.mxu0 %v15004_v37 }
 0x635   :  { %10225 = vmatprep.subr.bf16.mxu1 %v14940_v5 }
 0x638   :  { %10226 = vmatpush1.bf16.msra.mxu1 %v14938_v42  ;;  %v12530_v42 = vld [vmem:[#allocation13] ss:$0 sm:$0xff] }
 0x639   :  { %10236 = vmatprep.subr.bf16.mxu1 %v14943_v47 }
 0x63b   :  { %10228 = vmatmul.mubr.bf16.vlgmr.msra.gmra.mrb[16].mxu1 %v15480_v15  ;;  %v14956_v15 = vld [vmem:[#allocation8 + $0x15b0] ss:$40 sps:$4 sm:$0xff]  }
 0x63c   :  { %10237 = vmatpush1.bf16.msra.mxu1 %v14941_v30  ;;  %10268 = vmatprep.mubr.bf16.mxu1 %v15491_v44  ;;  %v14959_v44 = vld [vmem:[#allocation8 + $0x1600] ss:$40 sps:$4 sm:$0xff]  }
 0x63d   :  { %10238 = vmatprep.subr.bf16.mxu1 %v14946_v52 }
 0x640   :  { %10239 = vmatpush1.bf16.msra.mxu1 %v14944_v53 }
 0x641   :  { %10240 = vmatprep.subr.bf16.mxu1 %v14949_v46 }
 0x644   :  { %10241 = vmatpush1.bf16.msra.mxu1 %v14947_v55 }
 0x645   :  { %10242 = vmatprep.subr.bf16.mxu1 %v14952_v43 }
 0x648   :  { %10243 = vmatpush1.bf16.msra.mxu1 %v14950_v49  ;;  %v15017_v49 = vld [vmem:[#allocation11 + $0x270] sm:$0xff]  }
 0x649   :  { %10244 = vmatprep.subr.bf16.mxu1 %v14955_v56  ;;  %v15018_v56 = vld [vmem:[#allocation11 + $0x230] sm:$0xff]  }
 0x64c   :  { %10245 = vmatpush1.bf16.msra.mxu1 %v14953_v29  ;;  %v15019_v29 = vld [vmem:[#allocation11 + $0x278] sm:$0xff]  }
 0x64d   :  { %10246 = vmatprep.subr.bf16.mxu1 %v14958_v31  ;;  %v15020_v31 = vld [vmem:[#allocation11 + $0x238] sm:$0xff]  }
 0x650   :  { %10247 = vmatpush1.bf16.msra.mxu1 %v14956_v15 }
 0x651   :  { %10248 = vmatprep.subr.bf16.mxu1 %v14961_v57 }
 0x654   :  { %10249 = vmatpush1.bf16.msra.mxu1 %v14959_v44 }
 0x655   :  { %10250 = vmatprep.subr.bf16.mxu1 %v14964_v58 }
 0x658   :  { %10251 = vmatpush1.bf16.msra.mxu1 %v14962_v61 }
 0x659   :  { %10252 = vmatprep.subr.bf16.mxu1 %v14967_v62 }
 0x65c   :  { %10253 = vmatpush1.bf16.msra.mxu1 %v14965_v63  ;;  %v5199_v63 = vld [vmem:[#allocation10 + $0x8] sm:$0x3] }
 0x65d   :  { %10254 = vmatprep.subr.bf16.mxu1 %v14972_v10  ;;  %v5237_v10 = vrot.slane %v5199_v63, %v15420_v2 }
 0x660   :  { %10255 = vmatpush1.bf16.msra.mxu1 %v14970_v0  ;;  %v5241_v0 = vrot.slane %v5199_v63, %v15405_v40 }
 0x661   :  { %10256 = vmatprep.subr.bf16.mxu1 %v14977_v27 }
 0x664   :  { %10257 = vmatpush1.bf16.msra.mxu1 %v14975_v21 }
 0x665   :  { %10258 = vmatprep.subr.bf16.mxu1 %v14982_v9 }
 0x668   :  { %10259 = vmatpush1.bf16.msra.mxu1 %v14980_v1 }
 0x669   :  { %10260 = vmatprep.subr.bf16.mxu1 %v14987_v3 }
 0x66c   :  { %10261 = vmatpush1.bf16.msra.mxu1 %v14985_v7 }
 0x66d   :  { %10262 = vmatprep.subr.bf16.mxu1 %v14992_v19 }
 0x670   :  { %10263 = vmatpush1.bf16.msra.mxu1 %v14990_v59 }
 0x671   :  { %10264 = vmatprep.subr.bf16.mxu1 %v14997_v12 }
 0x673   :  { %v10065_v18 = vpop.f32.mrb[16].mxu0 }
 0x674   :  { %v12737_v20 = vadd.f32 %v10065_v18, %v5229_v26  ;;  %v10067_v4 = vpop.f32.mrb[17].mxu0  ;;  %10265 = vmatpush1.bf16.msra.mxu1 %v14995_v14 }
 0x675   :  { %v12738_v28 = vadd.f32 %v10067_v4, %v5233_v16  ;;  %v10069_v23 = vpop.f32.mrb[18].mxu0  ;;  %10266 = vmatprep.subr.bf16.mxu1 %v15002_v17 }
 0x676   :  { %v10283_v8 = vmax.f32 %v12737_v20, 0.0  ;;  %v10070_v24 = vpop.f32.mrb[19].mxu0 }
 0x677   :  { %v10284_v25 = vmax.f32 %v12738_v28, 0.0 }
 0x678   :  { %10267 = vmatpush1.bf16.msra.mxu1 %v15000_v22  ;;  %v10293_v39 = vpack.c.bf16 %v10283_v8, %v10283_v8 }
 0x679   :  { %v10294_v13 = vpack.c.bf16 %v10284_v25, %v10284_v25  ;;  %12699 = vmatprep.subr.bf16.mxu1 %v15005_v60 }
 0x67b   :  { %10269 = vmatmul.mubr.bf16.vlgmr.msra.gmra.mrb[16].mxu1 %v15493_v51  ;;  %11096 = vmatprep.mubr.bf16.mxu0 %v10294_v13  ;;  %v15016_v51 = vld [vmem:[#allocation11 + $0x228] sm:$0xff]  }
 0x67c   :  { %11097 = vmatmul.mubr.bf16.vlgmr.msra.gmra.mrb[32].mxu0 %v10293_v39  ;;  %12700 = vmatpush3.bf16.msra.mxu1 %v15006_v38 }
 0x67d   :  { %12701 = vmatprep.subr.bf16.mxu1 %v15007_v34 }
 0x680   :  { %12702 = vmatpush3.bf16.msra.mxu1 %v15008_v11 }
 0x681   :  { %12703 = vmatprep.subr.bf16.mxu1 %v15009_v6 }
 0x684   :  { %12704 = vmatpush3.bf16.msra.mxu1 %v15010_v48 }
 0x685   :  { %12705 = vmatprep.subr.bf16.mxu1 %v15011_v54 }
 0x688   :  { %12706 = vmatpush3.bf16.msra.mxu1 %v15012_v41 }
 0x689   :  { %12707 = vmatprep.subr.bf16.mxu1 %v15013_v45 }
 0x68c   :  { %12708 = vmatpush3.bf16.msra.mxu1 %v15014_v32 }
 0x68d   :  { %12709 = vmatprep.subr.bf16.mxu1 %v15015_v35 }
 0x690   :  { %12710 = vmatpush3.bf16.msra.mxu1 %v15016_v51 }
 0x691   :  { %12711 = vmatprep.subr.bf16.mxu1 %v15017_v49 }
 0x693   :  { %v12627_v33 = vpop.f32.mrb[20].mxu0 }
 0x694   :  { %v12628_v50 = vpop.f32.mrb[21].mxu0  ;;  %12712 = vmatpush3.bf16.msra.mxu1 %v15018_v56 }
 0x695   :  { %v12629_v36 = vadd.f32 %v12628_v50, %v12627_v33  ;;  %v12630_v37 = vpop.f32.mrb[22].mxu0  ;;  %12713 = vmatprep.subr.bf16.mxu1 %v15019_v29 }
 0x696   :  { %v12631_v5 = vpop.f32.mrb[23].mxu0 }
 0x697   :  { %v10979_v52 = vadd.f32 %v12629_v36, %v12530_v42 }
 0x698   :  { %12714 = vmatpush3.bf16.msra.mxu1 %v15020_v31 }
 0x6b3   :  { %v12649_v47 = vpop.f32.mrb[24].mxu0 }
 0x6b4   :  { %v12650_v30 = vpop.f32.mrb[25].mxu0 }
 0x6b5   :  { %v12651_v53 = vadd.f32 %v12650_v30, %v12649_v47  ;;  %v12652_v46 = vpop.f32.mrb[26].mxu0 }
 0x6b6   :  { %v12653_v55 = vpop.f32.mrb[27].mxu0 }
 0x6b7   :  { %v11019_v43 = vadd.f32 %v12651_v53, %v10979_v52 }
 0x6ea   :  { %v12671_v15 = vpop.f32.mrb[28].mxu0 }
 0x6eb   :  { %v12672_v57 = vpop.f32.mrb[29].mxu0 }
 0x6ec   :  { %v12673_v44 = vadd.f32 %v12672_v57, %v12671_v15  ;;  %v12674_v58 = vpop.f32.mrb[30].mxu0 }
 0x6ed   :  { %v12675_v61 = vpop.f32.mrb[31].mxu0 }
 0x6ee   :  { %v11059_v62 = vadd.f32 %v12673_v44, %v11019_v43 }
 0x74e   :  { %v10270_v27 = vpop.f32.mrb[16].mxu1 }
 0x74f   :  { %v12739_v21 = vadd.f32 %v10270_v27, %v5237_v10  ;;  %v10272_v9 = vpop.f32.mrb[17].mxu1  ;;  %v12693_v1 = vpop.f32.mrb[32].mxu0 }
 0x750   :  { %v12740_v3 = vadd.f32 %v10272_v9, %v5241_v0  ;;  %v10274_v7 = vpop.f32.mrb[18].mxu1  ;;  %v12694_v19 = vpop.f32.mrb[33].mxu0 }
 0x751   :  { %v10285_v59 = vmax.f32 %v12739_v21, 0.0  ;;  %v12695_v12 = vadd.f32 %v12694_v19, %v12693_v1  ;;  %v10275_v26 = vpop.f32.mrb[19].mxu1  ;;  %v12696_v14 = vpop.f32.mrb[34].mxu0 }
 0x752   :  { %v10286_v16 = vmax.f32 %v12740_v3, 0.0  ;;  %v12697_v17 = vpop.f32.mrb[35].mxu0 }
 0x753   :  { %v11099_v18 = vadd.f32 %v12695_v12, %v11059_v62  ;;  %v10295_v4 = vpack.c.bf16 %v10285_v59, %v10285_v59 }
 0x754   :  { %v10296_v20 = vpack.c.bf16 %v10286_v16, %v10286_v16 }
 0x756   :  { %11136 = vmatprep.mubr.bf16.mxu1 %v10296_v20 }
 0x757   :  { %11137 = vmatmul.mubr.bf16.vlgmr.msra.gmra.mrb[20].mxu1 %v10295_v4 }
 0x82a   :  { %v12715_v2 = vpop.f32.mrb[20].mxu1 }
 0x82b   :  { %v12716_v40 = vpop.f32.mrb[21].mxu1 }
 0x82c   :  { %v12717_v22 = vadd.f32 %v12716_v40, %v12715_v2  ;;  %v12718_v28 = vpop.f32.mrb[22].mxu1 }
 0x82d   :  { %v12719_v23 = vpop.f32.mrb[23].mxu1 }
 0x82e   :  { %v11139_v60 = vadd.f32 %v12717_v22, %v11099_v18 }
 0x830   :  { %11144 = vst [vmem:[#allocation14] sm:$0xff] %v11139_v60 }
 0x831   :  { %15190 = shalt.err (!%p15187_p4)
}
 0x832   :  { %s15191_s11 = scalar_lea.hbm %s15587_s7, 128 }
 0x833   :  { %p15192_p5 = scmp.ne.s32.totalorder %s15587_s7, %s15191_s11  ;;  %p15195_p6 = scmp.lt.u32.totalorder %s15191_s11, %s15587_s7 }
 0x835   :  { %p15197_p7 = pnand %p15195_p6, %p15192_p5 }
 0x837   :  { %15200 = shalt.err (!%p15197_p7)
}
 0x838   :  { %11154 = dma.vmem_to_hbm [thread:$0]  %s11152_s13, 128, %s15587_s7, [#allocation4]  }
 0x839   :  { %15209 = dma.done.wait [#allocation4], 128  }
 0x83a   :  { %15210 = vsyncadd [#allocation4], 4294967168 }
 0x83b   :  { %11158 = vsyncpa [#allocation3], 1 }
 0x83c   :  { %11159 = vsyncpa [#allocation6], 1 }
 0x83d   :  { %11160 = vsyncpa [#allocation9], 1 }
 0x83e   :  { %11161 = vsyncpa [#allocation12], 1 }
 0x83f   :  { %11162 = vsyncpa [#allocation4], 1 }

</bundles_post_ra>
